<compile_context>
chip_gen: v5e
topology: v5e:2x2
jax: 0.10.0
libtpu: 0.0.40
codegen_flags: <defaults>
</compile_context>

<pallas_src>
import functools

import numpy as np
import jax
import jax.numpy as jnp
from jax import lax
from jax.experimental import pallas as pl
from jax.experimental.pallas import tpu as pltpu

N_CASCADE = 5      # DC-CNN cascades
N_LAYERS = 5       # conv layers per cascade
FEAT = 8           # padded channel width used by the in-kernel matmuls


# ----------------------------------------------------------------------------
# Host-side constants (built once per shape, become XLA constants under jit).
# ----------------------------------------------------------------------------
def _dft_block_mats(H, W):
    """Ortho-normalised DFT matrices in block-complex form."""
    def mats(n):
        k = np.arange(n)
        ang = -2.0 * np.pi * np.outer(k, k) / n
        s = 1.0 / np.sqrt(n)
        return np.cos(ang) * s, np.sin(ang) * s

    fhr, fhi = mats(H)
    fwr, fwi = mats(W)
    mh_f = np.block([[fhr, -fhi], [fhi, fhr]])      # forward row-DFT   (2H, 2H)
    mh_i = np.block([[fhr, fhi], [-fhi, fhr]])      # inverse row-DFT   (2H, 2H)
    nw = np.concatenate([fwr, fwi], axis=1)         # [Fwr | Fwi]       (W, 2W)
    return (jnp.asarray(mh_f, jnp.float32),
            jnp.asarray(mh_i, jnp.float32),
            jnp.asarray(nw, jnp.float32))


def _edge_masks(H, W):
    """Row-wrap masks for the flat 'same'-conv taps: (2, H*W)."""
    j = np.arange(H * W) % W
    ml = (j != 0).astype(np.float32)        # kills wrapped reads for kw-shift = -1
    mr = (j != W - 1).astype(np.float32)    # kills wrapped reads for kw-shift = +1
    return jnp.asarray(np.stack([ml, mr], axis=0))


# ----------------------------------------------------------------------------
# In-kernel block-complex 2-D DFT helpers (operate on [Xr; Xi] stacked (2H, W)).
# ----------------------------------------------------------------------------
def _fft2_block(z, mh_f, nw, H, W):
    a = jnp.dot(mh_f, z, preferred_element_type=jnp.float32)     # (2H, W)
    p = jnp.dot(a, nw, preferred_element_type=jnp.float32)       # (2H, 2W)
    kr = p[0:H, 0:W] - p[H:2 * H, W:2 * W]
    ki = p[0:H, W:2 * W] + p[H:2 * H, 0:W]
    return kr, ki


def _ifft2_block(z, mh_i, nw, H, W):
    b = jnp.dot(mh_i, z, preferred_element_type=jnp.float32)     # (2H, W)
    p = jnp.dot(b, nw, preferred_element_type=jnp.float32)       # (2H, 2W)
    yr = p[0:H, 0:W] + p[H:2 * H, W:2 * W]
    yi = p[H:2 * H, 0:W] - p[0:H, W:2 * W]
    return yr, yi


# ----------------------------------------------------------------------------
# flat (2, L) <-> stacked (2H, W) bridge (only the bulk-reshape path is lane-dense;
# small / unaligned shapes use short row loops).
# ----------------------------------------------------------------------------
def _stacked_to_flat(x_ref, xg_ref, H, W, G):
    """xg[0:2, G:G+L] = flatten(x_ref (2H, W))."""
    L = H * W
    if W % 128 == 0:
        xg_ref[0:2, G:G + L] = x_ref[...].reshape(2, L)
    elif H <= 32:
        for i in range(H):
            xg_ref[0:1, G + i * W:G + (i + 1) * W] = x_ref[i:i + 1, :]
            xg_ref[1:2, G + i * W:G + (i + 1) * W] = x_ref[H + i:H + i + 1, :]
    else:
        def body(i, carry):
            xg_ref[0:1, pl.ds(G + i * W, W)] = x_ref[pl.ds(i, 1), :]
            xg_ref[1:2, pl.ds(G + i * W, W)] = x_ref[pl.ds(H + i, 1), :]
            return carry
        lax.fori_loop(0, H, body, 0)


def _flat_to_stacked_add(h, x_ref, xg_ref, H, W, G):
    """x_ref (2H, W) += unflatten(h (2, L)) — residual add fused with the relayout."""
    L = H * W
    if W % 128 == 0:
        x_ref[...] = x_ref[...] + h.reshape(2 * H, W)
    elif H <= 32:
        for i in range(H):
            x_ref[i:i + 1, :] = x_ref[i:i + 1, :] + h[0:1, i * W:(i + 1) * W]
            x_ref[H + i:H + i + 1, :] = (x_ref[H + i:H + i + 1, :]
                                         + h[1:2, i * W:(i + 1) * W])
    else:
        xg_ref[0:2, G:G + L] = h
        def body(i, carry):
            x_ref[pl.ds(i, 1), :] = (x_ref[pl.ds(i, 1), :]
                                     + xg_ref[0:1, pl.ds(G + i * W, W)])
            x_ref[pl.ds(H + i, 1), :] = (x_ref[pl.ds(H + i, 1), :]
                                         + xg_ref[1:2, pl.ds(G + i * W, W)])
            return carry
        lax.fori_loop(0, H, body, 0)


# ----------------------------------------------------------------------------
# Single fused kernel: initial recon (c == 0) + one cascade per grid step.
# ----------------------------------------------------------------------------
def _fused_kernel(mh_f_ref, mh_i_ref, nw_ref, em_ref, w_ref, b_ref,
                  mask_ref, gdc_ref, gloss_ref, gt_ref,
                  out_ref, dcm_ref, lossm_ref,
                  xg_ref, x_ref, k0_ref, dc_ref, *, H, W, G):
    L = H * W
    c = pl.program_id(1)

    mh_f = mh_f_ref[...]
    mh_i = mh_i_ref[...]
    nw = nw_ref[...]

    # ---- per-batch-element init: masks, k0 = fft2(gt)*dc, x0 = ifft2(k0) ----
    @pl.when(c == 0)
    def _init():
        m = mask_ref[0, :, :]
        dc = gdc_ref[0, :, :] * m
        dc_ref[...] = dc
        dcm_ref[0, :, :] = dc
        lossm_ref[0, :, :] = gloss_ref[0, :, :] * m

        kr, ki = _fft2_block(gt_ref[0, :, :], mh_f, nw, H, W)
        k0 = dc * jnp.concatenate([kr, ki], axis=0)
        k0_ref[...] = k0
        yr, yi = _ifft2_block(k0, mh_i, nw, H, W)
        x_ref[...] = jnp.concatenate([yr, yi], axis=0)

        # Zero the guarded CNN buffer ONCE per batch element (guards stay zero;
        # main rows are fully rewritten by every conv layer afterwards).
        xg_ref[...] = jnp.zeros_like(xg_ref)

    # ---- bring the carried image (stacked) into the flat CNN input rows ----
    _stacked_to_flat(x_ref, xg_ref, H, W, G)

    # ---- 5-layer 3x3 "same" CNN: per-tap accumulating (8,8)@(8,L) MXU matmuls ----
    mask_l = em_ref[0:1, :]      # zero where j == 0      (column shift -1)
    mask_r = em_ref[1:2, :]      # zero where j == W - 1  (column shift +1)
    h = None
    for l in range(N_LAYERS):
        acc = None
        for t in range(9):
            dkh = t // 3 - 1
            dkw = t % 3 - 1
            s = dkh * W + dkw
            blk = xg_ref[:, G + s:G + s + L]                   # (FEAT, L) shifted view
            if dkw == -1:
                blk = blk * mask_l
            elif dkw == 1:
                blk = blk * mask_r
            p = jnp.dot(w_ref[l * 9 + t], blk,
                        preferred_element_type=jnp.float32)    # (FEAT, L)
            acc = p if acc is None else acc + p
        acc = acc + b_ref[l]                                   # (FEAT, 1) broadcast
        if l < N_LAYERS - 1:
            xg_ref[:, G:G + L] = jnp.maximum(acc, 0.0)         # next-layer input (VMEM)
        else:
            h = acc[0:2, :]                                    # final 2 channels

    # ---- residual connection fused with flat -> stacked relayout ----
    _flat_to_stacked_add(h, x_ref, xg_ref, H, W, G)

    # ---- hard data consistency: ifft2((1 - m) * fft2(x) + m * k0) ----
    kr, ki = _fft2_block(x_ref[...], mh_f, nw, H, W)
    k = jnp.concatenate([kr, ki], axis=0)
    dc = dc_ref[...]
    k = (1.0 - dc) * k + dc * k0_ref[...]
    yr, yi = _ifft2_block(k, mh_i, nw, H, W)
    y = jnp.concatenate([yr, yi], axis=0)
    x_ref[...] = y                                             # carry to next cascade

    @pl.when(c == pl.num_programs(1) - 1)
    def _store_out():
        out_ref[0, :, :] = y


# ----------------------------------------------------------------------------
# ParallelNetwork.forward — baseline method, train mode (one pallas_call total).
# ----------------------------------------------------------------------------
def parallel_network_forward(mask, gt, gdc_mask, gloss_mask, w_all, b_all):
    B, _, H, W = mask.shape
    L = H * W
    G = ((W + 1 + 127) // 128) * 128            # guard width, multiple of 128, >= W+1
    n_casc = w_all.shape[0] // (N_LAYERS * 9)

    mh_f, mh_i, nw = _dft_block_mats(H, W)
    em = _edge_masks(H, W)

    # Free (contiguous) reshapes only — no transposes, no pads in the wrapper.
    mask_s = mask.reshape(B, 2 * H, W)
    gdc_s = gdc_mask.reshape(B, 2 * H, W)
    gloss_s = gloss_mask.reshape(B, 2 * H, W)
    gt_s = gt.reshape(B, 2 * H, W)

    img_spec = pl.BlockSpec((1, 2 * H, W), lambda b, c: (b, 0, 0))

    def const_spec(shp):
        return pl.BlockSpec(shp, lambda b, c: (0,) * len(shp))

    out_sd = jax.ShapeDtypeStruct((B, 2 * H, W), jnp.float32)
    kernel = functools.partial(_fused_kernel, H=H, W=W, G=G)

    out_s, dcm_s, lossm_s = pl.pallas_call(
        kernel,
        out_shape=(out_sd, out_sd, out_sd),
        grid=(B, n_casc),
        in_specs=[
            const_spec((2 * H, 2 * H)),                                   # mh_f
            const_spec((2 * H, 2 * H)),                                   # mh_i
            const_spec((W, 2 * W)),                                       # nw
            const_spec((2, L)),                                           # edge masks
            pl.BlockSpec((N_LAYERS * 9, FEAT, FEAT), lambda b, c: (c, 0, 0)),  # weights
            pl.BlockSpec((N_LAYERS, FEAT, 1), lambda b, c: (c, 0, 0)),         # biases
            img_spec,                                                     # mask
            img_spec,                                                     # gdc
            img_spec,                                                     # gloss
            img_spec,                                                     # gt
        ],
        out_specs=(img_spec, img_spec, img_spec),
        scratch_shapes=[
            pltpu.VMEM((FEAT, L + 2 * G), jnp.float32),   # guarded flat activations
            pltpu.VMEM((2 * H, W), jnp.float32),          # carried image x (stacked)
            pltpu.VMEM((2 * H, W), jnp.float32),          # k0 (stacked)
            pltpu.VMEM((2 * H, W), jnp.float32),          # dc mask (stacked)
        ],
        compiler_params=pltpu.CompilerParams(
            dimension_semantics=("parallel", "arbitrary"),
            vmem_limit_bytes=48 * 1024 * 1024),
    )(mh_f, mh_i, nw, em, w_all, b_all, mask_s, gdc_s, gloss_s, gt_s)

    return (out_s.reshape(B, 2, H, W),
            lossm_s.reshape(B, 2, H, W),
            dcm_s.reshape(B, 2, H, W),
            mask)


# ----------------------------------------------------------------------------
# Parameters (DC-CNN cascade, n_cascade=5) and packing to the kernel layout.
# ----------------------------------------------------------------------------
def init_cascade_params(key, n_cascade=N_CASCADE, feat=FEAT):
    chans = [2, feat, feat, feat, feat, 2]
    params = []
    for _ in range(n_cascade):
        layers = []
        for li in range(len(chans) - 1):
            key, k1 = jax.random.split(key)
            cin, cout = chans[li], chans[li + 1]
            w = jax.random.normal(k1, (3, 3, cin, cout), jnp.float32) \
                * (1.0 / np.sqrt(9.0 * cin))
            b = jnp.zeros((cout,), jnp.float32)
            layers.append((w, b))
        params.append(layers)
    return params


def pack_cascade_params(params, feat=FEAT):
    """HWIO (3,3,Cin,Cout) weights -> per-tap (n_casc*n_layers*9, feat, feat) matmul
    form (zero-padded to feat x feat) and biases (n_casc*n_layers, feat, 1)."""
    w_rows, b_rows = [], []
    for layers in params:
        for (w, b) in layers:
            cin, cout = w.shape[2], w.shape[3]
            for kh in range(3):
                for kw in range(3):
                    wt = jnp.zeros((feat, feat), jnp.float32)
                    wt = wt.at[:cout, :cin].set(jnp.transpose(w[kh, kw]))  # (cout, cin)
                    w_rows.append(wt)
            bp = jnp.zeros((feat, 1), jnp.float32).at[:cout, 0].set(b)
            b_rows.append(bp)
    return jnp.stack(w_rows), jnp.stack(b_rows)


# ----------------------------------------------------------------------------
# Pure-JAX reference (same math, XLA ops) used as a correctness cross-check.
# ----------------------------------------------------------------------------
def _reference_forward(mask, gt, gdc_mask, gloss_mask, params):
    def fft2c(x):
        k = jnp.fft.fft2(x[:, 0] + 1j * x[:, 1], norm='ortho')
        return jnp.stack([k.real, k.imag], axis=1)

    def ifft2c(x):
        k = jnp.fft.ifft2(x[:, 0] + 1j * x[:, 1], norm='ortho')
        return jnp.stack([k.real, k.imag], axis=1)

    dc_mask = gdc_mask * mask
    loss_mask = gloss_mask * mask
    k0 = fft2c(gt) * dc_mask
    x = ifft2c(k0)
    for layers in params:
        h = x
        for li, (w, b) in enumerate(layers):
            h = jax.lax.conv_general_dilated(
                h, w, (1, 1), 'SAME',
                dimension_numbers=('NCHW', 'HWIO', 'NCHW'),
                precision=jax.lax.Precision.HIGHEST)
            h = h + b.reshape(1, -1, 1, 1)
            if li < len(layers) - 1:
                h = jnp.maximum(h, 0.0)
        x = x + h
        k = fft2c(x)
        k = (1.0 - dc_mask) * k + dc_mask * k0
        x = ifft2c(k)
    return x, loss_mask, dc_mask, mask


if __name__ == "__main__":
    key = jax.random.PRNGKey(0)
    B, H, W = 2, 16, 16
    k_mask, k_gt, k_gdc, k_param = jax.random.split(key, 4)

    # under-sampling mask, repeated over the real/imag channel like the module
    m1 = (jax.random.uniform(k_mask, (B, 1, H, W)) > 0.5).astype(jnp.float32)
    mask = jnp.concatenate([m1, m1], axis=1)                       # (B, 2, H, W)
    gt = jax.random.normal(k_gt, (B, 2, H, W), jnp.float32)        # complex as 2ch
    gdc_mask = (jax.random.uniform(k_gdc, (B, 2, H, W)) > 0.3).astype(jnp.float32)
    gloss_mask = 1.0 - gdc_mask

    params = init_cascade_params(k_param)
    w_all, b_all = pack_cascade_params(params)    # (225, 8, 8), (25, 8, 1)

    fwd = jax.jit(parallel_network_forward)
    out_img, loss_mask, dc_mask, mask_out = fwd(
        mask, gt, gdc_mask, gloss_mask, w_all, b_all)
    jax.block_until_ready((out_img, loss_mask, dc_mask, mask_out))
    assert out_img.shape == (B, 2, H, W)

    ref_out, ref_loss, ref_dc, _ = _reference_forward(
        mask, gt, gdc_mask, gloss_mask, params)
    np.testing.assert_allclose(np.asarray(dc_mask), np.asarray(ref_dc),
                               rtol=1e-5, atol=1e-5)
    np.testing.assert_allclose(np.asarray(loss_mask), np.asarray(ref_loss),
                               rtol=1e-5, atol=1e-5)
    # Tolerance kept at 1e-2: the in-kernel MXU f32 matmuls may take a reduced-precision
    # (bf16-pass) multiply path depending on generation/compiler defaults.
    np.testing.assert_allclose(np.asarray(out_img), np.asarray(ref_out),
                               rtol=1e-2, atol=1e-2)
    print("KERNEL_OK")
</pallas_src>

<mosaic_0001>
module attributes {stable_mosaic.version = 11 : i64} {
  func.func @_fused_kernel(%arg0: i32, %arg1: i32, %arg2: memref<32x32xf32, #tpu.memory_space<vmem>>, %arg3: memref<32x32xf32, #tpu.memory_space<vmem>>, %arg4: memref<16x32xf32, #tpu.memory_space<vmem>>, %arg5: memref<2x256xf32, #tpu.memory_space<vmem>>, %arg6: memref<45x8x8xf32, #tpu.memory_space<vmem>>, %arg7: memref<5x8x1xf32, #tpu.memory_space<vmem>>, %arg8: memref<1x32x16xf32, #tpu.memory_space<vmem>>, %arg9: memref<1x32x16xf32, #tpu.memory_space<vmem>>, %arg10: memref<1x32x16xf32, #tpu.memory_space<vmem>>, %arg11: memref<1x32x16xf32, #tpu.memory_space<vmem>>, %arg12: memref<1x32x16xf32, #tpu.memory_space<vmem>>, %arg13: memref<1x32x16xf32, #tpu.memory_space<vmem>>, %arg14: memref<1x32x16xf32, #tpu.memory_space<vmem>>, %arg15: memref<8x512xf32, #tpu.memory_space<vmem>>, %arg16: memref<32x16xf32, #tpu.memory_space<vmem>>, %arg17: memref<32x16xf32, #tpu.memory_space<vmem>>, %arg18: memref<32x16xf32, #tpu.memory_space<vmem>>) attributes {dimension_semantics = [#tpu.dimension_semantics<parallel>, #tpu.dimension_semantics<arbitrary>], iteration_bounds = array<i64: 2, 5>, scalar_prefetch = 0 : i64, scratch_operands = 4 : i64, tpu.core_type = #tpu.core_type<tc>, window_params = [{pipeline_mode = #tpu.pipeline_mode<synchronous>, transform_indices = @transform_0, window_bounds = array<i64: 32, 32>}, {pipeline_mode = #tpu.pipeline_mode<synchronous>, transform_indices = @transform_1, window_bounds = array<i64: 32, 32>}, {pipeline_mode = #tpu.pipeline_mode<synchronous>, transform_indices = @transform_2, window_bounds = array<i64: 16, 32>}, {pipeline_mode = #tpu.pipeline_mode<synchronous>, transform_indices = @transform_3, window_bounds = array<i64: 2, 256>}, {transform_indices = @transform_4, window_bounds = array<i64: 45, 8, 8>}, {transform_indices = @transform_5, window_bounds = array<i64: 5, 8, 1>}, {transform_indices = @transform_6, window_bounds = array<i64: 1, 32, 16>}, {transform_indices = @transform_7, window_bounds = array<i64: 1, 32, 16>}, {transform_indices = @transform_8, window_bounds = array<i64: 1, 32, 16>}, {transform_indices = @transform_9, window_bounds = array<i64: 1, 32, 16>}, {transform_indices = @transform_10, window_bounds = array<i64: 1, 32, 16>}, {transform_indices = @transform_11, window_bounds = array<i64: 1, 32, 16>}, {transform_indices = @transform_12, window_bounds = array<i64: 1, 32, 16>}]} {
    %c0 = arith.constant 0 : index
    %c0_0 = arith.constant 0 : index
    %0 = vector.load %arg2[%c0, %c0_0] : memref<32x32xf32, #tpu.memory_space<vmem>>, vector<32x32xf32>
    %c0_1 = arith.constant 0 : index
    %c0_2 = arith.constant 0 : index
    %1 = vector.load %arg3[%c0_1, %c0_2] : memref<32x32xf32, #tpu.memory_space<vmem>>, vector<32x32xf32>
    %c0_3 = arith.constant 0 : index
    %c0_4 = arith.constant 0 : index
    %2 = vector.load %arg4[%c0_3, %c0_4] : memref<16x32xf32, #tpu.memory_space<vmem>>, vector<16x32xf32>
    %c0_i32 = arith.constant 0 : i32
    %3 = arith.cmpi eq, %arg1, %c0_i32 : i32
    %4 = arith.extui %3 : i1 to i32
    %c0_i32_5 = arith.constant 0 : i32
    %5 = arith.cmpi ne, %4, %c0_i32_5 : i32
    scf.if %5 {
      %c0_509 = arith.constant 0 : index
      %c0_510 = arith.constant 0 : index
      %c0_511 = arith.constant 0 : index
      %543 = vector.load %arg8[%c0_509, %c0_510, %c0_511] : memref<1x32x16xf32, #tpu.memory_space<vmem>>, vector<1x32x16xf32>
      %544 = vector.shape_cast %543 : vector<1x32x16xf32> to vector<32x16xf32>
      %c0_512 = arith.constant 0 : index
      %c0_513 = arith.constant 0 : index
      %c0_514 = arith.constant 0 : index
      %545 = vector.load %arg9[%c0_512, %c0_513, %c0_514] : memref<1x32x16xf32, #tpu.memory_space<vmem>>, vector<1x32x16xf32>
      %546 = vector.shape_cast %545 : vector<1x32x16xf32> to vector<32x16xf32>
      %547 = arith.mulf %546, %544 : vector<32x16xf32>
      %c0_515 = arith.constant 0 : index
      %c0_516 = arith.constant 0 : index
      %548 = vector.load %arg18[%c0_515, %c0_516] : memref<32x16xf32, #tpu.memory_space<vmem>>, vector<32x16xf32>
      tpu.vector_store %arg18[%c0_515, %c0_516], %547 {strides = array<i32>} : memref<32x16xf32, #tpu.memory_space<vmem>>, vector<32x16xf32>,
      %c0_517 = arith.constant 0 : index
      %c0_518 = arith.constant 0 : index
      %c0_519 = arith.constant 0 : index
      %549 = vector.load %arg13[%c0_517, %c0_518, %c0_519] : memref<1x32x16xf32, #tpu.memory_space<vmem>>, vector<1x32x16xf32>
      %550 = vector.shape_cast %549 : vector<1x32x16xf32> to vector<32x16xf32>
      %551 = vector.shape_cast %547 : vector<32x16xf32> to vector<1x32x16xf32>
      tpu.vector_store %arg13[%c0_517, %c0_518, %c0_519], %551 {strides = array<i32>} : memref<1x32x16xf32, #tpu.memory_space<vmem>>, vector<1x32x16xf32>,
      %c0_520 = arith.constant 0 : index
      %c0_521 = arith.constant 0 : index
      %c0_522 = arith.constant 0 : index
      %552 = vector.load %arg10[%c0_520, %c0_521, %c0_522] : memref<1x32x16xf32, #tpu.memory_space<vmem>>, vector<1x32x16xf32>
      %553 = vector.shape_cast %552 : vector<1x32x16xf32> to vector<32x16xf32>
      %554 = arith.mulf %553, %544 : vector<32x16xf32>
      %c0_523 = arith.constant 0 : index
      %c0_524 = arith.constant 0 : index
      %c0_525 = arith.constant 0 : index
      %555 = vector.load %arg14[%c0_523, %c0_524, %c0_525] : memref<1x32x16xf32, #tpu.memory_space<vmem>>, vector<1x32x16xf32>
      %556 = vector.shape_cast %555 : vector<1x32x16xf32> to vector<32x16xf32>
      %557 = vector.shape_cast %554 : vector<32x16xf32> to vector<1x32x16xf32>
      tpu.vector_store %arg14[%c0_523, %c0_524, %c0_525], %557 {strides = array<i32>} : memref<1x32x16xf32, #tpu.memory_space<vmem>>, vector<1x32x16xf32>,
      %c0_526 = arith.constant 0 : index
      %c0_527 = arith.constant 0 : index
      %c0_528 = arith.constant 0 : index
      %558 = vector.load %arg11[%c0_526, %c0_527, %c0_528] : memref<1x32x16xf32, #tpu.memory_space<vmem>>, vector<1x32x16xf32>
      %559 = vector.shape_cast %558 : vector<1x32x16xf32> to vector<32x16xf32>
      %cst_529 = arith.constant dense<0.000000e+00> : vector<32x16xf32>
      %560 = tpu.matmul %0, %559, %cst_529 {dimension_numbers = #tpu.dot_dimension_numbers<[1], [0], [0], [1], [0, 0, 1, 1], [], []>} : vector<32x32xf32>, vector<32x16xf32>, vector<32x16xf32> -> vector<32x16xf32>
      %cst_530 = arith.constant dense<0.000000e+00> : vector<32x32xf32>
      %561 = tpu.matmul %560, %2, %cst_530 {dimension_numbers = #tpu.dot_dimension_numbers<[1], [0], [0], [1], [0, 0, 1, 1], [], []>} : vector<32x16xf32>, vector<16x32xf32>, vector<32x32xf32> -> vector<32x32xf32>
      %562 = vector.extract_strided_slice %561 {offsets = [0, 0], sizes = [16, 16], strides = [1, 1]} : vector<32x32xf32> to vector<16x16xf32>
      %563 = vector.extract_strided_slice %561 {offsets = [16, 16], sizes = [16, 16], strides = [1, 1]} : vector<32x32xf32> to vector<16x16xf32>
      %564 = arith.subf %562, %563 : vector<16x16xf32>
      %565 = vector.extract_strided_slice %561 {offsets = [0, 16], sizes = [16, 16], strides = [1, 1]} : vector<32x32xf32> to vector<16x16xf32>
      %566 = vector.extract_strided_slice %561 {offsets = [16, 0], sizes = [16, 16], strides = [1, 1]} : vector<32x32xf32> to vector<16x16xf32>
      %567 = arith.addf %565, %566 : vector<16x16xf32>
      %568 = tpu.concatenate %564, %567 in 0 : vector<16x16xf32>, vector<16x16xf32> -> vector<32x16xf32>
      %569 = arith.mulf %547, %568 : vector<32x16xf32>
      %c0_531 = arith.constant 0 : index
      %c0_532 = arith.constant 0 : index
      %570 = vector.load %arg17[%c0_531, %c0_532] : memref<32x16xf32, #tpu.memory_space<vmem>>, vector<32x16xf32>
      tpu.vector_store %arg17[%c0_531, %c0_532], %569 {strides = array<i32>} : memref<32x16xf32, #tpu.memory_space<vmem>>, vector<32x16xf32>,
      %cst_533 = arith.constant dense<0.000000e+00> : vector<32x16xf32>
      %571 = tpu.matmul %1, %569, %cst_533 {dimension_numbers = #tpu.dot_dimension_numbers<[1], [0], [0], [1], [0, 0, 1, 1], [], []>} : vector<32x32xf32>, vector<32x16xf32>, vector<32x16xf32> -> vector<32x16xf32>
      %cst_534 = arith.constant dense<0.000000e+00> : vector<32x32xf32>
      %572 = tpu.matmul %571, %2, %cst_534 {dimension_numbers = #tpu.dot_dimension_numbers<[1], [0], [0], [1], [0, 0, 1, 1], [], []>} : vector<32x16xf32>, vector<16x32xf32>, vector<32x32xf32> -> vector<32x32xf32>
      %573 = vector.extract_strided_slice %572 {offsets = [0, 0], sizes = [16, 16], strides = [1, 1]} : vector<32x32xf32> to vector<16x16xf32>
      %574 = vector.extract_strided_slice %572 {offsets = [16, 16], sizes = [16, 16], strides = [1, 1]} : vector<32x32xf32> to vector<16x16xf32>
      %575 = arith.addf %573, %574 : vector<16x16xf32>
      %576 = vector.extract_strided_slice %572 {offsets = [16, 0], sizes = [16, 16], strides = [1, 1]} : vector<32x32xf32> to vector<16x16xf32>
      %577 = vector.extract_strided_slice %572 {offsets = [0, 16], sizes = [16, 16], strides = [1, 1]} : vector<32x32xf32> to vector<16x16xf32>
      %578 = arith.subf %576, %577 : vector<16x16xf32>
      %579 = tpu.concatenate %575, %578 in 0 : vector<16x16xf32>, vector<16x16xf32> -> vector<32x16xf32>
      %c0_535 = arith.constant 0 : index
      %c0_536 = arith.constant 0 : index
      %580 = vector.load %arg16[%c0_535, %c0_536] : memref<32x16xf32, #tpu.memory_space<vmem>>, vector<32x16xf32>
      tpu.vector_store %arg16[%c0_535, %c0_536], %579 {strides = array<i32>} : memref<32x16xf32, #tpu.memory_space<vmem>>, vector<32x16xf32>,
      %cst_537 = arith.constant 0.000000e+00 : f32
      %581 = vector.broadcast %cst_537 : f32 to vector<8x512xf32>
      %c0_538 = arith.constant 0 : index
      %c0_539 = arith.constant 0 : index
      %582 = vector.load %arg15[%c0_538, %c0_539] : memref<8x512xf32, #tpu.memory_space<vmem>>, vector<8x512xf32>
      tpu.vector_store %arg15[%c0_538, %c0_539], %581 {strides = array<i32>} : memref<8x512xf32, #tpu.memory_space<vmem>>, vector<8x512xf32>,
    } else {
    }
    %c0_6 = arith.constant 0 : index
    %c0_7 = arith.constant 0 : index
    %6 = vector.load %arg16[%c0_6, %c0_7] : memref<32x16xf32, #tpu.memory_space<vmem>>, vector<1x16xf32>
    %c0_8 = arith.constant 0 : index
    %c128 = arith.constant 128 : index
    %7 = vector.load %arg15[%c0_8, %c128] : memref<8x512xf32, #tpu.memory_space<vmem>>, vector<1x16xf32>
    tpu.vector_store %arg15[%c0_8, %c128], %6 {strides = array<i32>} : memref<8x512xf32, #tpu.memory_space<vmem>>, vector<1x16xf32>,
    %c16 = arith.constant 16 : index
    %c0_9 = arith.constant 0 : index
    %8 = vector.load %arg16[%c16, %c0_9] : memref<32x16xf32, #tpu.memory_space<vmem>>, vector<1x16xf32>
    %c1 = arith.constant 1 : index
    %c128_10 = arith.constant 128 : index
    %9 = vector.load %arg15[%c1, %c128_10] : memref<8x512xf32, #tpu.memory_space<vmem>>, vector<1x16xf32>
    tpu.vector_store %arg15[%c1, %c128_10], %8 {strides = array<i32>} : memref<8x512xf32, #tpu.memory_space<vmem>>, vector<1x16xf32>,
    %c1_11 = arith.constant 1 : index
    %c0_12 = arith.constant 0 : index
    %10 = vector.load %arg16[%c1_11, %c0_12] : memref<32x16xf32, #tpu.memory_space<vmem>>, vector<1x16xf32>
    %c0_13 = arith.constant 0 : index
    %c144 = arith.constant 144 : index
    %11 = vector.load %arg15[%c0_13, %c144] : memref<8x512xf32, #tpu.memory_space<vmem>>, vector<1x16xf32>
    tpu.vector_store %arg15[%c0_13, %c144], %10 {strides = array<i32>} : memref<8x512xf32, #tpu.memory_space<vmem>>, vector<1x16xf32>,
    %c17 = arith.constant 17 : index
    %c0_14 = arith.constant 0 : index
    %12 = vector.load %arg16[%c17, %c0_14] : memref<32x16xf32, #tpu.memory_space<vmem>>, vector<1x16xf32>
    %c1_15 = arith.constant 1 : index
    %c144_16 = arith.constant 144 : index
    %13 = vector.load %arg15[%c1_15, %c144_16] : memref<8x512xf32, #tpu.memory_space<vmem>>, vector<1x16xf32>
    tpu.vector_store %arg15[%c1_15, %c144_16], %12 {strides = array<i32>} : memref<8x512xf32, #tpu.memory_space<vmem>>, vector<1x16xf32>,
    %c2 = arith.constant 2 : index
    %c0_17 = arith.constant 0 : index
    %14 = vector.load %arg16[%c2, %c0_17] : memref<32x16xf32, #tpu.memory_space<vmem>>, vector<1x16xf32>
    %c0_18 = arith.constant 0 : index
    %c160 = arith.constant 160 : index
    %15 = vector.load %arg15[%c0_18, %c160] : memref<8x512xf32, #tpu.memory_space<vmem>>, vector<1x16xf32>
    tpu.vector_store %arg15[%c0_18, %c160], %14 {strides = array<i32>} : memref<8x512xf32, #tpu.memory_space<vmem>>, vector<1x16xf32>,
    %c18 = arith.constant 18 : index
    %c0_19 = arith.constant 0 : index
    %16 = vector.load %arg16[%c18, %c0_19] : memref<32x16xf32, #tpu.memory_space<vmem>>, vector<1x16xf32>
    %c1_20 = arith.constant 1 : index
    %c160_21 = arith.constant 160 : index
    %17 = vector.load %arg15[%c1_20, %c160_21] : memref<8x512xf32, #tpu.memory_space<vmem>>, vector<1x16xf32>
    tpu.vector_store %arg15[%c1_20, %c160_21], %16 {strides = array<i32>} : memref<8x512xf32, #tpu.memory_space<vmem>>, vector<1x16xf32>,
    %c3 = arith.constant 3 : index
    %c0_22 = arith.constant 0 : index
    %18 = vector.load %arg16[%c3, %c0_22] : memref<32x16xf32, #tpu.memory_space<vmem>>, vector<1x16xf32>
    %c0_23 = arith.constant 0 : index
    %c176 = arith.constant 176 : index
    %19 = vector.load %arg15[%c0_23, %c176] : memref<8x512xf32, #tpu.memory_space<vmem>>, vector<1x16xf32>
    tpu.vector_store %arg15[%c0_23, %c176], %18 {strides = array<i32>} : memref<8x512xf32, #tpu.memory_space<vmem>>, vector<1x16xf32>,
    %c19 = arith.constant 19 : index
    %c0_24 = arith.constant 0 : index
    %20 = vector.load %arg16[%c19, %c0_24] : memref<32x16xf32, #tpu.memory_space<vmem>>, vector<1x16xf32>
    %c1_25 = arith.constant 1 : index
    %c176_26 = arith.constant 176 : index
    %21 = vector.load %arg15[%c1_25, %c176_26] : memref<8x512xf32, #tpu.memory_space<vmem>>, vector<1x16xf32>
    tpu.vector_store %arg15[%c1_25, %c176_26], %20 {strides = array<i32>} : memref<8x512xf32, #tpu.memory_space<vmem>>, vector<1x16xf32>,
    %c4 = arith.constant 4 : index
    %c0_27 = arith.constant 0 : index
    %22 = vector.load %arg16[%c4, %c0_27] : memref<32x16xf32, #tpu.memory_space<vmem>>, vector<1x16xf32>
    %c0_28 = arith.constant 0 : index
    %c192 = arith.constant 192 : index
    %23 = vector.load %arg15[%c0_28, %c192] : memref<8x512xf32, #tpu.memory_space<vmem>>, vector<1x16xf32>
    tpu.vector_store %arg15[%c0_28, %c192], %22 {strides = array<i32>} : memref<8x512xf32, #tpu.memory_space<vmem>>, vector<1x16xf32>,
    %c20 = arith.constant 20 : index
    %c0_29 = arith.constant 0 : index
    %24 = vector.load %arg16[%c20, %c0_29] : memref<32x16xf32, #tpu.memory_space<vmem>>, vector<1x16xf32>
    %c1_30 = arith.constant 1 : index
    %c192_31 = arith.constant 192 : index
    %25 = vector.load %arg15[%c1_30, %c192_31] : memref<8x512xf32, #tpu.memory_space<vmem>>, vector<1x16xf32>
    tpu.vector_store %arg15[%c1_30, %c192_31], %24 {strides = array<i32>} : memref<8x512xf32, #tpu.memory_space<vmem>>, vector<1x16xf32>,
    %c5 = arith.constant 5 : index
    %c0_32 = arith.constant 0 : index
    %26 = vector.load %arg16[%c5, %c0_32] : memref<32x16xf32, #tpu.memory_space<vmem>>, vector<1x16xf32>
    %c0_33 = arith.constant 0 : index
    %c208 = arith.constant 208 : index
    %27 = vector.load %arg15[%c0_33, %c208] : memref<8x512xf32, #tpu.memory_space<vmem>>, vector<1x16xf32>
    tpu.vector_store %arg15[%c0_33, %c208], %26 {strides = array<i32>} : memref<8x512xf32, #tpu.memory_space<vmem>>, vector<1x16xf32>,
    %c21 = arith.constant 21 : index
    %c0_34 = arith.constant 0 : index
    %28 = vector.load %arg16[%c21, %c0_34] : memref<32x16xf32, #tpu.memory_space<vmem>>, vector<1x16xf32>
    %c1_35 = arith.constant 1 : index
    %c208_36 = arith.constant 208 : index
    %29 = vector.load %arg15[%c1_35, %c208_36] : memref<8x512xf32, #tpu.memory_space<vmem>>, vector<1x16xf32>
    tpu.vector_store %arg15[%c1_35, %c208_36], %28 {strides = array<i32>} : memref<8x512xf32, #tpu.memory_space<vmem>>, vector<1x16xf32>,
    %c6 = arith.constant 6 : index
    %c0_37 = arith.constant 0 : index
    %30 = vector.load %arg16[%c6, %c0_37] : memref<32x16xf32, #tpu.memory_space<vmem>>, vector<1x16xf32>
    %c0_38 = arith.constant 0 : index
    %c224 = arith.constant 224 : index
    %31 = vector.load %arg15[%c0_38, %c224] : memref<8x512xf32, #tpu.memory_space<vmem>>, vector<1x16xf32>
    tpu.vector_store %arg15[%c0_38, %c224], %30 {strides = array<i32>} : memref<8x512xf32, #tpu.memory_space<vmem>>, vector<1x16xf32>,
    %c22 = arith.constant 22 : index
    %c0_39 = arith.constant 0 : index
    %32 = vector.load %arg16[%c22, %c0_39] : memref<32x16xf32, #tpu.memory_space<vmem>>, vector<1x16xf32>
    %c1_40 = arith.constant 1 : index
    %c224_41 = arith.constant 224 : index
    %33 = vector.load %arg15[%c1_40, %c224_41] : memref<8x512xf32, #tpu.memory_space<vmem>>, vector<1x16xf32>
    tpu.vector_store %arg15[%c1_40, %c224_41], %32 {strides = array<i32>} : memref<8x512xf32, #tpu.memory_space<vmem>>, vector<1x16xf32>,
    %c7 = arith.constant 7 : index
    %c0_42 = arith.constant 0 : index
    %34 = vector.load %arg16[%c7, %c0_42] : memref<32x16xf32, #tpu.memory_space<vmem>>, vector<1x16xf32>
    %c0_43 = arith.constant 0 : index
    %c240 = arith.constant 240 : index
    %35 = vector.load %arg15[%c0_43, %c240] : memref<8x512xf32, #tpu.memory_space<vmem>>, vector<1x16xf32>
    tpu.vector_store %arg15[%c0_43, %c240], %34 {strides = array<i32>} : memref<8x512xf32, #tpu.memory_space<vmem>>, vector<1x16xf32>,
    %c23 = arith.constant 23 : index
    %c0_44 = arith.constant 0 : index
    %36 = vector.load %arg16[%c23, %c0_44] : memref<32x16xf32, #tpu.memory_space<vmem>>, vector<1x16xf32>
    %c1_45 = arith.constant 1 : index
    %c240_46 = arith.constant 240 : index
    %37 = vector.load %arg15[%c1_45, %c240_46] : memref<8x512xf32, #tpu.memory_space<vmem>>, vector<1x16xf32>
    tpu.vector_store %arg15[%c1_45, %c240_46], %36 {strides = array<i32>} : memref<8x512xf32, #tpu.memory_space<vmem>>, vector<1x16xf32>,
    %c8 = arith.constant 8 : index
    %c0_47 = arith.constant 0 : index
    %38 = vector.load %arg16[%c8, %c0_47] : memref<32x16xf32, #tpu.memory_space<vmem>>, vector<1x16xf32>
    %c0_48 = arith.constant 0 : index
    %c256 = arith.constant 256 : index
    %39 = vector.load %arg15[%c0_48, %c256] : memref<8x512xf32, #tpu.memory_space<vmem>>, vector<1x16xf32>
    tpu.vector_store %arg15[%c0_48, %c256], %38 {strides = array<i32>} : memref<8x512xf32, #tpu.memory_space<vmem>>, vector<1x16xf32>,
    %c24 = arith.constant 24 : index
    %c0_49 = arith.constant 0 : index
    %40 = vector.load %arg16[%c24, %c0_49] : memref<32x16xf32, #tpu.memory_space<vmem>>, vector<1x16xf32>
    %c1_50 = arith.constant 1 : index
    %c256_51 = arith.constant 256 : index
    %41 = vector.load %arg15[%c1_50, %c256_51] : memref<8x512xf32, #tpu.memory_space<vmem>>, vector<1x16xf32>
    tpu.vector_store %arg15[%c1_50, %c256_51], %40 {strides = array<i32>} : memref<8x512xf32, #tpu.memory_space<vmem>>, vector<1x16xf32>,
    %c9 = arith.constant 9 : index
    %c0_52 = arith.constant 0 : index
    %42 = vector.load %arg16[%c9, %c0_52] : memref<32x16xf32, #tpu.memory_space<vmem>>, vector<1x16xf32>
    %c0_53 = arith.constant 0 : index
    %c272 = arith.constant 272 : index
    %43 = vector.load %arg15[%c0_53, %c272] : memref<8x512xf32, #tpu.memory_space<vmem>>, vector<1x16xf32>
    tpu.vector_store %arg15[%c0_53, %c272], %42 {strides = array<i32>} : memref<8x512xf32, #tpu.memory_space<vmem>>, vector<1x16xf32>,
    %c25 = arith.constant 25 : index
    %c0_54 = arith.constant 0 : index
    %44 = vector.load %arg16[%c25, %c0_54] : memref<32x16xf32, #tpu.memory_space<vmem>>, vector<1x16xf32>
    %c1_55 = arith.constant 1 : index
    %c272_56 = arith.constant 272 : index
    %45 = vector.load %arg15[%c1_55, %c272_56] : memref<8x512xf32, #tpu.memory_space<vmem>>, vector<1x16xf32>
    tpu.vector_store %arg15[%c1_55, %c272_56], %44 {strides = array<i32>} : memref<8x512xf32, #tpu.memory_space<vmem>>, vector<1x16xf32>,
    %c10 = arith.constant 10 : index
    %c0_57 = arith.constant 0 : index
    %46 = vector.load %arg16[%c10, %c0_57] : memref<32x16xf32, #tpu.memory_space<vmem>>, vector<1x16xf32>
    %c0_58 = arith.constant 0 : index
    %c288 = arith.constant 288 : index
    %47 = vector.load %arg15[%c0_58, %c288] : memref<8x512xf32, #tpu.memory_space<vmem>>, vector<1x16xf32>
    tpu.vector_store %arg15[%c0_58, %c288], %46 {strides = array<i32>} : memref<8x512xf32, #tpu.memory_space<vmem>>, vector<1x16xf32>,
    %c26 = arith.constant 26 : index
    %c0_59 = arith.constant 0 : index
    %48 = vector.load %arg16[%c26, %c0_59] : memref<32x16xf32, #tpu.memory_space<vmem>>, vector<1x16xf32>
    %c1_60 = arith.constant 1 : index
    %c288_61 = arith.constant 288 : index
    %49 = vector.load %arg15[%c1_60, %c288_61] : memref<8x512xf32, #tpu.memory_space<vmem>>, vector<1x16xf32>
    tpu.vector_store %arg15[%c1_60, %c288_61], %48 {strides = array<i32>} : memref<8x512xf32, #tpu.memory_space<vmem>>, vector<1x16xf32>,
    %c11 = arith.constant 11 : index
    %c0_62 = arith.constant 0 : index
    %50 = vector.load %arg16[%c11, %c0_62] : memref<32x16xf32, #tpu.memory_space<vmem>>, vector<1x16xf32>
    %c0_63 = arith.constant 0 : index
    %c304 = arith.constant 304 : index
    %51 = vector.load %arg15[%c0_63, %c304] : memref<8x512xf32, #tpu.memory_space<vmem>>, vector<1x16xf32>
    tpu.vector_store %arg15[%c0_63, %c304], %50 {strides = array<i32>} : memref<8x512xf32, #tpu.memory_space<vmem>>, vector<1x16xf32>,
    %c27 = arith.constant 27 : index
    %c0_64 = arith.constant 0 : index
    %52 = vector.load %arg16[%c27, %c0_64] : memref<32x16xf32, #tpu.memory_space<vmem>>, vector<1x16xf32>
    %c1_65 = arith.constant 1 : index
    %c304_66 = arith.constant 304 : index
    %53 = vector.load %arg15[%c1_65, %c304_66] : memref<8x512xf32, #tpu.memory_space<vmem>>, vector<1x16xf32>
    tpu.vector_store %arg15[%c1_65, %c304_66], %52 {strides = array<i32>} : memref<8x512xf32, #tpu.memory_space<vmem>>, vector<1x16xf32>,
    %c12 = arith.constant 12 : index
    %c0_67 = arith.constant 0 : index
    %54 = vector.load %arg16[%c12, %c0_67] : memref<32x16xf32, #tpu.memory_space<vmem>>, vector<1x16xf32>
    %c0_68 = arith.constant 0 : index
    %c320 = arith.constant 320 : index
    %55 = vector.load %arg15[%c0_68, %c320] : memref<8x512xf32, #tpu.memory_space<vmem>>, vector<1x16xf32>
    tpu.vector_store %arg15[%c0_68, %c320], %54 {strides = array<i32>} : memref<8x512xf32, #tpu.memory_space<vmem>>, vector<1x16xf32>,
    %c28 = arith.constant 28 : index
    %c0_69 = arith.constant 0 : index
    %56 = vector.load %arg16[%c28, %c0_69] : memref<32x16xf32, #tpu.memory_space<vmem>>, vector<1x16xf32>
    %c1_70 = arith.constant 1 : index
    %c320_71 = arith.constant 320 : index
    %57 = vector.load %arg15[%c1_70, %c320_71] : memref<8x512xf32, #tpu.memory_space<vmem>>, vector<1x16xf32>
    tpu.vector_store %arg15[%c1_70, %c320_71], %56 {strides = array<i32>} : memref<8x512xf32, #tpu.memory_space<vmem>>, vector<1x16xf32>,
    %c13 = arith.constant 13 : index
    %c0_72 = arith.constant 0 : index
    %58 = vector.load %arg16[%c13, %c0_72] : memref<32x16xf32, #tpu.memory_space<vmem>>, vector<1x16xf32>
    %c0_73 = arith.constant 0 : index
    %c336 = arith.constant 336 : index
    %59 = vector.load %arg15[%c0_73, %c336] : memref<8x512xf32, #tpu.memory_space<vmem>>, vector<1x16xf32>
    tpu.vector_store %arg15[%c0_73, %c336], %58 {strides = array<i32>} : memref<8x512xf32, #tpu.memory_space<vmem>>, vector<1x16xf32>,
    %c29 = arith.constant 29 : index
    %c0_74 = arith.constant 0 : index
    %60 = vector.load %arg16[%c29, %c0_74] : memref<32x16xf32, #tpu.memory_space<vmem>>, vector<1x16xf32>
    %c1_75 = arith.constant 1 : index
    %c336_76 = arith.constant 336 : index
    %61 = vector.load %arg15[%c1_75, %c336_76] : memref<8x512xf32, #tpu.memory_space<vmem>>, vector<1x16xf32>
    tpu.vector_store %arg15[%c1_75, %c336_76], %60 {strides = array<i32>} : memref<8x512xf32, #tpu.memory_space<vmem>>, vector<1x16xf32>,
    %c14 = arith.constant 14 : index
    %c0_77 = arith.constant 0 : index
    %62 = vector.load %arg16[%c14, %c0_77] : memref<32x16xf32, #tpu.memory_space<vmem>>, vector<1x16xf32>
    %c0_78 = arith.constant 0 : index
    %c352 = arith.constant 352 : index
    %63 = vector.load %arg15[%c0_78, %c352] : memref<8x512xf32, #tpu.memory_space<vmem>>, vector<1x16xf32>
    tpu.vector_store %arg15[%c0_78, %c352], %62 {strides = array<i32>} : memref<8x512xf32, #tpu.memory_space<vmem>>, vector<1x16xf32>,
    %c30 = arith.constant 30 : index
    %c0_79 = arith.constant 0 : index
    %64 = vector.load %arg16[%c30, %c0_79] : memref<32x16xf32, #tpu.memory_space<vmem>>, vector<1x16xf32>
    %c1_80 = arith.constant 1 : index
    %c352_81 = arith.constant 352 : index
    %65 = vector.load %arg15[%c1_80, %c352_81] : memref<8x512xf32, #tpu.memory_space<vmem>>, vector<1x16xf32>
    tpu.vector_store %arg15[%c1_80, %c352_81], %64 {strides = array<i32>} : memref<8x512xf32, #tpu.memory_space<vmem>>, vector<1x16xf32>,
    %c15 = arith.constant 15 : index
    %c0_82 = arith.constant 0 : index
    %66 = vector.load %arg16[%c15, %c0_82] : memref<32x16xf32, #tpu.memory_space<vmem>>, vector<1x16xf32>
    %c0_83 = arith.constant 0 : index
    %c368 = arith.constant 368 : index
    %67 = vector.load %arg15[%c0_83, %c368] : memref<8x512xf32, #tpu.memory_space<vmem>>, vector<1x16xf32>
    tpu.vector_store %arg15[%c0_83, %c368], %66 {strides = array<i32>} : memref<8x512xf32, #tpu.memory_space<vmem>>, vector<1x16xf32>,
    %c31 = arith.constant 31 : index
    %c0_84 = arith.constant 0 : index
    %68 = vector.load %arg16[%c31, %c0_84] : memref<32x16xf32, #tpu.memory_space<vmem>>, vector<1x16xf32>
    %c1_85 = arith.constant 1 : index
    %c368_86 = arith.constant 368 : index
    %69 = vector.load %arg15[%c1_85, %c368_86] : memref<8x512xf32, #tpu.memory_space<vmem>>, vector<1x16xf32>
    tpu.vector_store %arg15[%c1_85, %c368_86], %68 {strides = array<i32>} : memref<8x512xf32, #tpu.memory_space<vmem>>, vector<1x16xf32>,
    %c0_87 = arith.constant 0 : index
    %c0_88 = arith.constant 0 : index
    %70 = vector.load %arg5[%c0_87, %c0_88] : memref<2x256xf32, #tpu.memory_space<vmem>>, vector<1x256xf32>
    %c1_89 = arith.constant 1 : index
    %c0_90 = arith.constant 0 : index
    %71 = vector.load %arg5[%c1_89, %c0_90] : memref<2x256xf32, #tpu.memory_space<vmem>>, vector<1x256xf32>
    %c0_91 = arith.constant 0 : index
    %c111 = arith.constant 111 : index
    %72 = vector.load %arg15[%c0_91, %c111] : memref<8x512xf32, #tpu.memory_space<vmem>>, vector<8x256xf32>
    %73 = vector.broadcast %70 : vector<1x256xf32> to vector<8x256xf32>
    %74 = arith.mulf %72, %73 : vector<8x256xf32>
    %c0_92 = arith.constant 0 : index
    %c0_93 = arith.constant 0 : index
    %c0_94 = arith.constant 0 : index
    %75 = vector.load %arg6[%c0_92, %c0_93, %c0_94] : memref<45x8x8xf32, #tpu.memory_space<vmem>>, vector<1x8x8xf32>
    %76 = vector.shape_cast %75 : vector<1x8x8xf32> to vector<8x8xf32>
    %cst = arith.constant dense<0.000000e+00> : vector<8x256xf32>
    %77 = tpu.matmul %76, %74, %cst {dimension_numbers = #tpu.dot_dimension_numbers<[1], [0], [0], [1], [0, 0, 1, 1], [], []>} : vector<8x8xf32>, vector<8x256xf32>, vector<8x256xf32> -> vector<8x256xf32>
    %c0_95 = arith.constant 0 : index
    %c112 = arith.constant 112 : index
    %78 = vector.load %arg15[%c0_95, %c112] : memref<8x512xf32, #tpu.memory_space<vmem>>, vector<8x256xf32>
    %c1_96 = arith.constant 1 : index
    %c0_97 = arith.constant 0 : index
    %c0_98 = arith.constant 0 : index
    %79 = vector.load %arg6[%c1_96, %c0_97, %c0_98] : memref<45x8x8xf32, #tpu.memory_space<vmem>>, vector<1x8x8xf32>
    %80 = vector.shape_cast %79 : vector<1x8x8xf32> to vector<8x8xf32>
    %cst_99 = arith.constant dense<0.000000e+00> : vector<8x256xf32>
    %81 = tpu.matmul %80, %78, %cst_99 {dimension_numbers = #tpu.dot_dimension_numbers<[1], [0], [0], [1], [0, 0, 1, 1], [], []>} : vector<8x8xf32>, vector<8x256xf32>, vector<8x256xf32> -> vector<8x256xf32>
    %82 = arith.addf %77, %81 : vector<8x256xf32>
    %c0_100 = arith.constant 0 : index
    %c113 = arith.constant 113 : index
    %83 = vector.load %arg15[%c0_100, %c113] : memref<8x512xf32, #tpu.memory_space<vmem>>, vector<8x256xf32>
    %84 = vector.broadcast %71 : vector<1x256xf32> to vector<8x256xf32>
    %85 = arith.mulf %83, %84 : vector<8x256xf32>
    %c2_101 = arith.constant 2 : index
    %c0_102 = arith.constant 0 : index
    %c0_103 = arith.constant 0 : index
    %86 = vector.load %arg6[%c2_101, %c0_102, %c0_103] : memref<45x8x8xf32, #tpu.memory_space<vmem>>, vector<1x8x8xf32>
    %87 = vector.shape_cast %86 : vector<1x8x8xf32> to vector<8x8xf32>
    %cst_104 = arith.constant dense<0.000000e+00> : vector<8x256xf32>
    %88 = tpu.matmul %87, %85, %cst_104 {dimension_numbers = #tpu.dot_dimension_numbers<[1], [0], [0], [1], [0, 0, 1, 1], [], []>} : vector<8x8xf32>, vector<8x256xf32>, vector<8x256xf32> -> vector<8x256xf32>
    %89 = arith.addf %82, %88 : vector<8x256xf32>
    %c0_105 = arith.constant 0 : index
    %c127 = arith.constant 127 : index
    %90 = vector.load %arg15[%c0_105, %c127] : memref<8x512xf32, #tpu.memory_space<vmem>>, vector<8x256xf32>
    %91 = vector.broadcast %70 : vector<1x256xf32> to vector<8x256xf32>
    %92 = arith.mulf %90, %91 : vector<8x256xf32>
    %c3_106 = arith.constant 3 : index
    %c0_107 = arith.constant 0 : index
    %c0_108 = arith.constant 0 : index
    %93 = vector.load %arg6[%c3_106, %c0_107, %c0_108] : memref<45x8x8xf32, #tpu.memory_space<vmem>>, vector<1x8x8xf32>
    %94 = vector.shape_cast %93 : vector<1x8x8xf32> to vector<8x8xf32>
    %cst_109 = arith.constant dense<0.000000e+00> : vector<8x256xf32>
    %95 = tpu.matmul %94, %92, %cst_109 {dimension_numbers = #tpu.dot_dimension_numbers<[1], [0], [0], [1], [0, 0, 1, 1], [], []>} : vector<8x8xf32>, vector<8x256xf32>, vector<8x256xf32> -> vector<8x256xf32>
    %96 = arith.addf %89, %95 : vector<8x256xf32>
    %c0_110 = arith.constant 0 : index
    %c128_111 = arith.constant 128 : index
    %97 = vector.load %arg15[%c0_110, %c128_111] : memref<8x512xf32, #tpu.memory_space<vmem>>, vector<8x256xf32>
    %c4_112 = arith.constant 4 : index
    %c0_113 = arith.constant 0 : index
    %c0_114 = arith.constant 0 : index
    %98 = vector.load %arg6[%c4_112, %c0_113, %c0_114] : memref<45x8x8xf32, #tpu.memory_space<vmem>>, vector<1x8x8xf32>
    %99 = vector.shape_cast %98 : vector<1x8x8xf32> to vector<8x8xf32>
    %cst_115 = arith.constant dense<0.000000e+00> : vector<8x256xf32>
    %100 = tpu.matmul %99, %97, %cst_115 {dimension_numbers = #tpu.dot_dimension_numbers<[1], [0], [0], [1], [0, 0, 1, 1], [], []>} : vector<8x8xf32>, vector<8x256xf32>, vector<8x256xf32> -> vector<8x256xf32>
    %101 = arith.addf %96, %100 : vector<8x256xf32>
    %c0_116 = arith.constant 0 : index
    %c129 = arith.constant 129 : index
    %102 = vector.load %arg15[%c0_116, %c129] : memref<8x512xf32, #tpu.memory_space<vmem>>, vector<8x256xf32>
    %103 = vector.broadcast %71 : vector<1x256xf32> to vector<8x256xf32>
    %104 = arith.mulf %102, %103 : vector<8x256xf32>
    %c5_117 = arith.constant 5 : index
    %c0_118 = arith.constant 0 : index
    %c0_119 = arith.constant 0 : index
    %105 = vector.load %arg6[%c5_117, %c0_118, %c0_119] : memref<45x8x8xf32, #tpu.memory_space<vmem>>, vector<1x8x8xf32>
    %106 = vector.shape_cast %105 : vector<1x8x8xf32> to vector<8x8xf32>
    %cst_120 = arith.constant dense<0.000000e+00> : vector<8x256xf32>
    %107 = tpu.matmul %106, %104, %cst_120 {dimension_numbers = #tpu.dot_dimension_numbers<[1], [0], [0], [1], [0, 0, 1, 1], [], []>} : vector<8x8xf32>, vector<8x256xf32>, vector<8x256xf32> -> vector<8x256xf32>
    %108 = arith.addf %101, %107 : vector<8x256xf32>
    %c0_121 = arith.constant 0 : index
    %c143 = arith.constant 143 : index
    %109 = vector.load %arg15[%c0_121, %c143] : memref<8x512xf32, #tpu.memory_space<vmem>>, vector<8x256xf32>
    %110 = vector.broadcast %70 : vector<1x256xf32> to vector<8x256xf32>
    %111 = arith.mulf %109, %110 : vector<8x256xf32>
    %c6_122 = arith.constant 6 : index
    %c0_123 = arith.constant 0 : index
    %c0_124 = arith.constant 0 : index
    %112 = vector.load %arg6[%c6_122, %c0_123, %c0_124] : memref<45x8x8xf32, #tpu.memory_space<vmem>>, vector<1x8x8xf32>
    %113 = vector.shape_cast %112 : vector<1x8x8xf32> to vector<8x8xf32>
    %cst_125 = arith.constant dense<0.000000e+00> : vector<8x256xf32>
    %114 = tpu.matmul %113, %111, %cst_125 {dimension_numbers = #tpu.dot_dimension_numbers<[1], [0], [0], [1], [0, 0, 1, 1], [], []>} : vector<8x8xf32>, vector<8x256xf32>, vector<8x256xf32> -> vector<8x256xf32>
    %115 = arith.addf %108, %114 : vector<8x256xf32>
    %c0_126 = arith.constant 0 : index
    %c144_127 = arith.constant 144 : index
    %116 = vector.load %arg15[%c0_126, %c144_127] : memref<8x512xf32, #tpu.memory_space<vmem>>, vector<8x256xf32>
    %c7_128 = arith.constant 7 : index
    %c0_129 = arith.constant 0 : index
    %c0_130 = arith.constant 0 : index
    %117 = vector.load %arg6[%c7_128, %c0_129, %c0_130] : memref<45x8x8xf32, #tpu.memory_space<vmem>>, vector<1x8x8xf32>
    %118 = vector.shape_cast %117 : vector<1x8x8xf32> to vector<8x8xf32>
    %cst_131 = arith.constant dense<0.000000e+00> : vector<8x256xf32>
    %119 = tpu.matmul %118, %116, %cst_131 {dimension_numbers = #tpu.dot_dimension_numbers<[1], [0], [0], [1], [0, 0, 1, 1], [], []>} : vector<8x8xf32>, vector<8x256xf32>, vector<8x256xf32> -> vector<8x256xf32>
    %120 = arith.addf %115, %119 : vector<8x256xf32>
    %c0_132 = arith.constant 0 : index
    %c145 = arith.constant 145 : index
    %121 = vector.load %arg15[%c0_132, %c145] : memref<8x512xf32, #tpu.memory_space<vmem>>, vector<8x256xf32>
    %122 = vector.broadcast %71 : vector<1x256xf32> to vector<8x256xf32>
    %123 = arith.mulf %121, %122 : vector<8x256xf32>
    %c8_133 = arith.constant 8 : index
    %c0_134 = arith.constant 0 : index
    %c0_135 = arith.constant 0 : index
    %124 = vector.load %arg6[%c8_133, %c0_134, %c0_135] : memref<45x8x8xf32, #tpu.memory_space<vmem>>, vector<1x8x8xf32>
    %125 = vector.shape_cast %124 : vector<1x8x8xf32> to vector<8x8xf32>
    %cst_136 = arith.constant dense<0.000000e+00> : vector<8x256xf32>
    %126 = tpu.matmul %125, %123, %cst_136 {dimension_numbers = #tpu.dot_dimension_numbers<[1], [0], [0], [1], [0, 0, 1, 1], [], []>} : vector<8x8xf32>, vector<8x256xf32>, vector<8x256xf32> -> vector<8x256xf32>
    %127 = arith.addf %120, %126 : vector<8x256xf32>
    %c0_137 = arith.constant 0 : index
    %c0_138 = arith.constant 0 : index
    %c0_139 = arith.constant 0 : index
    %128 = vector.load %arg7[%c0_137, %c0_138, %c0_139] : memref<5x8x1xf32, #tpu.memory_space<vmem>>, vector<1x8x1xf32>
    %129 = vector.shape_cast %128 : vector<1x8x1xf32> to vector<8x1xf32>
    %130 = vector.broadcast %129 : vector<8x1xf32> to vector<8x256xf32>
    %131 = arith.addf %127, %130 : vector<8x256xf32>
    %cst_140 = arith.constant 0.000000e+00 : f32
    %132 = vector.broadcast %cst_140 : f32 to vector<8x256xf32>
    %133 = arith.maximumf %131, %132 : vector<8x256xf32>
    %c0_141 = arith.constant 0 : index
    %c128_142 = arith.constant 128 : index
    %134 = vector.load %arg15[%c0_141, %c128_142] : memref<8x512xf32, #tpu.memory_space<vmem>>, vector<8x256xf32>
    tpu.vector_store %arg15[%c0_141, %c128_142], %133 {strides = array<i32>} : memref<8x512xf32, #tpu.memory_space<vmem>>, vector<8x256xf32>,
    %c0_143 = arith.constant 0 : index
    %c111_144 = arith.constant 111 : index
    %135 = vector.load %arg15[%c0_143, %c111_144] : memref<8x512xf32, #tpu.memory_space<vmem>>, vector<8x256xf32>
    %136 = vector.broadcast %70 : vector<1x256xf32> to vector<8x256xf32>
    %137 = arith.mulf %135, %136 : vector<8x256xf32>
    %c9_145 = arith.constant 9 : index
    %c0_146 = arith.constant 0 : index
    %c0_147 = arith.constant 0 : index
    %138 = vector.load %arg6[%c9_145, %c0_146, %c0_147] : memref<45x8x8xf32, #tpu.memory_space<vmem>>, vector<1x8x8xf32>
    %139 = vector.shape_cast %138 : vector<1x8x8xf32> to vector<8x8xf32>
    %cst_148 = arith.constant dense<0.000000e+00> : vector<8x256xf32>
    %140 = tpu.matmul %139, %137, %cst_148 {dimension_numbers = #tpu.dot_dimension_numbers<[1], [0], [0], [1], [0, 0, 1, 1], [], []>} : vector<8x8xf32>, vector<8x256xf32>, vector<8x256xf32> -> vector<8x256xf32>
    %c0_149 = arith.constant 0 : index
    %c112_150 = arith.constant 112 : index
    %141 = vector.load %arg15[%c0_149, %c112_150] : memref<8x512xf32, #tpu.memory_space<vmem>>, vector<8x256xf32>
    %c10_151 = arith.constant 10 : index
    %c0_152 = arith.constant 0 : index
    %c0_153 = arith.constant 0 : index
    %142 = vector.load %arg6[%c10_151, %c0_152, %c0_153] : memref<45x8x8xf32, #tpu.memory_space<vmem>>, vector<1x8x8xf32>
    %143 = vector.shape_cast %142 : vector<1x8x8xf32> to vector<8x8xf32>
    %cst_154 = arith.constant dense<0.000000e+00> : vector<8x256xf32>
    %144 = tpu.matmul %143, %141, %cst_154 {dimension_numbers = #tpu.dot_dimension_numbers<[1], [0], [0], [1], [0, 0, 1, 1], [], []>} : vector<8x8xf32>, vector<8x256xf32>, vector<8x256xf32> -> vector<8x256xf32>
    %145 = arith.addf %140, %144 : vector<8x256xf32>
    %c0_155 = arith.constant 0 : index
    %c113_156 = arith.constant 113 : index
    %146 = vector.load %arg15[%c0_155, %c113_156] : memref<8x512xf32, #tpu.memory_space<vmem>>, vector<8x256xf32>
    %147 = vector.broadcast %71 : vector<1x256xf32> to vector<8x256xf32>
    %148 = arith.mulf %146, %147 : vector<8x256xf32>
    %c11_157 = arith.constant 11 : index
    %c0_158 = arith.constant 0 : index
    %c0_159 = arith.constant 0 : index
    %149 = vector.load %arg6[%c11_157, %c0_158, %c0_159] : memref<45x8x8xf32, #tpu.memory_space<vmem>>, vector<1x8x8xf32>
    %150 = vector.shape_cast %149 : vector<1x8x8xf32> to vector<8x8xf32>
    %cst_160 = arith.constant dense<0.000000e+00> : vector<8x256xf32>
    %151 = tpu.matmul %150, %148, %cst_160 {dimension_numbers = #tpu.dot_dimension_numbers<[1], [0], [0], [1], [0, 0, 1, 1], [], []>} : vector<8x8xf32>, vector<8x256xf32>, vector<8x256xf32> -> vector<8x256xf32>
    %152 = arith.addf %145, %151 : vector<8x256xf32>
    %c0_161 = arith.constant 0 : index
    %c127_162 = arith.constant 127 : index
    %153 = vector.load %arg15[%c0_161, %c127_162] : memref<8x512xf32, #tpu.memory_space<vmem>>, vector<8x256xf32>
    %154 = vector.broadcast %70 : vector<1x256xf32> to vector<8x256xf32>
    %155 = arith.mulf %153, %154 : vector<8x256xf32>
    %c12_163 = arith.constant 12 : index
    %c0_164 = arith.constant 0 : index
    %c0_165 = arith.constant 0 : index
    %156 = vector.load %arg6[%c12_163, %c0_164, %c0_165] : memref<45x8x8xf32, #tpu.memory_space<vmem>>, vector<1x8x8xf32>
    %157 = vector.shape_cast %156 : vector<1x8x8xf32> to vector<8x8xf32>
    %cst_166 = arith.constant dense<0.000000e+00> : vector<8x256xf32>
    %158 = tpu.matmul %157, %155, %cst_166 {dimension_numbers = #tpu.dot_dimension_numbers<[1], [0], [0], [1], [0, 0, 1, 1], [], []>} : vector<8x8xf32>, vector<8x256xf32>, vector<8x256xf32> -> vector<8x256xf32>
    %159 = arith.addf %152, %158 : vector<8x256xf32>
    %c0_167 = arith.constant 0 : index
    %c128_168 = arith.constant 128 : index
    %160 = vector.load %arg15[%c0_167, %c128_168] : memref<8x512xf32, #tpu.memory_space<vmem>>, vector<8x256xf32>
    %c13_169 = arith.constant 13 : index
    %c0_170 = arith.constant 0 : index
    %c0_171 = arith.constant 0 : index
    %161 = vector.load %arg6[%c13_169, %c0_170, %c0_171] : memref<45x8x8xf32, #tpu.memory_space<vmem>>, vector<1x8x8xf32>
    %162 = vector.shape_cast %161 : vector<1x8x8xf32> to vector<8x8xf32>
    %cst_172 = arith.constant dense<0.000000e+00> : vector<8x256xf32>
    %163 = tpu.matmul %162, %160, %cst_172 {dimension_numbers = #tpu.dot_dimension_numbers<[1], [0], [0], [1], [0, 0, 1, 1], [], []>} : vector<8x8xf32>, vector<8x256xf32>, vector<8x256xf32> -> vector<8x256xf32>
    %164 = arith.addf %159, %163 : vector<8x256xf32>
    %c0_173 = arith.constant 0 : index
    %c129_174 = arith.constant 129 : index
    %165 = vector.load %arg15[%c0_173, %c129_174] : memref<8x512xf32, #tpu.memory_space<vmem>>, vector<8x256xf32>
    %166 = vector.broadcast %71 : vector<1x256xf32> to vector<8x256xf32>
    %167 = arith.mulf %165, %166 : vector<8x256xf32>
    %c14_175 = arith.constant 14 : index
    %c0_176 = arith.constant 0 : index
    %c0_177 = arith.constant 0 : index
    %168 = vector.load %arg6[%c14_175, %c0_176, %c0_177] : memref<45x8x8xf32, #tpu.memory_space<vmem>>, vector<1x8x8xf32>
    %169 = vector.shape_cast %168 : vector<1x8x8xf32> to vector<8x8xf32>
    %cst_178 = arith.constant dense<0.000000e+00> : vector<8x256xf32>
    %170 = tpu.matmul %169, %167, %cst_178 {dimension_numbers = #tpu.dot_dimension_numbers<[1], [0], [0], [1], [0, 0, 1, 1], [], []>} : vector<8x8xf32>, vector<8x256xf32>, vector<8x256xf32> -> vector<8x256xf32>
    %171 = arith.addf %164, %170 : vector<8x256xf32>
    %c0_179 = arith.constant 0 : index
    %c143_180 = arith.constant 143 : index
    %172 = vector.load %arg15[%c0_179, %c143_180] : memref<8x512xf32, #tpu.memory_space<vmem>>, vector<8x256xf32>
    %173 = vector.broadcast %70 : vector<1x256xf32> to vector<8x256xf32>
    %174 = arith.mulf %172, %173 : vector<8x256xf32>
    %c15_181 = arith.constant 15 : index
    %c0_182 = arith.constant 0 : index
    %c0_183 = arith.constant 0 : index
    %175 = vector.load %arg6[%c15_181, %c0_182, %c0_183] : memref<45x8x8xf32, #tpu.memory_space<vmem>>, vector<1x8x8xf32>
    %176 = vector.shape_cast %175 : vector<1x8x8xf32> to vector<8x8xf32>
    %cst_184 = arith.constant dense<0.000000e+00> : vector<8x256xf32>
    %177 = tpu.matmul %176, %174, %cst_184 {dimension_numbers = #tpu.dot_dimension_numbers<[1], [0], [0], [1], [0, 0, 1, 1], [], []>} : vector<8x8xf32>, vector<8x256xf32>, vector<8x256xf32> -> vector<8x256xf32>
    %178 = arith.addf %171, %177 : vector<8x256xf32>
    %c0_185 = arith.constant 0 : index
    %c144_186 = arith.constant 144 : index
    %179 = vector.load %arg15[%c0_185, %c144_186] : memref<8x512xf32, #tpu.memory_space<vmem>>, vector<8x256xf32>
    %c16_187 = arith.constant 16 : index
    %c0_188 = arith.constant 0 : index
    %c0_189 = arith.constant 0 : index
    %180 = vector.load %arg6[%c16_187, %c0_188, %c0_189] : memref<45x8x8xf32, #tpu.memory_space<vmem>>, vector<1x8x8xf32>
    %181 = vector.shape_cast %180 : vector<1x8x8xf32> to vector<8x8xf32>
    %cst_190 = arith.constant dense<0.000000e+00> : vector<8x256xf32>
    %182 = tpu.matmul %181, %179, %cst_190 {dimension_numbers = #tpu.dot_dimension_numbers<[1], [0], [0], [1], [0, 0, 1, 1], [], []>} : vector<8x8xf32>, vector<8x256xf32>, vector<8x256xf32> -> vector<8x256xf32>
    %183 = arith.addf %178, %182 : vector<8x256xf32>
    %c0_191 = arith.constant 0 : index
    %c145_192 = arith.constant 145 : index
    %184 = vector.load %arg15[%c0_191, %c145_192] : memref<8x512xf32, #tpu.memory_space<vmem>>, vector<8x256xf32>
    %185 = vector.broadcast %71 : vector<1x256xf32> to vector<8x256xf32>
    %186 = arith.mulf %184, %185 : vector<8x256xf32>
    %c17_193 = arith.constant 17 : index
    %c0_194 = arith.constant 0 : index
    %c0_195 = arith.constant 0 : index
    %187 = vector.load %arg6[%c17_193, %c0_194, %c0_195] : memref<45x8x8xf32, #tpu.memory_space<vmem>>, vector<1x8x8xf32>
    %188 = vector.shape_cast %187 : vector<1x8x8xf32> to vector<8x8xf32>
    %cst_196 = arith.constant dense<0.000000e+00> : vector<8x256xf32>
    %189 = tpu.matmul %188, %186, %cst_196 {dimension_numbers = #tpu.dot_dimension_numbers<[1], [0], [0], [1], [0, 0, 1, 1], [], []>} : vector<8x8xf32>, vector<8x256xf32>, vector<8x256xf32> -> vector<8x256xf32>
    %190 = arith.addf %183, %189 : vector<8x256xf32>
    %c1_197 = arith.constant 1 : index
    %c0_198 = arith.constant 0 : index
    %c0_199 = arith.constant 0 : index
    %191 = vector.load %arg7[%c1_197, %c0_198, %c0_199] : memref<5x8x1xf32, #tpu.memory_space<vmem>>, vector<1x8x1xf32>
    %192 = vector.shape_cast %191 : vector<1x8x1xf32> to vector<8x1xf32>
    %193 = vector.broadcast %192 : vector<8x1xf32> to vector<8x256xf32>
    %194 = arith.addf %190, %193 : vector<8x256xf32>
    %cst_200 = arith.constant 0.000000e+00 : f32
    %195 = vector.broadcast %cst_200 : f32 to vector<8x256xf32>
    %196 = arith.maximumf %194, %195 : vector<8x256xf32>
    %c0_201 = arith.constant 0 : index
    %c128_202 = arith.constant 128 : index
    %197 = vector.load %arg15[%c0_201, %c128_202] : memref<8x512xf32, #tpu.memory_space<vmem>>, vector<8x256xf32>
    tpu.vector_store %arg15[%c0_201, %c128_202], %196 {strides = array<i32>} : memref<8x512xf32, #tpu.memory_space<vmem>>, vector<8x256xf32>,
    %c0_203 = arith.constant 0 : index
    %c111_204 = arith.constant 111 : index
    %198 = vector.load %arg15[%c0_203, %c111_204] : memref<8x512xf32, #tpu.memory_space<vmem>>, vector<8x256xf32>
    %199 = vector.broadcast %70 : vector<1x256xf32> to vector<8x256xf32>
    %200 = arith.mulf %198, %199 : vector<8x256xf32>
    %c18_205 = arith.constant 18 : index
    %c0_206 = arith.constant 0 : index
    %c0_207 = arith.constant 0 : index
    %201 = vector.load %arg6[%c18_205, %c0_206, %c0_207] : memref<45x8x8xf32, #tpu.memory_space<vmem>>, vector<1x8x8xf32>
    %202 = vector.shape_cast %201 : vector<1x8x8xf32> to vector<8x8xf32>
    %cst_208 = arith.constant dense<0.000000e+00> : vector<8x256xf32>
    %203 = tpu.matmul %202, %200, %cst_208 {dimension_numbers = #tpu.dot_dimension_numbers<[1], [0], [0], [1], [0, 0, 1, 1], [], []>} : vector<8x8xf32>, vector<8x256xf32>, vector<8x256xf32> -> vector<8x256xf32>
    %c0_209 = arith.constant 0 : index
    %c112_210 = arith.constant 112 : index
    %204 = vector.load %arg15[%c0_209, %c112_210] : memref<8x512xf32, #tpu.memory_space<vmem>>, vector<8x256xf32>
    %c19_211 = arith.constant 19 : index
    %c0_212 = arith.constant 0 : index
    %c0_213 = arith.constant 0 : index
    %205 = vector.load %arg6[%c19_211, %c0_212, %c0_213] : memref<45x8x8xf32, #tpu.memory_space<vmem>>, vector<1x8x8xf32>
    %206 = vector.shape_cast %205 : vector<1x8x8xf32> to vector<8x8xf32>
    %cst_214 = arith.constant dense<0.000000e+00> : vector<8x256xf32>
    %207 = tpu.matmul %206, %204, %cst_214 {dimension_numbers = #tpu.dot_dimension_numbers<[1], [0], [0], [1], [0, 0, 1, 1], [], []>} : vector<8x8xf32>, vector<8x256xf32>, vector<8x256xf32> -> vector<8x256xf32>
    %208 = arith.addf %203, %207 : vector<8x256xf32>
    %c0_215 = arith.constant 0 : index
    %c113_216 = arith.constant 113 : index
    %209 = vector.load %arg15[%c0_215, %c113_216] : memref<8x512xf32, #tpu.memory_space<vmem>>, vector<8x256xf32>
    %210 = vector.broadcast %71 : vector<1x256xf32> to vector<8x256xf32>
    %211 = arith.mulf %209, %210 : vector<8x256xf32>
    %c20_217 = arith.constant 20 : index
    %c0_218 = arith.constant 0 : index
    %c0_219 = arith.constant 0 : index
    %212 = vector.load %arg6[%c20_217, %c0_218, %c0_219] : memref<45x8x8xf32, #tpu.memory_space<vmem>>, vector<1x8x8xf32>
    %213 = vector.shape_cast %212 : vector<1x8x8xf32> to vector<8x8xf32>
    %cst_220 = arith.constant dense<0.000000e+00> : vector<8x256xf32>
    %214 = tpu.matmul %213, %211, %cst_220 {dimension_numbers = #tpu.dot_dimension_numbers<[1], [0], [0], [1], [0, 0, 1, 1], [], []>} : vector<8x8xf32>, vector<8x256xf32>, vector<8x256xf32> -> vector<8x256xf32>
    %215 = arith.addf %208, %214 : vector<8x256xf32>
    %c0_221 = arith.constant 0 : index
    %c127_222 = arith.constant 127 : index
    %216 = vector.load %arg15[%c0_221, %c127_222] : memref<8x512xf32, #tpu.memory_space<vmem>>, vector<8x256xf32>
    %217 = vector.broadcast %70 : vector<1x256xf32> to vector<8x256xf32>
    %218 = arith.mulf %216, %217 : vector<8x256xf32>
    %c21_223 = arith.constant 21 : index
    %c0_224 = arith.constant 0 : index
    %c0_225 = arith.constant 0 : index
    %219 = vector.load %arg6[%c21_223, %c0_224, %c0_225] : memref<45x8x8xf32, #tpu.memory_space<vmem>>, vector<1x8x8xf32>
    %220 = vector.shape_cast %219 : vector<1x8x8xf32> to vector<8x8xf32>
    %cst_226 = arith.constant dense<0.000000e+00> : vector<8x256xf32>
    %221 = tpu.matmul %220, %218, %cst_226 {dimension_numbers = #tpu.dot_dimension_numbers<[1], [0], [0], [1], [0, 0, 1, 1], [], []>} : vector<8x8xf32>, vector<8x256xf32>, vector<8x256xf32> -> vector<8x256xf32>
    %222 = arith.addf %215, %221 : vector<8x256xf32>
    %c0_227 = arith.constant 0 : index
    %c128_228 = arith.constant 128 : index
    %223 = vector.load %arg15[%c0_227, %c128_228] : memref<8x512xf32, #tpu.memory_space<vmem>>, vector<8x256xf32>
    %c22_229 = arith.constant 22 : index
    %c0_230 = arith.constant 0 : index
    %c0_231 = arith.constant 0 : index
    %224 = vector.load %arg6[%c22_229, %c0_230, %c0_231] : memref<45x8x8xf32, #tpu.memory_space<vmem>>, vector<1x8x8xf32>
    %225 = vector.shape_cast %224 : vector<1x8x8xf32> to vector<8x8xf32>
    %cst_232 = arith.constant dense<0.000000e+00> : vector<8x256xf32>
    %226 = tpu.matmul %225, %223, %cst_232 {dimension_numbers = #tpu.dot_dimension_numbers<[1], [0], [0], [1], [0, 0, 1, 1], [], []>} : vector<8x8xf32>, vector<8x256xf32>, vector<8x256xf32> -> vector<8x256xf32>
    %227 = arith.addf %222, %226 : vector<8x256xf32>
    %c0_233 = arith.constant 0 : index
    %c129_234 = arith.constant 129 : index
    %228 = vector.load %arg15[%c0_233, %c129_234] : memref<8x512xf32, #tpu.memory_space<vmem>>, vector<8x256xf32>
    %229 = vector.broadcast %71 : vector<1x256xf32> to vector<8x256xf32>
    %230 = arith.mulf %228, %229 : vector<8x256xf32>
    %c23_235 = arith.constant 23 : index
    %c0_236 = arith.constant 0 : index
    %c0_237 = arith.constant 0 : index
    %231 = vector.load %arg6[%c23_235, %c0_236, %c0_237] : memref<45x8x8xf32, #tpu.memory_space<vmem>>, vector<1x8x8xf32>
    %232 = vector.shape_cast %231 : vector<1x8x8xf32> to vector<8x8xf32>
    %cst_238 = arith.constant dense<0.000000e+00> : vector<8x256xf32>
    %233 = tpu.matmul %232, %230, %cst_238 {dimension_numbers = #tpu.dot_dimension_numbers<[1], [0], [0], [1], [0, 0, 1, 1], [], []>} : vector<8x8xf32>, vector<8x256xf32>, vector<8x256xf32> -> vector<8x256xf32>
    %234 = arith.addf %227, %233 : vector<8x256xf32>
    %c0_239 = arith.constant 0 : index
    %c143_240 = arith.constant 143 : index
    %235 = vector.load %arg15[%c0_239, %c143_240] : memref<8x512xf32, #tpu.memory_space<vmem>>, vector<8x256xf32>
    %236 = vector.broadcast %70 : vector<1x256xf32> to vector<8x256xf32>
    %237 = arith.mulf %235, %236 : vector<8x256xf32>
    %c24_241 = arith.constant 24 : index
    %c0_242 = arith.constant 0 : index
    %c0_243 = arith.constant 0 : index
    %238 = vector.load %arg6[%c24_241, %c0_242, %c0_243] : memref<45x8x8xf32, #tpu.memory_space<vmem>>, vector<1x8x8xf32>
    %239 = vector.shape_cast %238 : vector<1x8x8xf32> to vector<8x8xf32>
    %cst_244 = arith.constant dense<0.000000e+00> : vector<8x256xf32>
    %240 = tpu.matmul %239, %237, %cst_244 {dimension_numbers = #tpu.dot_dimension_numbers<[1], [0], [0], [1], [0, 0, 1, 1], [], []>} : vector<8x8xf32>, vector<8x256xf32>, vector<8x256xf32> -> vector<8x256xf32>
    %241 = arith.addf %234, %240 : vector<8x256xf32>
    %c0_245 = arith.constant 0 : index
    %c144_246 = arith.constant 144 : index
    %242 = vector.load %arg15[%c0_245, %c144_246] : memref<8x512xf32, #tpu.memory_space<vmem>>, vector<8x256xf32>
    %c25_247 = arith.constant 25 : index
    %c0_248 = arith.constant 0 : index
    %c0_249 = arith.constant 0 : index
    %243 = vector.load %arg6[%c25_247, %c0_248, %c0_249] : memref<45x8x8xf32, #tpu.memory_space<vmem>>, vector<1x8x8xf32>
    %244 = vector.shape_cast %243 : vector<1x8x8xf32> to vector<8x8xf32>
    %cst_250 = arith.constant dense<0.000000e+00> : vector<8x256xf32>
    %245 = tpu.matmul %244, %242, %cst_250 {dimension_numbers = #tpu.dot_dimension_numbers<[1], [0], [0], [1], [0, 0, 1, 1], [], []>} : vector<8x8xf32>, vector<8x256xf32>, vector<8x256xf32> -> vector<8x256xf32>
    %246 = arith.addf %241, %245 : vector<8x256xf32>
    %c0_251 = arith.constant 0 : index
    %c145_252 = arith.constant 145 : index
    %247 = vector.load %arg15[%c0_251, %c145_252] : memref<8x512xf32, #tpu.memory_space<vmem>>, vector<8x256xf32>
    %248 = vector.broadcast %71 : vector<1x256xf32> to vector<8x256xf32>
    %249 = arith.mulf %247, %248 : vector<8x256xf32>
    %c26_253 = arith.constant 26 : index
    %c0_254 = arith.constant 0 : index
    %c0_255 = arith.constant 0 : index
    %250 = vector.load %arg6[%c26_253, %c0_254, %c0_255] : memref<45x8x8xf32, #tpu.memory_space<vmem>>, vector<1x8x8xf32>
    %251 = vector.shape_cast %250 : vector<1x8x8xf32> to vector<8x8xf32>
    %cst_256 = arith.constant dense<0.000000e+00> : vector<8x256xf32>
    %252 = tpu.matmul %251, %249, %cst_256 {dimension_numbers = #tpu.dot_dimension_numbers<[1], [0], [0], [1], [0, 0, 1, 1], [], []>} : vector<8x8xf32>, vector<8x256xf32>, vector<8x256xf32> -> vector<8x256xf32>
    %253 = arith.addf %246, %252 : vector<8x256xf32>
    %c2_257 = arith.constant 2 : index
    %c0_258 = arith.constant 0 : index
    %c0_259 = arith.constant 0 : index
    %254 = vector.load %arg7[%c2_257, %c0_258, %c0_259] : memref<5x8x1xf32, #tpu.memory_space<vmem>>, vector<1x8x1xf32>
    %255 = vector.shape_cast %254 : vector<1x8x1xf32> to vector<8x1xf32>
    %256 = vector.broadcast %255 : vector<8x1xf32> to vector<8x256xf32>
    %257 = arith.addf %253, %256 : vector<8x256xf32>
    %cst_260 = arith.constant 0.000000e+00 : f32
    %258 = vector.broadcast %cst_260 : f32 to vector<8x256xf32>
    %259 = arith.maximumf %257, %258 : vector<8x256xf32>
    %c0_261 = arith.constant 0 : index
    %c128_262 = arith.constant 128 : index
    %260 = vector.load %arg15[%c0_261, %c128_262] : memref<8x512xf32, #tpu.memory_space<vmem>>, vector<8x256xf32>
    tpu.vector_store %arg15[%c0_261, %c128_262], %259 {strides = array<i32>} : memref<8x512xf32, #tpu.memory_space<vmem>>, vector<8x256xf32>,
    %c0_263 = arith.constant 0 : index
    %c111_264 = arith.constant 111 : index
    %261 = vector.load %arg15[%c0_263, %c111_264] : memref<8x512xf32, #tpu.memory_space<vmem>>, vector<8x256xf32>
    %262 = vector.broadcast %70 : vector<1x256xf32> to vector<8x256xf32>
    %263 = arith.mulf %261, %262 : vector<8x256xf32>
    %c27_265 = arith.constant 27 : index
    %c0_266 = arith.constant 0 : index
    %c0_267 = arith.constant 0 : index
    %264 = vector.load %arg6[%c27_265, %c0_266, %c0_267] : memref<45x8x8xf32, #tpu.memory_space<vmem>>, vector<1x8x8xf32>
    %265 = vector.shape_cast %264 : vector<1x8x8xf32> to vector<8x8xf32>
    %cst_268 = arith.constant dense<0.000000e+00> : vector<8x256xf32>
    %266 = tpu.matmul %265, %263, %cst_268 {dimension_numbers = #tpu.dot_dimension_numbers<[1], [0], [0], [1], [0, 0, 1, 1], [], []>} : vector<8x8xf32>, vector<8x256xf32>, vector<8x256xf32> -> vector<8x256xf32>
    %c0_269 = arith.constant 0 : index
    %c112_270 = arith.constant 112 : index
    %267 = vector.load %arg15[%c0_269, %c112_270] : memref<8x512xf32, #tpu.memory_space<vmem>>, vector<8x256xf32>
    %c28_271 = arith.constant 28 : index
    %c0_272 = arith.constant 0 : index
    %c0_273 = arith.constant 0 : index
    %268 = vector.load %arg6[%c28_271, %c0_272, %c0_273] : memref<45x8x8xf32, #tpu.memory_space<vmem>>, vector<1x8x8xf32>
    %269 = vector.shape_cast %268 : vector<1x8x8xf32> to vector<8x8xf32>
    %cst_274 = arith.constant dense<0.000000e+00> : vector<8x256xf32>
    %270 = tpu.matmul %269, %267, %cst_274 {dimension_numbers = #tpu.dot_dimension_numbers<[1], [0], [0], [1], [0, 0, 1, 1], [], []>} : vector<8x8xf32>, vector<8x256xf32>, vector<8x256xf32> -> vector<8x256xf32>
    %271 = arith.addf %266, %270 : vector<8x256xf32>
    %c0_275 = arith.constant 0 : index
    %c113_276 = arith.constant 113 : index
    %272 = vector.load %arg15[%c0_275, %c113_276] : memref<8x512xf32, #tpu.memory_space<vmem>>, vector<8x256xf32>
    %273 = vector.broadcast %71 : vector<1x256xf32> to vector<8x256xf32>
    %274 = arith.mulf %272, %273 : vector<8x256xf32>
    %c29_277 = arith.constant 29 : index
    %c0_278 = arith.constant 0 : index
    %c0_279 = arith.constant 0 : index
    %275 = vector.load %arg6[%c29_277, %c0_278, %c0_279] : memref<45x8x8xf32, #tpu.memory_space<vmem>>, vector<1x8x8xf32>
    %276 = vector.shape_cast %275 : vector<1x8x8xf32> to vector<8x8xf32>
    %cst_280 = arith.constant dense<0.000000e+00> : vector<8x256xf32>
    %277 = tpu.matmul %276, %274, %cst_280 {dimension_numbers = #tpu.dot_dimension_numbers<[1], [0], [0], [1], [0, 0, 1, 1], [], []>} : vector<8x8xf32>, vector<8x256xf32>, vector<8x256xf32> -> vector<8x256xf32>
    %278 = arith.addf %271, %277 : vector<8x256xf32>
    %c0_281 = arith.constant 0 : index
    %c127_282 = arith.constant 127 : index
    %279 = vector.load %arg15[%c0_281, %c127_282] : memref<8x512xf32, #tpu.memory_space<vmem>>, vector<8x256xf32>
    %280 = vector.broadcast %70 : vector<1x256xf32> to vector<8x256xf32>
    %281 = arith.mulf %279, %280 : vector<8x256xf32>
    %c30_283 = arith.constant 30 : index
    %c0_284 = arith.constant 0 : index
    %c0_285 = arith.constant 0 : index
    %282 = vector.load %arg6[%c30_283, %c0_284, %c0_285] : memref<45x8x8xf32, #tpu.memory_space<vmem>>, vector<1x8x8xf32>
    %283 = vector.shape_cast %282 : vector<1x8x8xf32> to vector<8x8xf32>
    %cst_286 = arith.constant dense<0.000000e+00> : vector<8x256xf32>
    %284 = tpu.matmul %283, %281, %cst_286 {dimension_numbers = #tpu.dot_dimension_numbers<[1], [0], [0], [1], [0, 0, 1, 1], [], []>} : vector<8x8xf32>, vector<8x256xf32>, vector<8x256xf32> -> vector<8x256xf32>
    %285 = arith.addf %278, %284 : vector<8x256xf32>
    %c0_287 = arith.constant 0 : index
    %c128_288 = arith.constant 128 : index
    %286 = vector.load %arg15[%c0_287, %c128_288] : memref<8x512xf32, #tpu.memory_space<vmem>>, vector<8x256xf32>
    %c31_289 = arith.constant 31 : index
    %c0_290 = arith.constant 0 : index
    %c0_291 = arith.constant 0 : index
    %287 = vector.load %arg6[%c31_289, %c0_290, %c0_291] : memref<45x8x8xf32, #tpu.memory_space<vmem>>, vector<1x8x8xf32>
    %288 = vector.shape_cast %287 : vector<1x8x8xf32> to vector<8x8xf32>
    %cst_292 = arith.constant dense<0.000000e+00> : vector<8x256xf32>
    %289 = tpu.matmul %288, %286, %cst_292 {dimension_numbers = #tpu.dot_dimension_numbers<[1], [0], [0], [1], [0, 0, 1, 1], [], []>} : vector<8x8xf32>, vector<8x256xf32>, vector<8x256xf32> -> vector<8x256xf32>
    %290 = arith.addf %285, %289 : vector<8x256xf32>
    %c0_293 = arith.constant 0 : index
    %c129_294 = arith.constant 129 : index
    %291 = vector.load %arg15[%c0_293, %c129_294] : memref<8x512xf32, #tpu.memory_space<vmem>>, vector<8x256xf32>
    %292 = vector.broadcast %71 : vector<1x256xf32> to vector<8x256xf32>
    %293 = arith.mulf %291, %292 : vector<8x256xf32>
    %c32 = arith.constant 32 : index
    %c0_295 = arith.constant 0 : index
    %c0_296 = arith.constant 0 : index
    %294 = vector.load %arg6[%c32, %c0_295, %c0_296] : memref<45x8x8xf32, #tpu.memory_space<vmem>>, vector<1x8x8xf32>
    %295 = vector.shape_cast %294 : vector<1x8x8xf32> to vector<8x8xf32>
    %cst_297 = arith.constant dense<0.000000e+00> : vector<8x256xf32>
    %296 = tpu.matmul %295, %293, %cst_297 {dimension_numbers = #tpu.dot_dimension_numbers<[1], [0], [0], [1], [0, 0, 1, 1], [], []>} : vector<8x8xf32>, vector<8x256xf32>, vector<8x256xf32> -> vector<8x256xf32>
    %297 = arith.addf %290, %296 : vector<8x256xf32>
    %c0_298 = arith.constant 0 : index
    %c143_299 = arith.constant 143 : index
    %298 = vector.load %arg15[%c0_298, %c143_299] : memref<8x512xf32, #tpu.memory_space<vmem>>, vector<8x256xf32>
    %299 = vector.broadcast %70 : vector<1x256xf32> to vector<8x256xf32>
    %300 = arith.mulf %298, %299 : vector<8x256xf32>
    %c33 = arith.constant 33 : index
    %c0_300 = arith.constant 0 : index
    %c0_301 = arith.constant 0 : index
    %301 = vector.load %arg6[%c33, %c0_300, %c0_301] : memref<45x8x8xf32, #tpu.memory_space<vmem>>, vector<1x8x8xf32>
    %302 = vector.shape_cast %301 : vector<1x8x8xf32> to vector<8x8xf32>
    %cst_302 = arith.constant dense<0.000000e+00> : vector<8x256xf32>
    %303 = tpu.matmul %302, %300, %cst_302 {dimension_numbers = #tpu.dot_dimension_numbers<[1], [0], [0], [1], [0, 0, 1, 1], [], []>} : vector<8x8xf32>, vector<8x256xf32>, vector<8x256xf32> -> vector<8x256xf32>
    %304 = arith.addf %297, %303 : vector<8x256xf32>
    %c0_303 = arith.constant 0 : index
    %c144_304 = arith.constant 144 : index
    %305 = vector.load %arg15[%c0_303, %c144_304] : memref<8x512xf32, #tpu.memory_space<vmem>>, vector<8x256xf32>
    %c34 = arith.constant 34 : index
    %c0_305 = arith.constant 0 : index
    %c0_306 = arith.constant 0 : index
    %306 = vector.load %arg6[%c34, %c0_305, %c0_306] : memref<45x8x8xf32, #tpu.memory_space<vmem>>, vector<1x8x8xf32>
    %307 = vector.shape_cast %306 : vector<1x8x8xf32> to vector<8x8xf32>
    %cst_307 = arith.constant dense<0.000000e+00> : vector<8x256xf32>
    %308 = tpu.matmul %307, %305, %cst_307 {dimension_numbers = #tpu.dot_dimension_numbers<[1], [0], [0], [1], [0, 0, 1, 1], [], []>} : vector<8x8xf32>, vector<8x256xf32>, vector<8x256xf32> -> vector<8x256xf32>
    %309 = arith.addf %304, %308 : vector<8x256xf32>
    %c0_308 = arith.constant 0 : index
    %c145_309 = arith.constant 145 : index
    %310 = vector.load %arg15[%c0_308, %c145_309] : memref<8x512xf32, #tpu.memory_space<vmem>>, vector<8x256xf32>
    %311 = vector.broadcast %71 : vector<1x256xf32> to vector<8x256xf32>
    %312 = arith.mulf %310, %311 : vector<8x256xf32>
    %c35 = arith.constant 35 : index
    %c0_310 = arith.constant 0 : index
    %c0_311 = arith.constant 0 : index
    %313 = vector.load %arg6[%c35, %c0_310, %c0_311] : memref<45x8x8xf32, #tpu.memory_space<vmem>>, vector<1x8x8xf32>
    %314 = vector.shape_cast %313 : vector<1x8x8xf32> to vector<8x8xf32>
    %cst_312 = arith.constant dense<0.000000e+00> : vector<8x256xf32>
    %315 = tpu.matmul %314, %312, %cst_312 {dimension_numbers = #tpu.dot_dimension_numbers<[1], [0], [0], [1], [0, 0, 1, 1], [], []>} : vector<8x8xf32>, vector<8x256xf32>, vector<8x256xf32> -> vector<8x256xf32>
    %316 = arith.addf %309, %315 : vector<8x256xf32>
    %c3_313 = arith.constant 3 : index
    %c0_314 = arith.constant 0 : index
    %c0_315 = arith.constant 0 : index
    %317 = vector.load %arg7[%c3_313, %c0_314, %c0_315] : memref<5x8x1xf32, #tpu.memory_space<vmem>>, vector<1x8x1xf32>
    %318 = vector.shape_cast %317 : vector<1x8x1xf32> to vector<8x1xf32>
    %319 = vector.broadcast %318 : vector<8x1xf32> to vector<8x256xf32>
    %320 = arith.addf %316, %319 : vector<8x256xf32>
    %cst_316 = arith.constant 0.000000e+00 : f32
    %321 = vector.broadcast %cst_316 : f32 to vector<8x256xf32>
    %322 = arith.maximumf %320, %321 : vector<8x256xf32>
    %c0_317 = arith.constant 0 : index
    %c128_318 = arith.constant 128 : index
    %323 = vector.load %arg15[%c0_317, %c128_318] : memref<8x512xf32, #tpu.memory_space<vmem>>, vector<8x256xf32>
    tpu.vector_store %arg15[%c0_317, %c128_318], %322 {strides = array<i32>} : memref<8x512xf32, #tpu.memory_space<vmem>>, vector<8x256xf32>,
    %c0_319 = arith.constant 0 : index
    %c111_320 = arith.constant 111 : index
    %324 = vector.load %arg15[%c0_319, %c111_320] : memref<8x512xf32, #tpu.memory_space<vmem>>, vector<8x256xf32>
    %325 = vector.broadcast %70 : vector<1x256xf32> to vector<8x256xf32>
    %326 = arith.mulf %324, %325 : vector<8x256xf32>
    %c36 = arith.constant 36 : index
    %c0_321 = arith.constant 0 : index
    %c0_322 = arith.constant 0 : index
    %327 = vector.load %arg6[%c36, %c0_321, %c0_322] : memref<45x8x8xf32, #tpu.memory_space<vmem>>, vector<1x8x8xf32>
    %328 = vector.shape_cast %327 : vector<1x8x8xf32> to vector<8x8xf32>
    %cst_323 = arith.constant dense<0.000000e+00> : vector<8x256xf32>
    %329 = tpu.matmul %328, %326, %cst_323 {dimension_numbers = #tpu.dot_dimension_numbers<[1], [0], [0], [1], [0, 0, 1, 1], [], []>} : vector<8x8xf32>, vector<8x256xf32>, vector<8x256xf32> -> vector<8x256xf32>
    %c0_324 = arith.constant 0 : index
    %c112_325 = arith.constant 112 : index
    %330 = vector.load %arg15[%c0_324, %c112_325] : memref<8x512xf32, #tpu.memory_space<vmem>>, vector<8x256xf32>
    %c37 = arith.constant 37 : index
    %c0_326 = arith.constant 0 : index
    %c0_327 = arith.constant 0 : index
    %331 = vector.load %arg6[%c37, %c0_326, %c0_327] : memref<45x8x8xf32, #tpu.memory_space<vmem>>, vector<1x8x8xf32>
    %332 = vector.shape_cast %331 : vector<1x8x8xf32> to vector<8x8xf32>
    %cst_328 = arith.constant dense<0.000000e+00> : vector<8x256xf32>
    %333 = tpu.matmul %332, %330, %cst_328 {dimension_numbers = #tpu.dot_dimension_numbers<[1], [0], [0], [1], [0, 0, 1, 1], [], []>} : vector<8x8xf32>, vector<8x256xf32>, vector<8x256xf32> -> vector<8x256xf32>
    %334 = arith.addf %329, %333 : vector<8x256xf32>
    %c0_329 = arith.constant 0 : index
    %c113_330 = arith.constant 113 : index
    %335 = vector.load %arg15[%c0_329, %c113_330] : memref<8x512xf32, #tpu.memory_space<vmem>>, vector<8x256xf32>
    %336 = vector.broadcast %71 : vector<1x256xf32> to vector<8x256xf32>
    %337 = arith.mulf %335, %336 : vector<8x256xf32>
    %c38 = arith.constant 38 : index
    %c0_331 = arith.constant 0 : index
    %c0_332 = arith.constant 0 : index
    %338 = vector.load %arg6[%c38, %c0_331, %c0_332] : memref<45x8x8xf32, #tpu.memory_space<vmem>>, vector<1x8x8xf32>
    %339 = vector.shape_cast %338 : vector<1x8x8xf32> to vector<8x8xf32>
    %cst_333 = arith.constant dense<0.000000e+00> : vector<8x256xf32>
    %340 = tpu.matmul %339, %337, %cst_333 {dimension_numbers = #tpu.dot_dimension_numbers<[1], [0], [0], [1], [0, 0, 1, 1], [], []>} : vector<8x8xf32>, vector<8x256xf32>, vector<8x256xf32> -> vector<8x256xf32>
    %341 = arith.addf %334, %340 : vector<8x256xf32>
    %c0_334 = arith.constant 0 : index
    %c127_335 = arith.constant 127 : index
    %342 = vector.load %arg15[%c0_334, %c127_335] : memref<8x512xf32, #tpu.memory_space<vmem>>, vector<8x256xf32>
    %343 = vector.broadcast %70 : vector<1x256xf32> to vector<8x256xf32>
    %344 = arith.mulf %342, %343 : vector<8x256xf32>
    %c39 = arith.constant 39 : index
    %c0_336 = arith.constant 0 : index
    %c0_337 = arith.constant 0 : index
    %345 = vector.load %arg6[%c39, %c0_336, %c0_337] : memref<45x8x8xf32, #tpu.memory_space<vmem>>, vector<1x8x8xf32>
    %346 = vector.shape_cast %345 : vector<1x8x8xf32> to vector<8x8xf32>
    %cst_338 = arith.constant dense<0.000000e+00> : vector<8x256xf32>
    %347 = tpu.matmul %346, %344, %cst_338 {dimension_numbers = #tpu.dot_dimension_numbers<[1], [0], [0], [1], [0, 0, 1, 1], [], []>} : vector<8x8xf32>, vector<8x256xf32>, vector<8x256xf32> -> vector<8x256xf32>
    %348 = arith.addf %341, %347 : vector<8x256xf32>
    %c0_339 = arith.constant 0 : index
    %c128_340 = arith.constant 128 : index
    %349 = vector.load %arg15[%c0_339, %c128_340] : memref<8x512xf32, #tpu.memory_space<vmem>>, vector<8x256xf32>
    %c40 = arith.constant 40 : index
    %c0_341 = arith.constant 0 : index
    %c0_342 = arith.constant 0 : index
    %350 = vector.load %arg6[%c40, %c0_341, %c0_342] : memref<45x8x8xf32, #tpu.memory_space<vmem>>, vector<1x8x8xf32>
    %351 = vector.shape_cast %350 : vector<1x8x8xf32> to vector<8x8xf32>
    %cst_343 = arith.constant dense<0.000000e+00> : vector<8x256xf32>
    %352 = tpu.matmul %351, %349, %cst_343 {dimension_numbers = #tpu.dot_dimension_numbers<[1], [0], [0], [1], [0, 0, 1, 1], [], []>} : vector<8x8xf32>, vector<8x256xf32>, vector<8x256xf32> -> vector<8x256xf32>
    %353 = arith.addf %348, %352 : vector<8x256xf32>
    %c0_344 = arith.constant 0 : index
    %c129_345 = arith.constant 129 : index
    %354 = vector.load %arg15[%c0_344, %c129_345] : memref<8x512xf32, #tpu.memory_space<vmem>>, vector<8x256xf32>
    %355 = vector.broadcast %71 : vector<1x256xf32> to vector<8x256xf32>
    %356 = arith.mulf %354, %355 : vector<8x256xf32>
    %c41 = arith.constant 41 : index
    %c0_346 = arith.constant 0 : index
    %c0_347 = arith.constant 0 : index
    %357 = vector.load %arg6[%c41, %c0_346, %c0_347] : memref<45x8x8xf32, #tpu.memory_space<vmem>>, vector<1x8x8xf32>
    %358 = vector.shape_cast %357 : vector<1x8x8xf32> to vector<8x8xf32>
    %cst_348 = arith.constant dense<0.000000e+00> : vector<8x256xf32>
    %359 = tpu.matmul %358, %356, %cst_348 {dimension_numbers = #tpu.dot_dimension_numbers<[1], [0], [0], [1], [0, 0, 1, 1], [], []>} : vector<8x8xf32>, vector<8x256xf32>, vector<8x256xf32> -> vector<8x256xf32>
    %360 = arith.addf %353, %359 : vector<8x256xf32>
    %c0_349 = arith.constant 0 : index
    %c143_350 = arith.constant 143 : index
    %361 = vector.load %arg15[%c0_349, %c143_350] : memref<8x512xf32, #tpu.memory_space<vmem>>, vector<8x256xf32>
    %362 = vector.broadcast %70 : vector<1x256xf32> to vector<8x256xf32>
    %363 = arith.mulf %361, %362 : vector<8x256xf32>
    %c42 = arith.constant 42 : index
    %c0_351 = arith.constant 0 : index
    %c0_352 = arith.constant 0 : index
    %364 = vector.load %arg6[%c42, %c0_351, %c0_352] : memref<45x8x8xf32, #tpu.memory_space<vmem>>, vector<1x8x8xf32>
    %365 = vector.shape_cast %364 : vector<1x8x8xf32> to vector<8x8xf32>
    %cst_353 = arith.constant dense<0.000000e+00> : vector<8x256xf32>
    %366 = tpu.matmul %365, %363, %cst_353 {dimension_numbers = #tpu.dot_dimension_numbers<[1], [0], [0], [1], [0, 0, 1, 1], [], []>} : vector<8x8xf32>, vector<8x256xf32>, vector<8x256xf32> -> vector<8x256xf32>
    %367 = arith.addf %360, %366 : vector<8x256xf32>
    %c0_354 = arith.constant 0 : index
    %c144_355 = arith.constant 144 : index
    %368 = vector.load %arg15[%c0_354, %c144_355] : memref<8x512xf32, #tpu.memory_space<vmem>>, vector<8x256xf32>
    %c43 = arith.constant 43 : index
    %c0_356 = arith.constant 0 : index
    %c0_357 = arith.constant 0 : index
    %369 = vector.load %arg6[%c43, %c0_356, %c0_357] : memref<45x8x8xf32, #tpu.memory_space<vmem>>, vector<1x8x8xf32>
    %370 = vector.shape_cast %369 : vector<1x8x8xf32> to vector<8x8xf32>
    %cst_358 = arith.constant dense<0.000000e+00> : vector<8x256xf32>
    %371 = tpu.matmul %370, %368, %cst_358 {dimension_numbers = #tpu.dot_dimension_numbers<[1], [0], [0], [1], [0, 0, 1, 1], [], []>} : vector<8x8xf32>, vector<8x256xf32>, vector<8x256xf32> -> vector<8x256xf32>
    %372 = arith.addf %367, %371 : vector<8x256xf32>
    %c0_359 = arith.constant 0 : index
    %c145_360 = arith.constant 145 : index
    %373 = vector.load %arg15[%c0_359, %c145_360] : memref<8x512xf32, #tpu.memory_space<vmem>>, vector<8x256xf32>
    %374 = vector.broadcast %71 : vector<1x256xf32> to vector<8x256xf32>
    %375 = arith.mulf %373, %374 : vector<8x256xf32>
    %c44 = arith.constant 44 : index
    %c0_361 = arith.constant 0 : index
    %c0_362 = arith.constant 0 : index
    %376 = vector.load %arg6[%c44, %c0_361, %c0_362] : memref<45x8x8xf32, #tpu.memory_space<vmem>>, vector<1x8x8xf32>
    %377 = vector.shape_cast %376 : vector<1x8x8xf32> to vector<8x8xf32>
    %cst_363 = arith.constant dense<0.000000e+00> : vector<8x256xf32>
    %378 = tpu.matmul %377, %375, %cst_363 {dimension_numbers = #tpu.dot_dimension_numbers<[1], [0], [0], [1], [0, 0, 1, 1], [], []>} : vector<8x8xf32>, vector<8x256xf32>, vector<8x256xf32> -> vector<8x256xf32>
    %379 = arith.addf %372, %378 : vector<8x256xf32>
    %c4_364 = arith.constant 4 : index
    %c0_365 = arith.constant 0 : index
    %c0_366 = arith.constant 0 : index
    %380 = vector.load %arg7[%c4_364, %c0_365, %c0_366] : memref<5x8x1xf32, #tpu.memory_space<vmem>>, vector<1x8x1xf32>
    %381 = vector.shape_cast %380 : vector<1x8x1xf32> to vector<8x1xf32>
    %382 = vector.broadcast %381 : vector<8x1xf32> to vector<8x256xf32>
    %383 = arith.addf %379, %382 : vector<8x256xf32>
    %384 = vector.extract_strided_slice %383 {offsets = [0, 0], sizes = [2, 256], strides = [1, 1]} : vector<8x256xf32> to vector<2x256xf32>
    %c0_367 = arith.constant 0 : index
    %c0_368 = arith.constant 0 : index
    %385 = vector.load %arg16[%c0_367, %c0_368] : memref<32x16xf32, #tpu.memory_space<vmem>>, vector<1x16xf32>
    %386 = vector.extract_strided_slice %384 {offsets = [0, 0], sizes = [1, 16], strides = [1, 1]} : vector<2x256xf32> to vector<1x16xf32>
    %387 = arith.addf %385, %386 : vector<1x16xf32>
    %c0_369 = arith.constant 0 : index
    %c0_370 = arith.constant 0 : index
    %388 = vector.load %arg16[%c0_369, %c0_370] : memref<32x16xf32, #tpu.memory_space<vmem>>, vector<1x16xf32>
    tpu.vector_store %arg16[%c0_369, %c0_370], %387 {strides = array<i32>} : memref<32x16xf32, #tpu.memory_space<vmem>>, vector<1x16xf32>,
    %c16_371 = arith.constant 16 : index
    %c0_372 = arith.constant 0 : index
    %389 = vector.load %arg16[%c16_371, %c0_372] : memref<32x16xf32, #tpu.memory_space<vmem>>, vector<1x16xf32>
    %390 = vector.extract_strided_slice %384 {offsets = [1, 0], sizes = [1, 16], strides = [1, 1]} : vector<2x256xf32> to vector<1x16xf32>
    %391 = arith.addf %389, %390 : vector<1x16xf32>
    %c16_373 = arith.constant 16 : index
    %c0_374 = arith.constant 0 : index
    %392 = vector.load %arg16[%c16_373, %c0_374] : memref<32x16xf32, #tpu.memory_space<vmem>>, vector<1x16xf32>
    tpu.vector_store %arg16[%c16_373, %c0_374], %391 {strides = array<i32>} : memref<32x16xf32, #tpu.memory_space<vmem>>, vector<1x16xf32>,
    %c1_375 = arith.constant 1 : index
    %c0_376 = arith.constant 0 : index
    %393 = vector.load %arg16[%c1_375, %c0_376] : memref<32x16xf32, #tpu.memory_space<vmem>>, vector<1x16xf32>
    %394 = vector.extract_strided_slice %384 {offsets = [0, 16], sizes = [1, 16], strides = [1, 1]} : vector<2x256xf32> to vector<1x16xf32>
    %395 = arith.addf %393, %394 : vector<1x16xf32>
    %c1_377 = arith.constant 1 : index
    %c0_378 = arith.constant 0 : index
    %396 = vector.load %arg16[%c1_377, %c0_378] : memref<32x16xf32, #tpu.memory_space<vmem>>, vector<1x16xf32>
    tpu.vector_store %arg16[%c1_377, %c0_378], %395 {strides = array<i32>} : memref<32x16xf32, #tpu.memory_space<vmem>>, vector<1x16xf32>,
    %c17_379 = arith.constant 17 : index
    %c0_380 = arith.constant 0 : index
    %397 = vector.load %arg16[%c17_379, %c0_380] : memref<32x16xf32, #tpu.memory_space<vmem>>, vector<1x16xf32>
    %398 = vector.extract_strided_slice %384 {offsets = [1, 16], sizes = [1, 16], strides = [1, 1]} : vector<2x256xf32> to vector<1x16xf32>
    %399 = arith.addf %397, %398 : vector<1x16xf32>
    %c17_381 = arith.constant 17 : index
    %c0_382 = arith.constant 0 : index
    %400 = vector.load %arg16[%c17_381, %c0_382] : memref<32x16xf32, #tpu.memory_space<vmem>>, vector<1x16xf32>
    tpu.vector_store %arg16[%c17_381, %c0_382], %399 {strides = array<i32>} : memref<32x16xf32, #tpu.memory_space<vmem>>, vector<1x16xf32>,
    %c2_383 = arith.constant 2 : index
    %c0_384 = arith.constant 0 : index
    %401 = vector.load %arg16[%c2_383, %c0_384] : memref<32x16xf32, #tpu.memory_space<vmem>>, vector<1x16xf32>
    %402 = vector.extract_strided_slice %384 {offsets = [0, 32], sizes = [1, 16], strides = [1, 1]} : vector<2x256xf32> to vector<1x16xf32>
    %403 = arith.addf %401, %402 : vector<1x16xf32>
    %c2_385 = arith.constant 2 : index
    %c0_386 = arith.constant 0 : index
    %404 = vector.load %arg16[%c2_385, %c0_386] : memref<32x16xf32, #tpu.memory_space<vmem>>, vector<1x16xf32>
    tpu.vector_store %arg16[%c2_385, %c0_386], %403 {strides = array<i32>} : memref<32x16xf32, #tpu.memory_space<vmem>>, vector<1x16xf32>,
    %c18_387 = arith.constant 18 : index
    %c0_388 = arith.constant 0 : index
    %405 = vector.load %arg16[%c18_387, %c0_388] : memref<32x16xf32, #tpu.memory_space<vmem>>, vector<1x16xf32>
    %406 = vector.extract_strided_slice %384 {offsets = [1, 32], sizes = [1, 16], strides = [1, 1]} : vector<2x256xf32> to vector<1x16xf32>
    %407 = arith.addf %405, %406 : vector<1x16xf32>
    %c18_389 = arith.constant 18 : index
    %c0_390 = arith.constant 0 : index
    %408 = vector.load %arg16[%c18_389, %c0_390] : memref<32x16xf32, #tpu.memory_space<vmem>>, vector<1x16xf32>
    tpu.vector_store %arg16[%c18_389, %c0_390], %407 {strides = array<i32>} : memref<32x16xf32, #tpu.memory_space<vmem>>, vector<1x16xf32>,
    %c3_391 = arith.constant 3 : index
    %c0_392 = arith.constant 0 : index
    %409 = vector.load %arg16[%c3_391, %c0_392] : memref<32x16xf32, #tpu.memory_space<vmem>>, vector<1x16xf32>
    %410 = vector.extract_strided_slice %384 {offsets = [0, 48], sizes = [1, 16], strides = [1, 1]} : vector<2x256xf32> to vector<1x16xf32>
    %411 = arith.addf %409, %410 : vector<1x16xf32>
    %c3_393 = arith.constant 3 : index
    %c0_394 = arith.constant 0 : index
    %412 = vector.load %arg16[%c3_393, %c0_394] : memref<32x16xf32, #tpu.memory_space<vmem>>, vector<1x16xf32>
    tpu.vector_store %arg16[%c3_393, %c0_394], %411 {strides = array<i32>} : memref<32x16xf32, #tpu.memory_space<vmem>>, vector<1x16xf32>,
    %c19_395 = arith.constant 19 : index
    %c0_396 = arith.constant 0 : index
    %413 = vector.load %arg16[%c19_395, %c0_396] : memref<32x16xf32, #tpu.memory_space<vmem>>, vector<1x16xf32>
    %414 = vector.extract_strided_slice %384 {offsets = [1, 48], sizes = [1, 16], strides = [1, 1]} : vector<2x256xf32> to vector<1x16xf32>
    %415 = arith.addf %413, %414 : vector<1x16xf32>
    %c19_397 = arith.constant 19 : index
    %c0_398 = arith.constant 0 : index
    %416 = vector.load %arg16[%c19_397, %c0_398] : memref<32x16xf32, #tpu.memory_space<vmem>>, vector<1x16xf32>
    tpu.vector_store %arg16[%c19_397, %c0_398], %415 {strides = array<i32>} : memref<32x16xf32, #tpu.memory_space<vmem>>, vector<1x16xf32>,
    %c4_399 = arith.constant 4 : index
    %c0_400 = arith.constant 0 : index
    %417 = vector.load %arg16[%c4_399, %c0_400] : memref<32x16xf32, #tpu.memory_space<vmem>>, vector<1x16xf32>
    %418 = vector.extract_strided_slice %384 {offsets = [0, 64], sizes = [1, 16], strides = [1, 1]} : vector<2x256xf32> to vector<1x16xf32>
    %419 = arith.addf %417, %418 : vector<1x16xf32>
    %c4_401 = arith.constant 4 : index
    %c0_402 = arith.constant 0 : index
    %420 = vector.load %arg16[%c4_401, %c0_402] : memref<32x16xf32, #tpu.memory_space<vmem>>, vector<1x16xf32>
    tpu.vector_store %arg16[%c4_401, %c0_402], %419 {strides = array<i32>} : memref<32x16xf32, #tpu.memory_space<vmem>>, vector<1x16xf32>,
    %c20_403 = arith.constant 20 : index
    %c0_404 = arith.constant 0 : index
    %421 = vector.load %arg16[%c20_403, %c0_404] : memref<32x16xf32, #tpu.memory_space<vmem>>, vector<1x16xf32>
    %422 = vector.extract_strided_slice %384 {offsets = [1, 64], sizes = [1, 16], strides = [1, 1]} : vector<2x256xf32> to vector<1x16xf32>
    %423 = arith.addf %421, %422 : vector<1x16xf32>
    %c20_405 = arith.constant 20 : index
    %c0_406 = arith.constant 0 : index
    %424 = vector.load %arg16[%c20_405, %c0_406] : memref<32x16xf32, #tpu.memory_space<vmem>>, vector<1x16xf32>
    tpu.vector_store %arg16[%c20_405, %c0_406], %423 {strides = array<i32>} : memref<32x16xf32, #tpu.memory_space<vmem>>, vector<1x16xf32>,
    %c5_407 = arith.constant 5 : index
    %c0_408 = arith.constant 0 : index
    %425 = vector.load %arg16[%c5_407, %c0_408] : memref<32x16xf32, #tpu.memory_space<vmem>>, vector<1x16xf32>
    %426 = vector.extract_strided_slice %384 {offsets = [0, 80], sizes = [1, 16], strides = [1, 1]} : vector<2x256xf32> to vector<1x16xf32>
    %427 = arith.addf %425, %426 : vector<1x16xf32>
    %c5_409 = arith.constant 5 : index
    %c0_410 = arith.constant 0 : index
    %428 = vector.load %arg16[%c5_409, %c0_410] : memref<32x16xf32, #tpu.memory_space<vmem>>, vector<1x16xf32>
    tpu.vector_store %arg16[%c5_409, %c0_410], %427 {strides = array<i32>} : memref<32x16xf32, #tpu.memory_space<vmem>>, vector<1x16xf32>,
    %c21_411 = arith.constant 21 : index
    %c0_412 = arith.constant 0 : index
    %429 = vector.load %arg16[%c21_411, %c0_412] : memref<32x16xf32, #tpu.memory_space<vmem>>, vector<1x16xf32>
    %430 = vector.extract_strided_slice %384 {offsets = [1, 80], sizes = [1, 16], strides = [1, 1]} : vector<2x256xf32> to vector<1x16xf32>
    %431 = arith.addf %429, %430 : vector<1x16xf32>
    %c21_413 = arith.constant 21 : index
    %c0_414 = arith.constant 0 : index
    %432 = vector.load %arg16[%c21_413, %c0_414] : memref<32x16xf32, #tpu.memory_space<vmem>>, vector<1x16xf32>
    tpu.vector_store %arg16[%c21_413, %c0_414], %431 {strides = array<i32>} : memref<32x16xf32, #tpu.memory_space<vmem>>, vector<1x16xf32>,
    %c6_415 = arith.constant 6 : index
    %c0_416 = arith.constant 0 : index
    %433 = vector.load %arg16[%c6_415, %c0_416] : memref<32x16xf32, #tpu.memory_space<vmem>>, vector<1x16xf32>
    %434 = vector.extract_strided_slice %384 {offsets = [0, 96], sizes = [1, 16], strides = [1, 1]} : vector<2x256xf32> to vector<1x16xf32>
    %435 = arith.addf %433, %434 : vector<1x16xf32>
    %c6_417 = arith.constant 6 : index
    %c0_418 = arith.constant 0 : index
    %436 = vector.load %arg16[%c6_417, %c0_418] : memref<32x16xf32, #tpu.memory_space<vmem>>, vector<1x16xf32>
    tpu.vector_store %arg16[%c6_417, %c0_418], %435 {strides = array<i32>} : memref<32x16xf32, #tpu.memory_space<vmem>>, vector<1x16xf32>,
    %c22_419 = arith.constant 22 : index
    %c0_420 = arith.constant 0 : index
    %437 = vector.load %arg16[%c22_419, %c0_420] : memref<32x16xf32, #tpu.memory_space<vmem>>, vector<1x16xf32>
    %438 = vector.extract_strided_slice %384 {offsets = [1, 96], sizes = [1, 16], strides = [1, 1]} : vector<2x256xf32> to vector<1x16xf32>
    %439 = arith.addf %437, %438 : vector<1x16xf32>
    %c22_421 = arith.constant 22 : index
    %c0_422 = arith.constant 0 : index
    %440 = vector.load %arg16[%c22_421, %c0_422] : memref<32x16xf32, #tpu.memory_space<vmem>>, vector<1x16xf32>
    tpu.vector_store %arg16[%c22_421, %c0_422], %439 {strides = array<i32>} : memref<32x16xf32, #tpu.memory_space<vmem>>, vector<1x16xf32>,
    %c7_423 = arith.constant 7 : index
    %c0_424 = arith.constant 0 : index
    %441 = vector.load %arg16[%c7_423, %c0_424] : memref<32x16xf32, #tpu.memory_space<vmem>>, vector<1x16xf32>
    %442 = vector.extract_strided_slice %384 {offsets = [0, 112], sizes = [1, 16], strides = [1, 1]} : vector<2x256xf32> to vector<1x16xf32>
    %443 = arith.addf %441, %442 : vector<1x16xf32>
    %c7_425 = arith.constant 7 : index
    %c0_426 = arith.constant 0 : index
    %444 = vector.load %arg16[%c7_425, %c0_426] : memref<32x16xf32, #tpu.memory_space<vmem>>, vector<1x16xf32>
    tpu.vector_store %arg16[%c7_425, %c0_426], %443 {strides = array<i32>} : memref<32x16xf32, #tpu.memory_space<vmem>>, vector<1x16xf32>,
    %c23_427 = arith.constant 23 : index
    %c0_428 = arith.constant 0 : index
    %445 = vector.load %arg16[%c23_427, %c0_428] : memref<32x16xf32, #tpu.memory_space<vmem>>, vector<1x16xf32>
    %446 = vector.extract_strided_slice %384 {offsets = [1, 112], sizes = [1, 16], strides = [1, 1]} : vector<2x256xf32> to vector<1x16xf32>
    %447 = arith.addf %445, %446 : vector<1x16xf32>
    %c23_429 = arith.constant 23 : index
    %c0_430 = arith.constant 0 : index
    %448 = vector.load %arg16[%c23_429, %c0_430] : memref<32x16xf32, #tpu.memory_space<vmem>>, vector<1x16xf32>
    tpu.vector_store %arg16[%c23_429, %c0_430], %447 {strides = array<i32>} : memref<32x16xf32, #tpu.memory_space<vmem>>, vector<1x16xf32>,
    %c8_431 = arith.constant 8 : index
    %c0_432 = arith.constant 0 : index
    %449 = vector.load %arg16[%c8_431, %c0_432] : memref<32x16xf32, #tpu.memory_space<vmem>>, vector<1x16xf32>
    %450 = vector.extract_strided_slice %384 {offsets = [0, 128], sizes = [1, 16], strides = [1, 1]} : vector<2x256xf32> to vector<1x16xf32>
    %451 = arith.addf %449, %450 : vector<1x16xf32>
    %c8_433 = arith.constant 8 : index
    %c0_434 = arith.constant 0 : index
    %452 = vector.load %arg16[%c8_433, %c0_434] : memref<32x16xf32, #tpu.memory_space<vmem>>, vector<1x16xf32>
    tpu.vector_store %arg16[%c8_433, %c0_434], %451 {strides = array<i32>} : memref<32x16xf32, #tpu.memory_space<vmem>>, vector<1x16xf32>,
    %c24_435 = arith.constant 24 : index
    %c0_436 = arith.constant 0 : index
    %453 = vector.load %arg16[%c24_435, %c0_436] : memref<32x16xf32, #tpu.memory_space<vmem>>, vector<1x16xf32>
    %454 = vector.extract_strided_slice %384 {offsets = [1, 128], sizes = [1, 16], strides = [1, 1]} : vector<2x256xf32> to vector<1x16xf32>
    %455 = arith.addf %453, %454 : vector<1x16xf32>
    %c24_437 = arith.constant 24 : index
    %c0_438 = arith.constant 0 : index
    %456 = vector.load %arg16[%c24_437, %c0_438] : memref<32x16xf32, #tpu.memory_space<vmem>>, vector<1x16xf32>
    tpu.vector_store %arg16[%c24_437, %c0_438], %455 {strides = array<i32>} : memref<32x16xf32, #tpu.memory_space<vmem>>, vector<1x16xf32>,
    %c9_439 = arith.constant 9 : index
    %c0_440 = arith.constant 0 : index
    %457 = vector.load %arg16[%c9_439, %c0_440] : memref<32x16xf32, #tpu.memory_space<vmem>>, vector<1x16xf32>
    %458 = vector.extract_strided_slice %384 {offsets = [0, 144], sizes = [1, 16], strides = [1, 1]} : vector<2x256xf32> to vector<1x16xf32>
    %459 = arith.addf %457, %458 : vector<1x16xf32>
    %c9_441 = arith.constant 9 : index
    %c0_442 = arith.constant 0 : index
    %460 = vector.load %arg16[%c9_441, %c0_442] : memref<32x16xf32, #tpu.memory_space<vmem>>, vector<1x16xf32>
    tpu.vector_store %arg16[%c9_441, %c0_442], %459 {strides = array<i32>} : memref<32x16xf32, #tpu.memory_space<vmem>>, vector<1x16xf32>,
    %c25_443 = arith.constant 25 : index
    %c0_444 = arith.constant 0 : index
    %461 = vector.load %arg16[%c25_443, %c0_444] : memref<32x16xf32, #tpu.memory_space<vmem>>, vector<1x16xf32>
    %462 = vector.extract_strided_slice %384 {offsets = [1, 144], sizes = [1, 16], strides = [1, 1]} : vector<2x256xf32> to vector<1x16xf32>
    %463 = arith.addf %461, %462 : vector<1x16xf32>
    %c25_445 = arith.constant 25 : index
    %c0_446 = arith.constant 0 : index
    %464 = vector.load %arg16[%c25_445, %c0_446] : memref<32x16xf32, #tpu.memory_space<vmem>>, vector<1x16xf32>
    tpu.vector_store %arg16[%c25_445, %c0_446], %463 {strides = array<i32>} : memref<32x16xf32, #tpu.memory_space<vmem>>, vector<1x16xf32>,
    %c10_447 = arith.constant 10 : index
    %c0_448 = arith.constant 0 : index
    %465 = vector.load %arg16[%c10_447, %c0_448] : memref<32x16xf32, #tpu.memory_space<vmem>>, vector<1x16xf32>
    %466 = vector.extract_strided_slice %384 {offsets = [0, 160], sizes = [1, 16], strides = [1, 1]} : vector<2x256xf32> to vector<1x16xf32>
    %467 = arith.addf %465, %466 : vector<1x16xf32>
    %c10_449 = arith.constant 10 : index
    %c0_450 = arith.constant 0 : index
    %468 = vector.load %arg16[%c10_449, %c0_450] : memref<32x16xf32, #tpu.memory_space<vmem>>, vector<1x16xf32>
    tpu.vector_store %arg16[%c10_449, %c0_450], %467 {strides = array<i32>} : memref<32x16xf32, #tpu.memory_space<vmem>>, vector<1x16xf32>,
    %c26_451 = arith.constant 26 : index
    %c0_452 = arith.constant 0 : index
    %469 = vector.load %arg16[%c26_451, %c0_452] : memref<32x16xf32, #tpu.memory_space<vmem>>, vector<1x16xf32>
    %470 = vector.extract_strided_slice %384 {offsets = [1, 160], sizes = [1, 16], strides = [1, 1]} : vector<2x256xf32> to vector<1x16xf32>
    %471 = arith.addf %469, %470 : vector<1x16xf32>
    %c26_453 = arith.constant 26 : index
    %c0_454 = arith.constant 0 : index
    %472 = vector.load %arg16[%c26_453, %c0_454] : memref<32x16xf32, #tpu.memory_space<vmem>>, vector<1x16xf32>
    tpu.vector_store %arg16[%c26_453, %c0_454], %471 {strides = array<i32>} : memref<32x16xf32, #tpu.memory_space<vmem>>, vector<1x16xf32>,
    %c11_455 = arith.constant 11 : index
    %c0_456 = arith.constant 0 : index
    %473 = vector.load %arg16[%c11_455, %c0_456] : memref<32x16xf32, #tpu.memory_space<vmem>>, vector<1x16xf32>
    %474 = vector.extract_strided_slice %384 {offsets = [0, 176], sizes = [1, 16], strides = [1, 1]} : vector<2x256xf32> to vector<1x16xf32>
    %475 = arith.addf %473, %474 : vector<1x16xf32>
    %c11_457 = arith.constant 11 : index
    %c0_458 = arith.constant 0 : index
    %476 = vector.load %arg16[%c11_457, %c0_458] : memref<32x16xf32, #tpu.memory_space<vmem>>, vector<1x16xf32>
    tpu.vector_store %arg16[%c11_457, %c0_458], %475 {strides = array<i32>} : memref<32x16xf32, #tpu.memory_space<vmem>>, vector<1x16xf32>,
    %c27_459 = arith.constant 27 : index
    %c0_460 = arith.constant 0 : index
    %477 = vector.load %arg16[%c27_459, %c0_460] : memref<32x16xf32, #tpu.memory_space<vmem>>, vector<1x16xf32>
    %478 = vector.extract_strided_slice %384 {offsets = [1, 176], sizes = [1, 16], strides = [1, 1]} : vector<2x256xf32> to vector<1x16xf32>
    %479 = arith.addf %477, %478 : vector<1x16xf32>
    %c27_461 = arith.constant 27 : index
    %c0_462 = arith.constant 0 : index
    %480 = vector.load %arg16[%c27_461, %c0_462] : memref<32x16xf32, #tpu.memory_space<vmem>>, vector<1x16xf32>
    tpu.vector_store %arg16[%c27_461, %c0_462], %479 {strides = array<i32>} : memref<32x16xf32, #tpu.memory_space<vmem>>, vector<1x16xf32>,
    %c12_463 = arith.constant 12 : index
    %c0_464 = arith.constant 0 : index
    %481 = vector.load %arg16[%c12_463, %c0_464] : memref<32x16xf32, #tpu.memory_space<vmem>>, vector<1x16xf32>
    %482 = vector.extract_strided_slice %384 {offsets = [0, 192], sizes = [1, 16], strides = [1, 1]} : vector<2x256xf32> to vector<1x16xf32>
    %483 = arith.addf %481, %482 : vector<1x16xf32>
    %c12_465 = arith.constant 12 : index
    %c0_466 = arith.constant 0 : index
    %484 = vector.load %arg16[%c12_465, %c0_466] : memref<32x16xf32, #tpu.memory_space<vmem>>, vector<1x16xf32>
    tpu.vector_store %arg16[%c12_465, %c0_466], %483 {strides = array<i32>} : memref<32x16xf32, #tpu.memory_space<vmem>>, vector<1x16xf32>,
    %c28_467 = arith.constant 28 : index
    %c0_468 = arith.constant 0 : index
    %485 = vector.load %arg16[%c28_467, %c0_468] : memref<32x16xf32, #tpu.memory_space<vmem>>, vector<1x16xf32>
    %486 = vector.extract_strided_slice %384 {offsets = [1, 192], sizes = [1, 16], strides = [1, 1]} : vector<2x256xf32> to vector<1x16xf32>
    %487 = arith.addf %485, %486 : vector<1x16xf32>
    %c28_469 = arith.constant 28 : index
    %c0_470 = arith.constant 0 : index
    %488 = vector.load %arg16[%c28_469, %c0_470] : memref<32x16xf32, #tpu.memory_space<vmem>>, vector<1x16xf32>
    tpu.vector_store %arg16[%c28_469, %c0_470], %487 {strides = array<i32>} : memref<32x16xf32, #tpu.memory_space<vmem>>, vector<1x16xf32>,
    %c13_471 = arith.constant 13 : index
    %c0_472 = arith.constant 0 : index
    %489 = vector.load %arg16[%c13_471, %c0_472] : memref<32x16xf32, #tpu.memory_space<vmem>>, vector<1x16xf32>
    %490 = vector.extract_strided_slice %384 {offsets = [0, 208], sizes = [1, 16], strides = [1, 1]} : vector<2x256xf32> to vector<1x16xf32>
    %491 = arith.addf %489, %490 : vector<1x16xf32>
    %c13_473 = arith.constant 13 : index
    %c0_474 = arith.constant 0 : index
    %492 = vector.load %arg16[%c13_473, %c0_474] : memref<32x16xf32, #tpu.memory_space<vmem>>, vector<1x16xf32>
    tpu.vector_store %arg16[%c13_473, %c0_474], %491 {strides = array<i32>} : memref<32x16xf32, #tpu.memory_space<vmem>>, vector<1x16xf32>,
    %c29_475 = arith.constant 29 : index
    %c0_476 = arith.constant 0 : index
    %493 = vector.load %arg16[%c29_475, %c0_476] : memref<32x16xf32, #tpu.memory_space<vmem>>, vector<1x16xf32>
    %494 = vector.extract_strided_slice %384 {offsets = [1, 208], sizes = [1, 16], strides = [1, 1]} : vector<2x256xf32> to vector<1x16xf32>
    %495 = arith.addf %493, %494 : vector<1x16xf32>
    %c29_477 = arith.constant 29 : index
    %c0_478 = arith.constant 0 : index
    %496 = vector.load %arg16[%c29_477, %c0_478] : memref<32x16xf32, #tpu.memory_space<vmem>>, vector<1x16xf32>
    tpu.vector_store %arg16[%c29_477, %c0_478], %495 {strides = array<i32>} : memref<32x16xf32, #tpu.memory_space<vmem>>, vector<1x16xf32>,
    %c14_479 = arith.constant 14 : index
    %c0_480 = arith.constant 0 : index
    %497 = vector.load %arg16[%c14_479, %c0_480] : memref<32x16xf32, #tpu.memory_space<vmem>>, vector<1x16xf32>
    %498 = vector.extract_strided_slice %384 {offsets = [0, 224], sizes = [1, 16], strides = [1, 1]} : vector<2x256xf32> to vector<1x16xf32>
    %499 = arith.addf %497, %498 : vector<1x16xf32>
    %c14_481 = arith.constant 14 : index
    %c0_482 = arith.constant 0 : index
    %500 = vector.load %arg16[%c14_481, %c0_482] : memref<32x16xf32, #tpu.memory_space<vmem>>, vector<1x16xf32>
    tpu.vector_store %arg16[%c14_481, %c0_482], %499 {strides = array<i32>} : memref<32x16xf32, #tpu.memory_space<vmem>>, vector<1x16xf32>,
    %c30_483 = arith.constant 30 : index
    %c0_484 = arith.constant 0 : index
    %501 = vector.load %arg16[%c30_483, %c0_484] : memref<32x16xf32, #tpu.memory_space<vmem>>, vector<1x16xf32>
    %502 = vector.extract_strided_slice %384 {offsets = [1, 224], sizes = [1, 16], strides = [1, 1]} : vector<2x256xf32> to vector<1x16xf32>
    %503 = arith.addf %501, %502 : vector<1x16xf32>
    %c30_485 = arith.constant 30 : index
    %c0_486 = arith.constant 0 : index
    %504 = vector.load %arg16[%c30_485, %c0_486] : memref<32x16xf32, #tpu.memory_space<vmem>>, vector<1x16xf32>
    tpu.vector_store %arg16[%c30_485, %c0_486], %503 {strides = array<i32>} : memref<32x16xf32, #tpu.memory_space<vmem>>, vector<1x16xf32>,
    %c15_487 = arith.constant 15 : index
    %c0_488 = arith.constant 0 : index
    %505 = vector.load %arg16[%c15_487, %c0_488] : memref<32x16xf32, #tpu.memory_space<vmem>>, vector<1x16xf32>
    %506 = vector.extract_strided_slice %384 {offsets = [0, 240], sizes = [1, 16], strides = [1, 1]} : vector<2x256xf32> to vector<1x16xf32>
    %507 = arith.addf %505, %506 : vector<1x16xf32>
    %c15_489 = arith.constant 15 : index
    %c0_490 = arith.constant 0 : index
    %508 = vector.load %arg16[%c15_489, %c0_490] : memref<32x16xf32, #tpu.memory_space<vmem>>, vector<1x16xf32>
    tpu.vector_store %arg16[%c15_489, %c0_490], %507 {strides = array<i32>} : memref<32x16xf32, #tpu.memory_space<vmem>>, vector<1x16xf32>,
    %c31_491 = arith.constant 31 : index
    %c0_492 = arith.constant 0 : index
    %509 = vector.load %arg16[%c31_491, %c0_492] : memref<32x16xf32, #tpu.memory_space<vmem>>, vector<1x16xf32>
    %510 = vector.extract_strided_slice %384 {offsets = [1, 240], sizes = [1, 16], strides = [1, 1]} : vector<2x256xf32> to vector<1x16xf32>
    %511 = arith.addf %509, %510 : vector<1x16xf32>
    %c31_493 = arith.constant 31 : index
    %c0_494 = arith.constant 0 : index
    %512 = vector.load %arg16[%c31_493, %c0_494] : memref<32x16xf32, #tpu.memory_space<vmem>>, vector<1x16xf32>
    tpu.vector_store %arg16[%c31_493, %c0_494], %511 {strides = array<i32>} : memref<32x16xf32, #tpu.memory_space<vmem>>, vector<1x16xf32>,
    %c0_495 = arith.constant 0 : index
    %c0_496 = arith.constant 0 : index
    %513 = vector.load %arg16[%c0_495, %c0_496] : memref<32x16xf32, #tpu.memory_space<vmem>>, vector<32x16xf32>
    %cst_497 = arith.constant dense<0.000000e+00> : vector<32x16xf32>
    %514 = tpu.matmul %0, %513, %cst_497 {dimension_numbers = #tpu.dot_dimension_numbers<[1], [0], [0], [1], [0, 0, 1, 1], [], []>} : vector<32x32xf32>, vector<32x16xf32>, vector<32x16xf32> -> vector<32x16xf32>
    %cst_498 = arith.constant dense<0.000000e+00> : vector<32x32xf32>
    %515 = tpu.matmul %514, %2, %cst_498 {dimension_numbers = #tpu.dot_dimension_numbers<[1], [0], [0], [1], [0, 0, 1, 1], [], []>} : vector<32x16xf32>, vector<16x32xf32>, vector<32x32xf32> -> vector<32x32xf32>
    %516 = vector.extract_strided_slice %515 {offsets = [0, 0], sizes = [16, 16], strides = [1, 1]} : vector<32x32xf32> to vector<16x16xf32>
    %517 = vector.extract_strided_slice %515 {offsets = [16, 16], sizes = [16, 16], strides = [1, 1]} : vector<32x32xf32> to vector<16x16xf32>
    %518 = arith.subf %516, %517 : vector<16x16xf32>
    %519 = vector.extract_strided_slice %515 {offsets = [0, 16], sizes = [16, 16], strides = [1, 1]} : vector<32x32xf32> to vector<16x16xf32>
    %520 = vector.extract_strided_slice %515 {offsets = [16, 0], sizes = [16, 16], strides = [1, 1]} : vector<32x32xf32> to vector<16x16xf32>
    %521 = arith.addf %519, %520 : vector<16x16xf32>
    %522 = tpu.concatenate %518, %521 in 0 : vector<16x16xf32>, vector<16x16xf32> -> vector<32x16xf32>
    %c0_499 = arith.constant 0 : index
    %c0_500 = arith.constant 0 : index
    %523 = vector.load %arg18[%c0_499, %c0_500] : memref<32x16xf32, #tpu.memory_space<vmem>>, vector<32x16xf32>
    %cst_501 = arith.constant 1.000000e+00 : f32
    %524 = vector.broadcast %cst_501 : f32 to vector<32x16xf32>
    %525 = arith.subf %524, %523 : vector<32x16xf32>
    %526 = arith.mulf %525, %522 : vector<32x16xf32>
    %c0_502 = arith.constant 0 : index
    %c0_503 = arith.constant 0 : index
    %527 = vector.load %arg17[%c0_502, %c0_503] : memref<32x16xf32, #tpu.memory_space<vmem>>, vector<32x16xf32>
    %528 = arith.mulf %523, %527 : vector<32x16xf32>
    %529 = arith.addf %526, %528 : vector<32x16xf32>
    %cst_504 = arith.constant dense<0.000000e+00> : vector<32x16xf32>
    %530 = tpu.matmul %1, %529, %cst_504 {dimension_numbers = #tpu.dot_dimension_numbers<[1], [0], [0], [1], [0, 0, 1, 1], [], []>} : vector<32x32xf32>, vector<32x16xf32>, vector<32x16xf32> -> vector<32x16xf32>
    %cst_505 = arith.constant dense<0.000000e+00> : vector<32x32xf32>
    %531 = tpu.matmul %530, %2, %cst_505 {dimension_numbers = #tpu.dot_dimension_numbers<[1], [0], [0], [1], [0, 0, 1, 1], [], []>} : vector<32x16xf32>, vector<16x32xf32>, vector<32x32xf32> -> vector<32x32xf32>
    %532 = vector.extract_strided_slice %531 {offsets = [0, 0], sizes = [16, 16], strides = [1, 1]} : vector<32x32xf32> to vector<16x16xf32>
    %533 = vector.extract_strided_slice %531 {offsets = [16, 16], sizes = [16, 16], strides = [1, 1]} : vector<32x32xf32> to vector<16x16xf32>
    %534 = arith.addf %532, %533 : vector<16x16xf32>
    %535 = vector.extract_strided_slice %531 {offsets = [16, 0], sizes = [16, 16], strides = [1, 1]} : vector<32x32xf32> to vector<16x16xf32>
    %536 = vector.extract_strided_slice %531 {offsets = [0, 16], sizes = [16, 16], strides = [1, 1]} : vector<32x32xf32> to vector<16x16xf32>
    %537 = arith.subf %535, %536 : vector<16x16xf32>
    %538 = tpu.concatenate %534, %537 in 0 : vector<16x16xf32>, vector<16x16xf32> -> vector<32x16xf32>
    %c0_506 = arith.constant 0 : index
    %c0_507 = arith.constant 0 : index
    %539 = vector.load %arg16[%c0_506, %c0_507] : memref<32x16xf32, #tpu.memory_space<vmem>>, vector<32x16xf32>
    tpu.vector_store %arg16[%c0_506, %c0_507], %538 {strides = array<i32>} : memref<32x16xf32, #tpu.memory_space<vmem>>, vector<32x16xf32>,
    %c4_i32 = arith.constant 4 : i32
    %540 = arith.cmpi eq, %arg1, %c4_i32 : i32
    %541 = arith.extui %540 : i1 to i32
    %c0_i32_508 = arith.constant 0 : i32
    %542 = arith.cmpi ne, %541, %c0_i32_508 : i32
    scf.if %542 {
      %c0_509 = arith.constant 0 : index
      %c0_510 = arith.constant 0 : index
      %c0_511 = arith.constant 0 : index
      %543 = vector.load %arg12[%c0_509, %c0_510, %c0_511] : memref<1x32x16xf32, #tpu.memory_space<vmem>>, vector<1x32x16xf32>
      %544 = vector.shape_cast %543 : vector<1x32x16xf32> to vector<32x16xf32>
      %545 = vector.shape_cast %538 : vector<32x16xf32> to vector<1x32x16xf32>
      tpu.vector_store %arg12[%c0_509, %c0_510, %c0_511], %545 {strides = array<i32>} : memref<1x32x16xf32, #tpu.memory_space<vmem>>, vector<1x32x16xf32>,
    } else {
    }
    return
  }
  func.func @transform_0(%arg0: i32, %arg1: i32) -> (i32, i32) {
    %c0_i32 = arith.constant 0 : i32
    %c0_i32_0 = arith.constant 0 : i32
    %c0_i32_1 = arith.constant 0 : i32
    return %c0_i32, %c0_i32_0 : i32, i32
  }
  func.func @transform_1(%arg0: i32, %arg1: i32) -> (i32, i32) {
    %c0_i32 = arith.constant 0 : i32
    %c0_i32_0 = arith.constant 0 : i32
    %c0_i32_1 = arith.constant 0 : i32
    return %c0_i32, %c0_i32_0 : i32, i32
  }
  func.func @transform_2(%arg0: i32, %arg1: i32) -> (i32, i32) {
    %c0_i32 = arith.constant 0 : i32
    %c0_i32_0 = arith.constant 0 : i32
    %c0_i32_1 = arith.constant 0 : i32
    return %c0_i32, %c0_i32_0 : i32, i32
  }
  func.func @transform_3(%arg0: i32, %arg1: i32) -> (i32, i32) {
    %c0_i32 = arith.constant 0 : i32
    %c0_i32_0 = arith.constant 0 : i32
    %c0_i32_1 = arith.constant 0 : i32
    return %c0_i32, %c0_i32_0 : i32, i32
  }
  func.func @transform_4(%arg0: i32, %arg1: i32) -> (i32, i32, i32) {
    %c0_i32 = arith.constant 0 : i32
    %c0_i32_0 = arith.constant 0 : i32
    %c0_i32_1 = arith.constant 0 : i32
    return %arg1, %c0_i32, %c0_i32_0 : i32, i32, i32
  }
  func.func @transform_5(%arg0: i32, %arg1: i32) -> (i32, i32, i32) {
    %c0_i32 = arith.constant 0 : i32
    %c0_i32_0 = arith.constant 0 : i32
    %c0_i32_1 = arith.constant 0 : i32
    return %arg1, %c0_i32, %c0_i32_0 : i32, i32, i32
  }
  func.func @transform_6(%arg0: i32, %arg1: i32) -> (i32, i32, i32) {
    %c0_i32 = arith.constant 0 : i32
    %c0_i32_0 = arith.constant 0 : i32
    %c0_i32_1 = arith.constant 0 : i32
    return %arg0, %c0_i32, %c0_i32_0 : i32, i32, i32
  }
  func.func @transform_7(%arg0: i32, %arg1: i32) -> (i32, i32, i32) {
    %c0_i32 = arith.constant 0 : i32
    %c0_i32_0 = arith.constant 0 : i32
    %c0_i32_1 = arith.constant 0 : i32
    return %arg0, %c0_i32, %c0_i32_0 : i32, i32, i32
  }
  func.func @transform_8(%arg0: i32, %arg1: i32) -> (i32, i32, i32) {
    %c0_i32 = arith.constant 0 : i32
    %c0_i32_0 = arith.constant 0 : i32
    %c0_i32_1 = arith.constant 0 : i32
    return %arg0, %c0_i32, %c0_i32_0 : i32, i32, i32
  }
  func.func @transform_9(%arg0: i32, %arg1: i32) -> (i32, i32, i32) {
    %c0_i32 = arith.constant 0 : i32
    %c0_i32_0 = arith.constant 0 : i32
    %c0_i32_1 = arith.constant 0 : i32
    return %arg0, %c0_i32, %c0_i32_0 : i32, i32, i32
  }
  func.func @transform_10(%arg0: i32, %arg1: i32) -> (i32, i32, i32) {
    %c0_i32 = arith.constant 0 : i32
    %c0_i32_0 = arith.constant 0 : i32
    %c0_i32_1 = arith.constant 0 : i32
    return %arg0, %c0_i32, %c0_i32_0 : i32, i32, i32
  }
  func.func @transform_11(%arg0: i32, %arg1: i32) -> (i32, i32, i32) {
    %c0_i32 = arith.constant 0 : i32
    %c0_i32_0 = arith.constant 0 : i32
    %c0_i32_1 = arith.constant 0 : i32
    return %arg0, %c0_i32, %c0_i32_0 : i32, i32, i32
  }
  func.func @transform_12(%arg0: i32, %arg1: i32) -> (i32, i32, i32) {
    %c0_i32 = arith.constant 0 : i32
    %c0_i32_0 = arith.constant 0 : i32
    %c0_i32_1 = arith.constant 0 : i32
    return %arg0, %c0_i32, %c0_i32_0 : i32, i32, i32
  }
}

</mosaic_0001>

<bundles_post_ra>
// kernel: parallel_network_forward.1
= control target key start
LH: loop header
LB: loop body
LE: loop exit
PB: predicated region body
PF: predicated region fallthrough
CT: control target
= control target key end

     0   :  { %s6436_s0 = inlined_call_operand.vmem [shape: f32[32,32], index: 0, kind: input, shape index: {}]   ;;  %s6437_s1 = inlined_call_operand.vmem [shape: f32[32,32], index: 1, kind: input, shape index: {}]   ;;  %s6438_s2 = inlined_call_operand.vmem [shape: f32[16,32], index: 2, kind: input, shape index: {}]   ;;  %s6439_s3 = inlined_call_operand.vmem [shape: f32[2,256], index: 3, kind: input, shape index: {}]   ;;  %s6440_s4 = inlined_call_operand.vmem [shape: f32[225,8,8], index: 4, kind: input, shape index: {}]   ;;  %s6441_s5 = inlined_call_operand.vmem [shape: f32[25,8,1], index: 5, kind: input, shape index: {}]   ;;  %s6442_s6 = inlined_call_operand.vmem [shape: f32[2,32,16], index: 6, kind: input, shape index: {}]   ;;  %s6443_s7 = inlined_call_operand.vmem [shape: f32[2,32,16], index: 7, kind: input, shape index: {}]   ;;  %s6444_s8 = inlined_call_operand.vmem [shape: f32[2,32,16], index: 8, kind: input, shape index: {}]   ;;  %s6445_s9 = inlined_call_operand.vmem [shape: f32[2,32,16], index: 9, kind: input, shape index: {}]   ;;  %s6446_s10 = inlined_call_operand.hbm [shape: f32[2,32,16], index: 10, kind: output, shape index: {0}]   ;;  %s6447_s11 = inlined_call_operand.hbm [shape: f32[2,32,16], index: 11, kind: output, shape index: {1}]   ;;  %s6448_s12 = inlined_call_operand.hbm [shape: f32[2,32,16], index: 12, kind: output, shape index: {2}]  }
   0x1   :  { %6461 = sst [smem:[#allocation22_spill]] %s6436_s0 }
   0x2   :  { %6462 = sst [smem:[#allocation23_spill]] %s6437_s1 }
   0x3   :  { %6463 = sst [smem:[#allocation24_spill]] %s6438_s2 }
   0x4   :  { %6464 = sst [smem:[#allocation25_spill]] %s6439_s3 }
   0x5   :  { %6465 = sst [smem:[#allocation26_spill]] %s6440_s4 }
   0x6   :  { %6466 = sst [smem:[#allocation27_spill]] %s6446_s10 }
   0x7   :  { %6467 = sst [smem:[#allocation28_spill]] %s6448_s12 }
   0x8   :  { %18 = vsyncpa [#allocation7], 0 }
   0x9   :  { %20 = vsyncpa [#allocation7 + $0x1], 0 }
   0xa   :  { %21 = vsyncpa [#allocation9], 0 }
   0xb   :  { %23 = vsyncpa [#allocation9 + $0x1], 0  ;;  %s5313_s21 = smov 0   ;;  %s5315_s22 = smov 0  }
   0xc   :  { %s5317_s23 = smov 0   ;;  %s5319_s24 = smov 0  }
   0xd   :  { %s5321_s25 = smov 0   ;;  %s5323_s26 = smov 0  }
   0xe   :  { %s5325_s27 = smov 0   ;;  %s5327_s28 = smov 0  }
   0xf LB: > { %6468 = sst [smem:[#allocation13_spill]] %s5199_s21  ;;  %s6450_s29 = sadd.s32 4294967295, %s5227_s28   ;;  %s5227_s28 = sphi %s5327_s28, %s29_s28   ;;  %s5223_s27 = sphi %s5325_s27, %s6498_s27   ;;  %s5219_s26 = sphi %s5323_s26, %s6497_s26   ;;  %s5215_s25 = sphi %s5321_s25, %s6496_s25   ;;  %s5211_s24 = sphi %s5319_s24, %s6501_s24   ;;  %s5207_s23 = sphi %s5317_s23, %s6494_s23   ;;  %s5203_s22 = sphi %s5315_s22, %s6500_s22   ;;  %s5199_s21 = sphi %s5313_s21, %s6499_s21  }
  0x10   : > { %6469 = sst [smem:[#allocation14_spill]] %s5207_s23  ;;  %s6449_s30 = sadd.s32 4294967294, %s5227_s28  }
  0x11   : > { %6470 = sst [smem:[#allocation15_spill]] %s5219_s26  ;;  %s38_s13 = sadd.s32 1, %s5219_s26 }
  0x12   : > { %6471 = sst [smem:[#allocation16_spill]] %s5223_s27  ;;  %p39_p0 = scmp.ge.s32.totalorder %s38_s13, 5 }
  0x13   : > { %s41_s14 = sadd.s32 1, %s5223_s27  ;;  %p298_p1 = scmp.ne.s32.totalorder %s5207_s23, %s5203_s22 }
  0x14   : > { %p299_p2 = scmp.eq.s32.totalorder %s6450_s29, 9  ;;  %s6503_s13 = smov (%p39_p0, %s38_s13), 0 }
  0x15   : > { %6472 = sst [smem:[#allocation17_spill]] %s6503_s13  ;;  %s6505_s14 = smov (!%p39_p0, %s41_s14), %s5223_s27 }
  0x16   : > { %p5364_p3 = por %p299_p2, %p298_p1  ;;  %p304_p4 = scmp.ne.s32.totalorder %s5203_s22, %s5199_s21 }
  0x17   : > { %p43_p5 = scmp.ge.s32.totalorder %s6505_s14, 2  ;;  %p305_p6 = scmp.eq.s32.totalorder %s6449_s30, 9 }
  0x18   : > { %p4565_p7 = scmp.ge.s32.totalorder %s5227_s28, 1  ;;  %p437_p8 = scmp.lt.s32.totalorder %s5227_s28, 11 }
  0x19   : > { %s6507_s14 = smov (%p43_p5, %s6505_s14), 0  ;;  %p5376_p9 = por %p305_p6, %p304_p4 }
  0x1a   : > { %6474 = sst [smem:[#allocation18_spill]] %s6507_s14  ;;  %p438_p10 = pnand %p4565_p7, %p437_p8 }
  0x1b   : > { %s6475_s16 = scalar_select %p5376_p9, 1, 0 }
  0x1c   : > { %s285_s17 = ssub.s32 %s5223_s27, %s6507_s14  ;;  %s288_s18 = sadd.s32 1, %s5207_s23 }
  0x1d   : > { %6476 = sst [smem:[#allocation19_spill]] %s6475_s16  ;;  %p286_p11 = scmp.eq.s32.totalorder %s285_s17, 0 }
  0x1e   : > { %441 = sbr.rel (%p438_p10) target bundleno = 3823 (0xeef), region = 60 }
  0x1f   : > { %s5384_s19 = scalar_select %p286_p11, %s5207_s23, %s288_s18  }
  0x21   : > { %6477 = sst [smem:[#allocation20_spill]] %s5384_s19 }
  0x23   : > { %s6456_s20 = sand.u32 1, %s5203_s22   ;;  %s514_s30 = smul.u32 45, %s5211_s24 }
  0x24   : > { %s6478_s0 = sld [smem:[#allocation22_spill]]  ;;  %s4566_s14 = sshll.u32 %s6456_s20, 5 }
  0x25   : > { %s520_s27 = smul.u32 5, %s5211_s24  ;;  %s6479_s1 = sld [smem:[#allocation23_spill]] }
  0x26   : > { %s6481_s2 = sld [smem:[#allocation24_spill]]  ;;  %p515_p12 = scmp.lt.s32.totalorder %s514_s30, 224 }
  0x27   : > { %p521_p13 = scmp.lt.s32.totalorder %s520_s27, 24  ;;  %p526_p0 = scmp.lt.s32.totalorder %s5215_s25, 1 }
  0x28   : > { %s6509_s30 = smov (!%p515_p12, %s514_s30), 224  ;;  %s6482_s4 = sld [smem:[#allocation26_spill]] }
  0x29   : > { %s6511_s27 = smov (!%p521_p13, %s520_s27), 24  ;;  %s4569_s16 = sshll.u32 %s6509_s30, 3 }
  0x2a   : > { %v5391_v0 = vld [vmem:[%s6478_s0] sm:$0xff]  ;;  %v5396_v1 = vld [vmem:[%s6478_s0 + $0x8] sm:$0xff]  ;;  %v5401_v2 = vld [vmem:[%s6478_s0 + $0x10] sm:$0xff]  ;;  %s4570_s23 = sshll.u32 %s6511_s27, 3  ;;  %s5473_s29 = scalar_lea.vmem [#allocation8], %s4566_s14 }
  0x2b   : > { %v5409_v3 = vld [vmem:[%s6478_s0 + $0x18] sm:$0xff]  ;;  %v5414_v4 = vld [vmem:[%s6479_s1] sm:$0xff]  ;;  %v5419_v5 = vld [vmem:[%s6479_s1 + $0x8] sm:$0xff]  ;;  %s5450_s0 = scalar_lea.vmem %s6441_s5, %s4570_s23  ;;  %p4579_p1 = scmp.ne.s32.totalorder %s5211_s24, 0 }
  0x2c   : > { %v5424_v6 = vld [vmem:[%s6479_s1 + $0x10] sm:$0xff]  ;;  %v5429_v7 = vld [vmem:[%s6479_s1 + $0x18] sm:$0xff]  ;;  %v5434_v8 = vld [vmem:[%s6481_s2] sm:$0xff]  ;;  %s527_s1 = scalar_select %p526_p0, %s5215_s25, 1 }
  0x2d   : > { %6480 = vst [vmem:[#allocation21_spill] sm:$0xff] %v5429_v7  ;;  %v5439_v9 = vld [vmem:[%s6481_s2 + $0x8] sm:$0xff]  ;;  %s5475_s2 = scalar_lea.vmem [#allocation10], %s4566_s14  ;;  %559 = sbr.rel (%p4579_p1) target bundleno = 988 (0x3dc), region = 64 }
  0x2e   : > { %s5445_s18 = scalar_lea.vmem %s6482_s4, %s4569_s16  ;;  %s4763_s13 = sshll.u32 %s527_s1, 5 }
  0x2f   : > { %s5456_s21 = scalar_lea.vmem %s6442_s6, %s4763_s13  ;;  %s5461_s10 = scalar_lea.vmem %s6443_s7, %s4763_s13 }
  0x30   : > { %s5466_s27 = scalar_lea.vmem %s6444_s8, %s4763_s13  ;;  %s545_s19 = scalar_lea.vmem %s6445_s9, %s4763_s13 }
  0x31   : > { %s5471_s1 = scalar_lea.vmem [#allocation6], %s4566_s14  ;;  %s5229_s12 = smov (!%p4579_p1), 16  }
  0x32   : > { %v596_v10 = vld [vmem:[%s545_s19 + $0x18] sm:$0xff]  ;;  %v595_v11 = vld [vmem:[%s545_s19 + $0x10] sm:$0xff]  ;;  %665 = vmatpush.msra.mxu1 %v5439_v9  ;;  %781 = vmatpush.msra.mxu3 %v5439_v9  ;;  %v594_v12 = vld [vmem:[%s545_s19 + $0x8] sm:$0xff]  ;;  %vm597_vm0 = vcmask 261120   ;;  %vm572_vm1 = vcmask 130048   ;;  %s5230_s14 = smov 112  }
  0x33   : > { %622 = vmatpush.msra.mxu0 %v596_v10  ;;  %v593_v13 = vld [vmem:[%s545_s19] sm:$0xff]  ;;  %v583_v26 = vld [vmem:[%s5466_s27 + $0x10] sm:$0xff]  ;;  %v584_v34 = vld [vmem:[%s5466_s27 + $0x18] sm:$0xff] }
  0x34   : > { %666 = vmatpush.msra.mxu1 %v5434_v8  ;;  %782 = vmatpush.msra.mxu3 %v5434_v8  ;;  %v562_v27 = vld [vmem:[%s5456_s21 + $0x10] sm:$0xff]  ;;  %v560_v31 = vld [vmem:[%s5456_s21] sm:$0xff]  ;;  %v563_v35 = vld [vmem:[%s5456_s21 + $0x18] sm:$0xff] }
  0x35   : > { %623 = vmatpush.msra.mxu0 %v595_v11  ;;  %v566_v28 = vld [vmem:[%s5461_s10 + $0x10] sm:$0xff]  ;;  %v587_v30 = vmul.f32 %v583_v26, %v562_v27  ;;  %v564_v32 = vld [vmem:[%s5461_s10] sm:$0xff]  ;;  %v567_v36 = vld [vmem:[%s5461_s10 + $0x18] sm:$0xff]  ;;  %v588_v38 = vmul.f32 %v584_v34, %v563_v35 }
  0x36   : > { %v570_v29 = vmul.f32 %v566_v28, %v562_v27  ;;  %v568_v33 = vmul.f32 %v564_v32, %v560_v31  ;;  %v571_v37 = vmul.f32 %v567_v36, %v563_v35  ;;  %v561_v39 = vld [vmem:[%s5456_s21 + $0x8] sm:$0xff]  ;;  %v581_v44 = vld [vmem:[%s5466_s27] sm:$0xff] }
  0x37   : > { %624 = vmatpush.msra.mxu0 %v594_v12  ;;  %591 = vst.msk [vmem:[%s5475_s2 + $0x10] sm:$0xff] %vm572_vm1, %v587_v30  ;;  %v565_v40 = vld [vmem:[%s5461_s10 + $0x8] sm:$0xff]  ;;  %v585_v45 = vmul.f32 %v581_v44, %v560_v31  ;;  %v5231_v12 = vmov 0.0  }
  0x38   : > { %575 = vst.msk [vmem:[#allocation5 + $0x10] sm:$0xff] %vm572_vm1, %v570_v29  ;;  %v569_v41 = vmul.f32 %v565_v40, %v561_v39  ;;  %v582_v42 = vld [vmem:[%s5466_s27 + $0x8] sm:$0xff] }
  0x39   : > { %625 = vmatpush.msra.mxu0 %v593_v13  ;;  %579 = vst.msk [vmem:[%s5473_s29 + $0x10] sm:$0xff] %vm572_vm1, %v570_v29  ;;  %v586_v43 = vmul.f32 %v582_v42, %v561_v39 }
  0x3a   : > { %4580 = vmatmul.msk.f32.vlgmr.msra.gmra.mxu0 %vm597_vm0, %v5391_v0  ;;  %573 = vst.msk [vmem:[#allocation5] sm:$0xff] %vm572_vm1, %v568_v33 }
  0x3b   : > { %577 = vst.msk [vmem:[%s5473_s29] sm:$0xff] %vm572_vm1, %v568_v33 }
  0x3c   : > { %576 = vst.msk [vmem:[#allocation5 + $0x18] sm:$0xff] %vm572_vm1, %v571_v37 }
  0x3d   : > { %580 = vst.msk [vmem:[%s5473_s29 + $0x18] sm:$0xff] %vm572_vm1, %v571_v37 }
  0x3e   : > { %592 = vst.msk [vmem:[%s5475_s2 + $0x18] sm:$0xff] %vm572_vm1, %v588_v38 }
  0x3f   : > { %574 = vst.msk [vmem:[#allocation5 + $0x8] sm:$0xff] %vm572_vm1, %v569_v41 }
  0x40   : > { %578 = vst.msk [vmem:[%s5473_s29 + $0x8] sm:$0xff] %vm572_vm1, %v569_v41 }
  0x41   : > { %590 = vst.msk [vmem:[%s5475_s2 + $0x8] sm:$0xff] %vm572_vm1, %v586_v43 }
  0x42   : > { %4581 = vmatmul.msk.f32.gmra.mxu0 %vm597_vm0, %v5396_v1  ;;  %589 = vst.msk [vmem:[%s5475_s2] sm:$0xff] %vm572_vm1, %v585_v45 }
  0x43   : > { %820 = vst [vmem:[#allocation2] sm:$0xff] %v5231_v12 }
  0x44   : > { %821 = vst [vmem:[#allocation2 + $0x8] sm:$0xff] %v5231_v12 }
  0x45   : > { %822 = vst [vmem:[#allocation2 + $0x10] sm:$0xff] %v5231_v12 }
  0x46   : > { %823 = vst [vmem:[#allocation2 + $0x18] sm:$0xff] %v5231_v12 }
  0x4a   : > { %4582 = vmatmul.msk.f32.gmra.mxu0 %vm597_vm0, %v5401_v2 }
  0x52   : > { %4583 = vmatmul.msk.f32.gmra.mxu0 %vm597_vm0, %v5409_v3 }
  0xb7   : > { %v627_v14 = vpop.f32.mrf.mxu0 }
  0xb8   : > { %4584 = vmatmul.msk.f32.vlgmr.msra.gmra.mxu1 %vm572_vm1, %v627_v14 }
  0xbf   : > { %v630_v15 = vpop.f32.mrf.mxu0 }
  0xc0   : > { %4585 = vmatmul.msk.f32.gmra.mxu1 %vm572_vm1, %v630_v15 }
  0xc7   : > { %v633_v16 = vpop.f32.mrf.mxu0 }
  0xc8   : > { %4586 = vmatmul.msk.f32.gmra.mxu1 %vm572_vm1, %v633_v16 }
  0xcf   : > { %v636_v17 = vpop.f32.mrf.mxu0 }
  0xd0   : > { %4587 = vmatmul.msk.f32.gmra.mxu1 %vm572_vm1, %v636_v17 }
 0x135   : > { %v668_v18 = vpop.f32.mrf.mxu1 }
 0x13d   : > { %v671_v19 = vpop.f32.mrf.mxu1 }
 0x145   : > { %v674_v20 = vpop.f32.mrf.mxu1 }
 0x14d   : > { %v677_v21 = vpop.f32.mrf.mxu1 }
 0x14e   : > { %692 = vrot.lane.b32.xlu0 %v677_v21, %s5229_s12 }
 0x156   : > { %690 = vrot.lane.b32.xlu0 %v674_v20, %s5229_s12 }
 0x1c0   : > { %v693_v22 = vpop.permute.xlu0 %692 }
 0x1c1   : > { %v697_v23 = vadd.f32 %v693_v22, %v671_v19 }
 0x1c3   : > { %702 = vrot.lane.b32.xlu1 %v697_v23, %s5230_s14 }
 0x1c8   : > { %v691_v24 = vpop.permute.xlu0 %690 }
 0x1c9   : > { %v696_v25 = vadd.f32 %v691_v24, %v668_v18 }
 0x1cb   : > { %684 = vrot.lane.b32.xlu1 %v677_v21, %s5230_s14  ;;  %700 = vrot.lane.b32.xlu2 %v696_v25, %s5230_s14 }
 0x1d3   : > { %682 = vrot.lane.b32.xlu2 %v674_v20, %s5230_s14 }
 0x225   : > { %v701_v46 = vpop.permute.xlu2 %700 }
 0x226   : > { %v708_v47 = vmul.f32 %v701_v46, %v570_v29 }
 0x228   : > { %712 = vst.msk [vmem:[#allocation4 + $0x10] sm:$0xff] %vm572_vm1, %v708_v47 }
 0x22d   : > { %v683_v48 = vpop.permute.xlu2 %682 }
 0x22e   : > { %v688_v49 = vsub.f32 %v668_v18, %v683_v48 }
 0x230   : > { %v706_v50 = vmul.f32 %v688_v49, %v568_v33 }
 0x232   : > { %710 = vst.msk [vmem:[#allocation4] sm:$0xff] %vm572_vm1, %v706_v50 }
 0x235   : > { %v703_v51 = vpop.permute.xlu1 %702 }
 0x236   : > { %v709_v52 = vmul.f32 %v703_v51, %v571_v37 }
 0x238   : > { %713 = vst.msk [vmem:[#allocation4 + $0x18] sm:$0xff] %vm572_vm1, %v709_v52  ;;  %738 = vmatpush.msra.mxu2 %v709_v52 }
 0x23a   : > { %739 = vmatpush.msra.mxu2 %v708_v47 }
 0x23d   : > { %v685_v53 = vpop.permute.xlu1 %684 }
 0x23e   : > { %v689_v54 = vsub.f32 %v671_v19, %v685_v53 }
 0x240   : > { %v707_v55 = vmul.f32 %v689_v54, %v569_v41 }
 0x242   : > { %711 = vst.msk [vmem:[#allocation4 + $0x8] sm:$0xff] %vm572_vm1, %v707_v55  ;;  %740 = vmatpush.msra.mxu2 %v707_v55 }
 0x244   : > { %741 = vmatpush.msra.mxu2 %v706_v50 }
 0x245   : > { %4588 = vmatmul.msk.f32.vlgmr.msra.gmra.mxu2 %vm597_vm0, %v5414_v4 }
 0x24d   : > { %4589 = vmatmul.msk.f32.gmra.mxu2 %vm597_vm0, %v5419_v5 }
 0x255   : > { %4590 = vmatmul.msk.f32.gmra.mxu2 %vm597_vm0, %v5424_v6 }
 0x25d   : > { %4591 = vmatmul.msk.f32.gmra.mxu2 %vm597_vm0, %v5429_v7 }
 0x2c8   : > { %v743_v56 = vpop.f32.mrf.mxu2 }
 0x2c9   : > { %4592 = vmatmul.msk.f32.vlgmr.msra.gmra.mxu3 %vm572_vm1, %v743_v56 }
 0x2d0   : > { %v746_v57 = vpop.f32.mrf.mxu2 }
 0x2d1   : > { %4593 = vmatmul.msk.f32.gmra.mxu3 %vm572_vm1, %v746_v57 }
 0x2d8   : > { %v749_v58 = vpop.f32.mrf.mxu2 }
 0x2d9   : > { %4594 = vmatmul.msk.f32.gmra.mxu3 %vm572_vm1, %v749_v58 }
 0x2e0   : > { %v752_v59 = vpop.f32.mrf.mxu2 }
 0x2e1   : > { %4595 = vmatmul.msk.f32.gmra.mxu3 %vm572_vm1, %v752_v59 }
 0x34c   : > { %v784_v60 = vpop.f32.mrf.mxu3 }
 0x34d   : > { %808 = vrot.lane.b32.xlu2 %v784_v60, %s5230_s14 }
 0x354   : > { %v787_v61 = vpop.f32.mrf.mxu3 }
 0x35c   : > { %v790_v62 = vpop.f32.mrf.mxu3 }
 0x35d   : > { %798 = vrot.lane.b32.xlu0 %v790_v62, %s5230_s14 }
 0x364   : > { %v793_v63 = vpop.f32.mrf.mxu3 }
 0x365   : > { %810 = vrot.lane.b32.xlu0 %v787_v61, %s5230_s14  ;;  %800 = vrot.lane.b32.xlu1 %v793_v63, %s5230_s14 }
 0x3a7   : > { %v809_v10 = vpop.permute.xlu2 %808 }
 0x3a8   : > { %v814_v11 = vsub.f32 %v790_v62, %v809_v10 }
 0x3aa   : > { %818 = vst.msk [vmem:[#allocation3 + $0x10] sm:$0xff] %vm572_vm1, %v814_v11 }
 0x3cf   : > { %v799_v13 = vpop.permute.xlu0 %798 }
 0x3d0   : > { %v804_v14 = vadd.f32 %v799_v13, %v784_v60 }
 0x3d2   : > { %816 = vst.msk [vmem:[#allocation3] sm:$0xff] %vm572_vm1, %v804_v14 }
 0x3d7   : > { %v811_v15 = vpop.permute.xlu0 %810  ;;  %v801_v16 = vpop.permute.xlu1 %800 }
 0x3d8   : > { %v815_v17 = vsub.f32 %v793_v63, %v811_v15  ;;  %v805_v18 = vadd.f32 %v801_v16, %v787_v61 }
 0x3da   : > { %819 = vst.msk [vmem:[#allocation3 + $0x18] sm:$0xff] %vm572_vm1, %v815_v17 }
 0x3db   : > { %817 = vst.msk [vmem:[#allocation3 + $0x8] sm:$0xff] %vm572_vm1, %v805_v18 }
 0x3dc PF: > { %v842_v19 = vld [vmem:[#allocation3 + $0x2] sm:$0x1]  ;;  %s5232_s10 = smov 32   ;;  %s5233_s21 = smov 16   ;;  %v829_v21 = vld [vmem:[#allocation3 + $0x1] sm:$0x1] }
 0x3dd   : > { %844 = vrot.lane.b32.xlu2 %v842_v19, %s5232_s10  ;;  %831 = vrot.lane.b32.xlu0 %v829_v21, %s5233_s21  ;;  %v849_v22 = vld [vmem:[#allocation3 + $0x12] sm:$0x1]  ;;  %v836_v24 = vld [vmem:[#allocation3 + $0x11] sm:$0x1]  ;;  %v855_v25 = vld [vmem:[#allocation3 + $0x3] sm:$0x1] }
 0x3de   : > { %s5234_s13 = smov 48   ;;  %v862_v30 = vld [vmem:[#allocation3 + $0x13] sm:$0x1]  ;;  %v875_v32 = vld [vmem:[#allocation3 + $0x14] sm:$0x1]  ;;  %s5235_s26 = smov 64  }
 0x3df   : > { %v868_v33 = vld [vmem:[#allocation3 + $0x4] sm:$0x1]  ;;  %v888_v34 = vld [vmem:[#allocation3 + $0x15] sm:$0x1]  ;;  %v881_v35 = vld [vmem:[#allocation3 + $0x5] sm:$0x1] }
 0x3e0   : > { %s5236_s30 = smov 80   ;;  %v894_v37 = vld [vmem:[#allocation3 + $0x6] sm:$0x1]  ;;  %s5237_s16 = smov 96   ;;  %v901_v42 = vld [vmem:[#allocation3 + $0x16] sm:$0x1] }
 0x3e1   : > { %v930_v23 = vld [vmem:[#allocation3 + $0x19] sm:$0x1]  ;;  %v942_v26 = vld [vmem:[#allocation3 + $0x1a] sm:$0x1]  ;;  %v954_v28 = vld [vmem:[#allocation3 + $0x1b] sm:$0x1] }
 0x3e2   : > { %v924_v20 = vld [vmem:[#allocation3 + $0x9] sm:$0x1]  ;;  %v936_v27 = vld [vmem:[#allocation3 + $0xa] sm:$0x1]  ;;  %v948_v29 = vld [vmem:[#allocation3 + $0xb] sm:$0x1] }
 0x3e3   : > { %926 = vrot.lane.b32.xlu1 %v924_v20, %s5233_s21  ;;  %v960_v31 = vld [vmem:[#allocation3 + $0xc] sm:$0x1]  ;;  %v966_v36 = vld [vmem:[#allocation3 + $0x1c] sm:$0x1]  ;;  %v978_v38 = vld [vmem:[#allocation3 + $0x1d] sm:$0x1] }
 0x3e4   : > { %v972_v39 = vld [vmem:[#allocation3 + $0xd] sm:$0x1]  ;;  %v990_v40 = vld [vmem:[#allocation3 + $0x1e] sm:$0x1]  ;;  %v984_v41 = vld [vmem:[#allocation3 + $0xe] sm:$0x1] }
 0x3e5   : > { %851 = vrot.lane.b32.xlu2 %v849_v22, %s5232_s10  ;;  %838 = vrot.lane.b32.xlu0 %v836_v24, %s5233_s21  ;;  %v996_v43 = vld [vmem:[#allocation3 + $0xf] sm:$0x1]  ;;  %v914_v44 = vld [vmem:[#allocation3 + $0x17] sm:$0x1]  ;;  %v907_v45 = vld [vmem:[#allocation3 + $0x7] sm:$0x1] }
 0x3e6   : > { %s5238_s17 = smov 112   ;;  %s6483_s3 = sld [smem:[#allocation25_spill]]  ;;  %v1002_v49 = vld [vmem:[#allocation3 + $0x1f] sm:$0x1]  ;;  %v920_v53 = vld [vmem:[#allocation3 + $0x8] sm:$0x1] }
 0x3e7   : > { %s5239_s23 = smov 111   ;;  %s5240_s14 = smov 127   ;;  %vm825_vm2 = vcmask 122880   ;;  %v824_v54 = vld [vmem:[#allocation3] sm:$0x1]  ;;  %vm834_vm3 = vcmask 254080  }
 0x3e8   : > { %s5241_s27 = smov 113   ;;  %921 = vst.msk [vmem:[#allocation2 + $0x10] sm:$0x1] %vm825_vm2, %v920_v53  ;;  %s5242_s20 = smov 1   ;;  %v922_v55 = vld [vmem:[#allocation3 + $0x18] sm:$0x1] }
 0x3e9   : > { %826 = vst.msk [vmem:[#allocation2 + $0x8] sm:$0x1] %vm825_vm2, %v824_v54  ;;  %v827_v56 = vld [vmem:[#allocation3 + $0x10] sm:$0x1]  ;;  %s5243_s19 = smov 17   ;;  %s5244_s12 = smov 15  }
 0x3ea   : > { %923 = vst.msk [vmem:[#allocation2 + $0x11] sm:$0x1] %vm825_vm2, %v922_v55  ;;  %vm847_vm4 = vcmask 385280   ;;  %vm860_vm5 = vcmask 516480   ;;  %vm873_vm6 = vcmask 647680   ;;  %vm886_vm7 = vcmask 778880  }
 0x3eb   : > { %932 = vrot.lane.b32.xlu1 %v930_v23, %s5233_s21  ;;  %828 = vst.msk [vmem:[#allocation2 + $0x9] sm:$0x1] %vm825_vm2, %v827_v56  ;;  %vm899_vm8 = vcmask 910080   ;;  %vm912_vm9 = vcmask 1041280   ;;  %vm1021_vm10 = vcmask 908288   ;;  %vm1154_vm11 = vcmask 924672  }
 0x3ec   : > { %v1008_v46 = vld [vmem:[%s6483_s3] ss:$2 sm:$0x3]  ;;  %v4596_v50 = vld [vmem:[%s6483_s3 + $0x1] ss:$2 sm:$0x3] }
 0x3ed   : > { %857 = vrot.lane.b32.xlu2 %v855_v25, %s5234_s13  ;;  %938 = vrot.lane.b32.xlu0 %v936_v27, %s5232_s10  ;;  %v1016_v47 = vperm.slane %v1008_v46, 1  ;;  %v1015_v48 = vperm.slane %v1008_v46, 0  ;;  %v1149_v51 = vperm.slane %v4596_v50, 1  ;;  %v1148_v52 = vperm.slane %v4596_v50, 0  ;;  %p4751_p2 = scmp.ne.s32.totalorder %s5211_s24, 4 }
 0x3ee   : > { %vm1246_vm12 = vcmask 7168   ;;  %vm1227_vm13 = vcmask 1039360   ;;  %vm1173_vm14 = vcmask 121856   ;;  %vm1099_vm15 = vcmask 138240  }
 0x3ef   : > { %vm1041_vm0 = vcmask 130048   ;;  %vm1046_vm1 = vcmask 64512  }
 0x3f3   : > { %944 = vrot.lane.b32.xlu1 %v942_v26, %s5232_s10 }
 0x3f5   : > { %956 = vrot.lane.b32.xlu2 %v954_v28, %s5234_s13  ;;  %864 = vrot.lane.b32.xlu0 %v862_v30, %s5234_s13 }
 0x3fb   : > { %950 = vrot.lane.b32.xlu1 %v948_v29, %s5234_s13 }
 0x3fd   : > { %962 = vrot.lane.b32.xlu2 %v960_v31, %s5235_s26  ;;  %870 = vrot.lane.b32.xlu0 %v868_v33, %s5235_s26  ;;  %v5621_v31 = vld [vmem:[#allocation2] sm:$0xff] }
 0x403   : > { %877 = vrot.lane.b32.xlu1 %v875_v32, %s5235_s26 }
 0x405   : > { %890 = vrot.lane.b32.xlu2 %v888_v34, %s5236_s30  ;;  %968 = vrot.lane.b32.xlu0 %v966_v36, %s5235_s26 }
 0x40b   : > { %883 = vrot.lane.b32.xlu1 %v881_v35, %s5236_s30 }
 0x40d   : > { %896 = vrot.lane.b32.xlu2 %v894_v37, %s5237_s16  ;;  %974 = vrot.lane.b32.xlu0 %v972_v39, %s5236_s30 }
 0x413   : > { %980 = vrot.lane.b32.xlu1 %v978_v38, %s5236_s30 }
 0x415   : > { %992 = vrot.lane.b32.xlu2 %v990_v40, %s5237_s16  ;;  %903 = vrot.lane.b32.xlu0 %v901_v42, %s5237_s16 }
 0x41b   : > { %986 = vrot.lane.b32.xlu1 %v984_v41, %s5237_s16 }
 0x41d   : > { %998 = vrot.lane.b32.xlu2 %v996_v43, %s5238_s17  ;;  %909 = vrot.lane.b32.xlu0 %v907_v45, %s5238_s17 }
 0x423   : > { %916 = vrot.lane.b32.xlu1 %v914_v44, %s5238_s17 }
 0x425   : > { %1019 = vrot.lane.b32.xlu2 %v1016_v47, %s5239_s23  ;;  %1004 = vrot.lane.b32.xlu0 %v1002_v49, %s5238_s17 }
 0x42b   : > { %1017 = vrot.lane.b32.xlu1 %v1015_v48, %s5239_s23 }
 0x42d   : > { %1223 = vrot.lane.b32.xlu2 %v1015_v48, %s5240_s14  ;;  %1150 = vrot.lane.b32.xlu0 %v1148_v52, %s5241_s27 }
 0x433   : > { %1152 = vrot.lane.b32.xlu1 %v1149_v51, %s5241_s27 }
 0x435   : > { %1348 = vrot.lane.b32.xlu2 %v1149_v51, %s5242_s20  ;;  %1225 = vrot.lane.b32.xlu0 %v1016_v47, %s5240_s14 }
 0x437   : > { %v845_v57 = vpop.permute.xlu2 %844 }
 0x43b   : > { %1346 = vrot.lane.b32.xlu1 %v1148_v52, %s5242_s20 }
 0x43d   : > { %1549 = vrot.lane.b32.xlu2 %v1148_v52, %s5243_s19  ;;  %1417 = vrot.lane.b32.xlu0 %v1015_v48, %s5244_s12 }
 0x43f   : > { %v852_v58 = vpop.permute.xlu2 %851 }
 0x443   : > { %1419 = vrot.lane.b32.xlu1 %v1016_v47, %s5244_s12 }
 0x445   : > { %1551 = vrot.lane.b32.xlu0 %v1149_v51, %s5243_s19 }
 0x447   : > { %v858_v59 = vpop.permute.xlu2 %857 }
 0x44f   : > { %v832_v61 = vpop.permute.xlu0 %831  ;;  %v957_v62 = vpop.permute.xlu2 %956 }
 0x450   : > { %835 = vst.msk [vmem:[#allocation2 + $0x8] sm:$0x1] %vm834_vm3, %v832_v61 }
 0x451   : > { %848 = vst.msk [vmem:[#allocation2 + $0x8] sm:$0x1] %vm847_vm4, %v845_v57 }
 0x452   : > { %861 = vst.msk [vmem:[#allocation2 + $0x8] sm:$0x1] %vm860_vm5, %v858_v59 }
 0x455   : > { %v927_v60 = vpop.permute.xlu1 %926 }
 0x456   : > { %929 = vst.msk [vmem:[#allocation2 + $0x10] sm:$0x1] %vm834_vm3, %v927_v60 }
 0x457   : > { %v839_v10 = vpop.permute.xlu0 %838  ;;  %v963_v12 = vpop.permute.xlu2 %962 }
 0x458   : > { %841 = vst.msk [vmem:[#allocation2 + $0x9] sm:$0x1] %vm834_vm3, %v839_v10  ;;  %v5708_v10 = vld [vmem:[#allocation2 + $0x18] sm:$0xff] }
 0x459   : > { %854 = vst.msk [vmem:[#allocation2 + $0x9] sm:$0x1] %vm847_vm4, %v852_v58 }
 0x45d   : > { %v933_v63 = vpop.permute.xlu1 %932 }
 0x45e   : > { %935 = vst.msk [vmem:[#allocation2 + $0x11] sm:$0x1] %vm834_vm3, %v933_v63  ;;  %vm1499_vm3 = vcmask 916480  }
 0x45f   : > { %v939_v13 = vpop.permute.xlu0 %938  ;;  %v891_v16 = vpop.permute.xlu2 %890 }
 0x460   : > { %941 = vst.msk [vmem:[#allocation2 + $0x10] sm:$0x1] %vm847_vm4, %v939_v13 }
 0x465   : > { %v945_v11 = vpop.permute.xlu1 %944 }
 0x466   : > { %947 = vst.msk [vmem:[#allocation2 + $0x11] sm:$0x1] %vm847_vm4, %v945_v11  ;;  %vm4058_vm4 = vcmask 261120  }
 0x467   : > { %959 = vst.msk [vmem:[#allocation2 + $0x11] sm:$0x1] %vm860_vm5, %v957_v62  ;;  %v865_v15 = vpop.permute.xlu0 %864  ;;  %v897_v19 = vpop.permute.xlu2 %896 }
 0x468   : > { %867 = vst.msk [vmem:[#allocation2 + $0x9] sm:$0x1] %vm860_vm5, %v865_v15 }
 0x46d   : > { %v951_v14 = vpop.permute.xlu1 %950 }
 0x46e   : > { %953 = vst.msk [vmem:[#allocation2 + $0x10] sm:$0x1] %vm860_vm5, %v951_v14 }
 0x46f   : > { %965 = vst.msk [vmem:[#allocation2 + $0x10] sm:$0x1] %vm873_vm6, %v963_v12  ;;  %v871_v18 = vpop.permute.xlu0 %870  ;;  %v993_v22 = vpop.permute.xlu2 %992 }
 0x470   : > { %874 = vst.msk [vmem:[#allocation2 + $0x8] sm:$0x1] %vm873_vm6, %v871_v18 }
 0x475   : > { %v878_v17 = vpop.permute.xlu1 %877 }
 0x476   : > { %880 = vst.msk [vmem:[#allocation2 + $0x9] sm:$0x1] %vm873_vm6, %v878_v17 }
 0x477   : > { %893 = vst.msk [vmem:[#allocation2 + $0x9] sm:$0x1] %vm886_vm7, %v891_v16  ;;  %v969_v21 = vpop.permute.xlu0 %968  ;;  %v999_v26 = vpop.permute.xlu2 %998 }
 0x478   : > { %971 = vst.msk [vmem:[#allocation2 + $0x11] sm:$0x1] %vm873_vm6, %v969_v21 }
 0x47d   : > { %v884_v20 = vpop.permute.xlu1 %883 }
 0x47e   : > { %887 = vst.msk [vmem:[#allocation2 + $0x8] sm:$0x1] %vm886_vm7, %v884_v20 }
 0x47f   : > { %900 = vst.msk [vmem:[#allocation2 + $0x8] sm:$0x1] %vm899_vm8, %v897_v19  ;;  %v975_v24 = vpop.permute.xlu0 %974  ;;  %v5619_v30 = vpop.permute.xlu2 %1019 }
 0x480   : > { %977 = vst.msk [vmem:[#allocation2 + $0x10] sm:$0x1] %vm886_vm7, %v975_v24 }
 0x485   : > { %v981_v23 = vpop.permute.xlu1 %980 }
 0x486   : > { %983 = vst.msk [vmem:[#allocation2 + $0x11] sm:$0x1] %vm886_vm7, %v981_v23 }
 0x487   : > { %995 = vst.msk [vmem:[#allocation2 + $0x11] sm:$0x1] %vm899_vm8, %v993_v22  ;;  %v904_v27 = vpop.permute.xlu0 %903  ;;  %v5643_v40 = vpop.permute.xlu2 %1223 }
 0x488   : > { %906 = vst.msk [vmem:[#allocation2 + $0x9] sm:$0x1] %vm899_vm8, %v904_v27  ;;  %v5685_v54 = vmul.f32 %v5643_v40, %v5621_v31 }
 0x48d   : > { %v987_v25 = vpop.permute.xlu1 %986 }
 0x48e   : > { %989 = vst.msk [vmem:[#allocation2 + $0x10] sm:$0x1] %vm899_vm8, %v987_v25 }
 0x48f   : > { %1001 = vst.msk [vmem:[#allocation2 + $0x10] sm:$0x1] %vm912_vm9, %v999_v26  ;;  %v910_v29 = vpop.permute.xlu0 %909  ;;  %v5671_v49 = vpop.permute.xlu2 %1348 }
 0x490   : > { %913 = vst.msk [vmem:[#allocation2 + $0x8] sm:$0x1] %vm912_vm9, %v910_v29  ;;  %v5726_v15 = vmul.f32 %v5671_v49, %v5708_v10 }
 0x495   : > { %v917_v28 = vpop.permute.xlu1 %916 }
 0x496   : > { %919 = vst.msk [vmem:[#allocation2 + $0x9] sm:$0x1] %vm912_vm9, %v917_v28 }
 0x497   : > { %v1005_v34 = vpop.permute.xlu0 %1004  ;;  %v5732_v16 = vpop.permute.xlu2 %1549 }
 0x498   : > { %1007 = vst.msk [vmem:[#allocation2 + $0x11] sm:$0x1] %vm912_vm9, %v1005_v34 }
 0x49d   : > { %v5623_v32 = vpop.permute.xlu1 %1017  ;;  %v5630_v35 = vld [vmem:[#allocation2 + $0x8] sm:$0xff] }
 0x49e   : > { %v5628_v33 = vsel %vm1021_vm10, %v5623_v32, %v5619_v30  ;;  %v5634_v36 = vmul.f32 %v5623_v32, %v5621_v31  ;;  %v4870_v37 = vpack.i.bf16 %v5630_v35, %v5621_v31  ;;  %v1557_v20 = vmul.f32 %v5732_v16, %v5630_v35 }
 0x49f   : > { %v1027_v38 = vmul.f32 %v5628_v33, %v5630_v35  ;;  %v5648_v42 = vpop.permute.xlu0 %1150  ;;  %v5650_v43 = vld [vmem:[#allocation2 + $0x10] sm:$0xff] }
 0x4a0   : > { %4871 = vrot.lane.b32.xlu1 %v4870_v37, %s5233_s21  ;;  %1039 = vrot.lane.b32.xlu2 %v5650_v43, %s5233_s21  ;;  %v1028_v45 = vmul.f32 %v5619_v30, %v5650_v43  ;;  %v5666_v47 = vmul.f32 %v5648_v42, %v5621_v31  ;;  %v4895_v22 = vpack.i.bf16 %v5650_v43, %v5630_v35 }
 0x4a1   : > { %v4875_v39 = vpack.i.bf16 %v1027_v38, %v5634_v36 }
 0x4a3   : > { %4876 = vrot.lane.b32.xlu0 %v4875_v39, %s5243_s19 }
 0x4a5   : > { %v5646_v41 = vpop.permute.xlu1 %1152 }
 0x4a6   : > { %v5655_v44 = vsel %vm1154_vm11, %v5648_v42, %v5646_v41  ;;  %v1161_v46 = vmul.f32 %v5646_v41, %v5650_v43 }
 0x4a7   : > { %v1160_v48 = vmul.f32 %v5655_v44, %v5630_v35  ;;  %v5681_v53 = vpop.permute.xlu0 %1225 }
 0x4a8   : > { %1097 = vrot.lane.b32.xlu1 %v1028_v45, %s5243_s19  ;;  %v5692_v56 = vsel %vm1227_vm13, %v5643_v40, %v5681_v53  ;;  %v1234_v62 = vmul.f32 %v5681_v53, %v5650_v43  ;;  %v4597_v45 = vld [vmem:[%s5445_s18 + $0x8] sm:$0xff] }
 0x4a9   : > { %v4880_v51 = vpack.i.bf16 %v1160_v48, %v5666_v47  ;;  %v1233_v58 = vmul.f32 %v5692_v56, %v5630_v35 }
 0x4ab   : > { %1171 = vrot.lane.b32.xlu0 %v1161_v46, %s5244_s12  ;;  %4881 = vrot.lane.b32.xlu2 %v4880_v51, %s5244_s12  ;;  %v4885_v60 = vpack.i.bf16 %v1233_v58, %v5685_v54 }
 0x4ad   : > { %v5673_v50 = vpop.permute.xlu1 %1346 }
 0x4ae   : > { %v5679_v52 = vsel %vm1246_vm12, %v5673_v50, %v5671_v49  ;;  %v1354_v55 = vmul.f32 %v5673_v50, %v5630_v35 }
 0x4af   : > { %v1355_v57 = vmul.f32 %v5679_v52, %v5650_v43  ;;  %v5706_v63 = vpop.permute.xlu0 %1417 }
 0x4b0   : > { %4886 = vrot.lane.b32.xlu1 %v4885_v60, %s5242_s20  ;;  %v1425_v13 = vmul.f32 %v5706_v63, %v5630_v35 }
 0x4b1   : > { %v4890_v59 = vpack.i.bf16 %v1355_v57, %v1354_v55  ;;  %v1029_v57 = vld [vmem:[%s5445_s18] sm:$0xff] }
 0x4b3   : > { %4891 = vrot.lane.b32.xlu0 %v4890_v59, %s5240_s14  ;;  %1244 = vrot.lane.b32.xlu2 %v1234_v62, %s5242_s20 }
 0x4b5   : > { %v5702_v61 = vpop.permute.xlu1 %1419 }
 0x4b6   : > { %v5713_v11 = vsel %vm1173_vm14, %v5706_v63, %v5702_v61  ;;  %v5718_v12 = vmul.f32 %v5702_v61, %v5708_v10 }
 0x4b7   : > { %v1426_v14 = vmul.f32 %v5713_v11, %v5650_v43  ;;  %v5734_v18 = vpop.permute.xlu0 %1551 }
 0x4b8   : > { %1366 = vrot.lane.b32.xlu1 %v5726_v15, %s5240_s14  ;;  %v5739_v19 = vsel %vm1099_vm15, %v5732_v16, %v5734_v18  ;;  %v5754_v24 = vmul.f32 %v5734_v18, %v5708_v10 }
 0x4b9   : > { %v4900_v17 = vpack.i.bf16 %v1426_v14, %v1425_v13  ;;  %v1558_v21 = vmul.f32 %v5739_v19, %v5650_v43 }
 0x4bb   : > { %1437 = vrot.lane.b32.xlu0 %v5718_v12, %s5241_s27  ;;  %4901 = vrot.lane.b32.xlu2 %v4900_v17, %s5241_s27  ;;  %v4905_v23 = vpack.i.bf16 %v1558_v21, %v1557_v20  ;;  %v4602_v21 = vld [vmem:[%s5445_s18 + $0x10] sm:$0xff] }
 0x4c0   : > { %4896 = vrot.lane.b32.xlu1 %v4895_v22, %s5238_s17 }
 0x4c3   : > { %4906 = vrot.lane.b32.xlu0 %v4905_v23, %s5239_s23  ;;  %1497 = vrot.lane.b32.xlu2 %v5708_v10, %s5238_s17  ;;  %v1620_v23 = vld [vmem:[%s5450_s0] sm:$0xff] }
 0x4c8   : > { %1569 = vrot.lane.b32.xlu1 %v5754_v24, %s5239_s23 }
 0x4fa   : > { %v1040_v25 = vpop.permute.xlu2 %1039 }
 0x505   : > { %v4882_v26 = vpop.permute.xlu2 %4881 }
 0x506   : > { %v4884_v29 = vunpack.i.h.bf16 %v4882_v26  ;;  %v4883_v34 = vunpack.i.l.bf16 %v4882_v26 }
 0x508   : > { %v1174_v58 = vsel %vm1173_vm14, %v4883_v34, %v4884_v29 }
 0x50d   : > { %v1245_v27 = vpop.permute.xlu2 %1244 }
 0x512   : > { %v4872_v28 = vpop.permute.xlu1 %4871 }
 0x513   : > { %v4874_v37 = vunpack.i.h.bf16 %v4872_v28  ;;  %v4873_v38 = vunpack.i.l.bf16 %v4872_v28  ;;  %v4608_v28 = vld [vmem:[%s5445_s18 + $0x20] sm:$0xff] }
 0x515   : > { %v4877_v39 = vpop.permute.xlu0 %4876  ;;  %v1042_v51 = vsel %vm1041_vm0, %v4873_v38, %v4874_v37  ;;  %v1043_v55 = vsel %vm1041_vm0, %v4874_v37, %v1040_v25  ;;  %v4902_v60 = vpop.permute.xlu2 %4901  ;;  %v5245_v25 = vmov 0  }
 0x516   : > { %v4879_v46 = vunpack.i.h.bf16 %v4877_v39  ;;  %v4878_v48 = vunpack.i.l.bf16 %v4877_v39  ;;  %1065 = vmatpush.msra.mxu0 %v1042_v51  ;;  %1085 = vmatpush.msra.mxu1 %v1043_v55  ;;  %v4904_v13 = vunpack.i.h.bf16 %v4902_v60  ;;  %v4903_v14 = vunpack.i.l.bf16 %v4902_v60  ;;  %v4614_v55 = vld [vmem:[%s5445_s18 + $0x30] sm:$0xff] }
 0x517   : > { %4598 = vmatmul.msk.f32.vlgmr.msra.gmra.mxu0 %vm1046_vm1, %v4597_v45  ;;  %4599 = vmatmul.msk.f32.vlgmr.msra.gmra.mxu1 %vm1046_vm1, %v4597_v45  ;;  %v4605_v45 = vld [vmem:[%s5445_s18 + $0x18] sm:$0xff] }
 0x518   : > { %v1100_v59 = vsel %vm1099_vm15, %v4878_v48, %v4879_v46  ;;  %1196 = vmatpush.msrb.mxu0 %v1174_v58  ;;  %4910 = vset.pattern.permute.xlu2 %v5245_v25 }
 0x519   : > { %1122 = vmatpush.msra.mxu2 %v1100_v59  ;;  %4951 = vset.pattern.permute.xlu1 %v5245_v25 }
 0x51a   : > { %1316 = vmatpush.msra.mxu0 %v5630_v35  ;;  %4600 = vmatmul.msk.f32.vlgmr.msra.gmra.mxu2 %vm1046_vm1, %v1029_v57  ;;  %v1098_v62 = vpop.permute.xlu1 %1097  ;;  %v1439_v35 = vsel %vm1154_vm11, %v4903_v14, %v4904_v13 }
 0x51b   : > { %v1101_v17 = vsel %vm1099_vm15, %v4879_v46, %v1098_v62  ;;  %1623 = vperm.xlu2 %4910, %v1620_v23   ;;  %4992 = vset.pattern.permute.xlu0 %v5245_v25 }
 0x51c   : > { %1142 = vmatpush.msra.mxu3 %v1101_v17 }
 0x51d   : > { %v1172_v20 = vpop.permute.xlu0 %1171  ;;  %4601 = vmatmul.msk.f32.vlgmr.msra.gmra.mxu3 %vm1046_vm1, %v1029_v57  ;;  %v1498_v60 = vpop.permute.xlu2 %1497 }
 0x51e   : > { %v1175_v22 = vsel %vm1173_vm14, %v4884_v29, %v1172_v20 }
 0x51f   : > { %1216 = vmatpush.msrb.mxu1 %v1175_v22  ;;  %4603 = vmatmul.msk.f32.vlgmr.msrb.gmra.mxu0 %vm1046_vm1, %v4602_v21  ;;  %v4617_v22 = vld [vmem:[%s5445_s18 + $0x38] sm:$0xff] }
 0x520   : > { %1461 = vmatpush.msrb.mxu0 %v1439_v35  ;;  %4604 = vmatmul.msk.f32.vlgmr.msrb.gmra.mxu1 %vm1046_vm1, %v4602_v21 }
 0x521   : > { %1336 = vmatpush.msra.mxu1 %v5650_v43 }
 0x522   : > { %v4887_v29 = vpop.permute.xlu1 %4886 }
 0x523   : > { %v4889_v38 = vunpack.i.h.bf16 %v4887_v29  ;;  %v4888_v39 = vunpack.i.l.bf16 %v4887_v29 }
 0x525   : > { %v4892_v26 = vpop.permute.xlu0 %4891  ;;  %v1247_v43 = vsel %vm1246_vm12, %v4888_v39, %v4889_v38  ;;  %v1248_v46 = vsel %vm1246_vm12, %v4889_v38, %v1245_v27  ;;  %v4611_v27 = vld [vmem:[%s5445_s18 + $0x28] sm:$0xff] }
 0x526   : > { %v4894_v34 = vunpack.i.h.bf16 %v4892_v26  ;;  %v4893_v37 = vunpack.i.l.bf16 %v4892_v26  ;;  %1269 = vmatpush.msrb.mxu2 %v1247_v43  ;;  %1289 = vmatpush.msrb.mxu3 %v1248_v46  ;;  %v4620_v26 = vld [vmem:[%s5445_s18 + $0x40] sm:$0xff] }
 0x527   : > { %4609 = vmatmul.msk.f32.vlgmr.msra.gmra.mxu0 %vm1046_vm1, %v4608_v28  ;;  %4606 = vmatmul.msk.f32.vlgmr.msrb.gmra.mxu2 %vm1046_vm1, %v4605_v45 }
 0x528   : > { %v1368_v48 = vsel %vm1227_vm13, %v4893_v37, %v4894_v34  ;;  %4610 = vmatmul.msk.f32.vlgmr.msra.gmra.mxu1 %vm1046_vm1, %v4608_v28  ;;  %4607 = vmatmul.msk.f32.vlgmr.msrb.gmra.mxu3 %vm1046_vm1, %v4605_v45 }
 0x529   : > { %1390 = vmatpush.msra.mxu2 %v1368_v48 }
 0x52a   : > { %v1367_v57 = vpop.permute.xlu1 %1366 }
 0x52b   : > { %v1369_v59 = vsel %vm1227_vm13, %v4894_v34, %v1367_v57 }
 0x52c   : > { %1410 = vmatpush.msra.mxu3 %v1369_v59 }
 0x52d   : > { %v1438_v51 = vpop.permute.xlu0 %1437 }
 0x52e   : > { %v1440_v58 = vsel %vm1154_vm11, %v4904_v13, %v1438_v51 }
 0x52f   : > { %1481 = vmatpush.msrb.mxu1 %v1440_v58  ;;  %4615 = vmatmul.msk.f32.vlgmr.msrb.gmra.mxu0 %vm1046_vm1, %v4614_v55 }
 0x530   : > { %4616 = vmatmul.msk.f32.vlgmr.msrb.gmra.mxu1 %vm1046_vm1, %v4614_v55  ;;  %4612 = vmatmul.msk.f32.vlgmr.msra.gmra.mxu2 %vm1046_vm1, %v4611_v27 }
 0x531   : > { %4613 = vmatmul.msk.f32.vlgmr.msra.gmra.mxu3 %vm1046_vm1, %v4611_v27 }
 0x532   : > { %v4897_v62 = vpop.permute.xlu1 %4896 }
 0x533   : > { %v4899_v13 = vunpack.i.h.bf16 %v4897_v62  ;;  %v4898_v17 = vunpack.i.l.bf16 %v4897_v62 }
 0x535   : > { %v4907_v14 = vpop.permute.xlu0 %4906  ;;  %v1501_v35 = vsel %vm1499_vm3, %v4899_v13, %v1498_v60  ;;  %v1500_v23 = vsel %vm1499_vm3, %v4898_v17, %v4899_v13 }
 0x536   : > { %v4909_v20 = vunpack.i.h.bf16 %v4907_v14  ;;  %v4908_v21 = vunpack.i.l.bf16 %v4907_v14  ;;  %1522 = vmatpush.msrb.mxu2 %v1500_v23  ;;  %1542 = vmatpush.msrb.mxu3 %v1501_v35 }
 0x538   : > { %v1571_v25 = vsel %vm1021_vm10, %v4908_v21, %v4909_v20  ;;  %4618 = vmatmul.msk.f32.vlgmr.msrb.gmra.mxu2 %vm1046_vm1, %v4617_v22 }
 0x539   : > { %1593 = vmatpush.msra.mxu0 %v1571_v25  ;;  %4619 = vmatmul.msk.f32.vlgmr.msrb.gmra.mxu3 %vm1046_vm1, %v4617_v22 }
 0x53a   : > { %4621 = vmatmul.msk.f32.vlgmr.msra.gmra.mxu0 %vm1046_vm1, %v4620_v26  ;;  %v1570_v28 = vpop.permute.xlu1 %1569 }
 0x53b   : > { %v1572_v29 = vsel %vm1021_vm10, %v4909_v20, %v1570_v28 }
 0x53c   : > { %1613 = vmatpush.msra.mxu1 %v1572_v29 }
 0x53d   : > { %4622 = vmatmul.msk.f32.vlgmr.msra.gmra.mxu1 %vm1046_vm1, %v4620_v26 }
 0x594   : > { %v1087_v34 = vpop.f32.mrf.mxu1  ;;  %v1067_v37 = vpop.f32.mrf.mxu0 }
 0x59c   : > { %v1198_v39 = vpop.f32.mrf.mxu0 }
 0x59d   : > { %v1218_v38 = vpop.f32.mrf.mxu1  ;;  %v1124_v43 = vpop.f32.mrf.mxu2 }
 0x59e   : > { %v1125_v51 = vadd.f32 %v1124_v43, %v1067_v37 }
 0x5a0   : > { %v1144_v45 = vpop.f32.mrf.mxu3  ;;  %v1221_v59 = vadd.f32 %v1198_v39, %v1125_v51  ;;  %v1624_v39 = vpop.permute.xlu2 %1623 }
 0x5a1   : > { %v1145_v55 = vadd.f32 %v1144_v45, %v1087_v34 }
 0x5a3   : > { %v1222_v27 = vadd.f32 %v1218_v38, %v1145_v55 }
 0x5a4   : > { %v1318_v46 = vpop.f32.mrf.mxu0 }
 0x5a5   : > { %v1338_v48 = vpop.f32.mrf.mxu1 }
 0x5aa   : > { %v1271_v57 = vpop.f32.mrf.mxu2 }
 0x5ab   : > { %v1291_v58 = vpop.f32.mrf.mxu3  ;;  %v1294_v60 = vadd.f32 %v1271_v57, %v1221_v59 }
 0x5ac   : > { %v1295_v62 = vadd.f32 %v1291_v58, %v1222_v27  ;;  %v1463_v14 = vpop.f32.mrf.mxu0 }
 0x5ad   : > { %v1483_v13 = vpop.f32.mrf.mxu1  ;;  %v1341_v21 = vadd.f32 %v1318_v46, %v1294_v60 }
 0x5ae   : > { %v1342_v22 = vadd.f32 %v1338_v48, %v1295_v62 }
 0x5b3   : > { %v1392_v17 = vpop.f32.mrf.mxu2 }
 0x5b4   : > { %v1412_v20 = vpop.f32.mrf.mxu3  ;;  %v1415_v35 = vadd.f32 %v1392_v17, %v1341_v21 }
 0x5b5   : > { %v1416_v23 = vadd.f32 %v1412_v20, %v1342_v22 }
 0x5b6   : > { %v1486_v25 = vadd.f32 %v1463_v14, %v1415_v35 }
 0x5b7   : > { %v1487_v26 = vadd.f32 %v1483_v13, %v1416_v23  ;;  %v1595_v29 = vpop.f32.mrf.mxu0 }
 0x5ba   : > { %v1615_v45 = vpop.f32.mrf.mxu1 }
 0x5bb   : > { %v1524_v28 = vpop.f32.mrf.mxu2 }
 0x5bc   : > { %v1547_v37 = vadd.f32 %v1524_v28, %v1486_v25  ;;  %v1544_v34 = vpop.f32.mrf.mxu3 }
 0x5bd   : > { %v1548_v43 = vadd.f32 %v1544_v34, %v1487_v26 }
 0x5be   : > { %v1618_v38 = vadd.f32 %v1595_v29, %v1547_v37 }
 0x5bf   : > { %v1619_v51 = vadd.f32 %v1615_v45, %v1548_v43 }
 0x5c0   : > { %v1626_v55 = vadd.f32 %v1624_v39, %v1618_v38 }
 0x5c1   : > { %v1627_v57 = vadd.f32 %v1624_v39, %v1619_v51 }
 0x5c2   : > { %v1628_v58 = vmax.f32 %v1626_v55, 0.0 }
 0x5c3   : > { %v5804_v59 = vmax.f32 %v1627_v57, 0.0 }
 0x5c4   : > { %v4911_v46 = vpack.i.bf16 %v1628_v58, %v5621_v31  ;;  %v1755_v48 = vmul.f32 %v1628_v58, %v5655_v44  ;;  %v1636_v60 = vmul.f32 %v1628_v58, %v5628_v33  ;;  %v1993_v17 = vmul.f32 %v1628_v58, %v5706_v63 }
 0x5c5   : > { %1649 = vrot.lane.b32.xlu1 %v5804_v59, %s5233_s21  ;;  %v1756_v14 = vmul.f32 %v5804_v59, %v5646_v41  ;;  %v1637_v13 = vmul.f32 %v5804_v59, %v5619_v30  ;;  %v1994_v20 = vmul.f32 %v5804_v59, %v5713_v11  ;;  %v1819_v21 = vmul.f32 %v5804_v59, %v5681_v53 }
 0x5c6   : > { %4912 = vrot.lane.b32.xlu0 %v4911_v46, %s5233_s21  ;;  %v4916_v27 = vpack.i.bf16 %v1755_v48, %v5666_v47  ;;  %v4921_v62 = vpack.i.bf16 %v1636_v60, %v5634_v36  ;;  %v1930_v35 = vmul.f32 %v1628_v58, %v5673_v50  ;;  %v1931_v23 = vmul.f32 %v5804_v59, %v5679_v52 }
 0x5c7   : > { %v4931_v22 = vpack.i.bf16 %v1994_v20, %v1993_v17  ;;  %v1818_v25 = vmul.f32 %v1628_v58, %v5692_v56  ;;  %v2116_v29 = vmul.f32 %v1628_v58, %v5732_v16  ;;  %v2117_v37 = vmul.f32 %v5804_v59, %v5739_v19 }
 0x5c8   : > { %4917 = vrot.lane.b32.xlu2 %v4916_v27, %s5244_s12  ;;  %v4936_v26 = vpack.i.bf16 %v1931_v23, %v1930_v35  ;;  %v4941_v45 = vpack.i.bf16 %v5804_v59, %v1628_v58  ;;  %v4624_v27 = vld [vmem:[%s5445_s18 + $0x50] sm:$0xff] }
 0x5c9   : > { %v4926_v28 = vpack.i.bf16 %v1818_v25, %v5685_v54  ;;  %v4946_v34 = vpack.i.bf16 %v2117_v37, %v2116_v29  ;;  %v4629_v37 = vld [vmem:[%s5445_s18 + $0x58] sm:$0xff] }
 0x5cd   : > { %4922 = vrot.lane.b32.xlu1 %v4921_v62, %s5243_s19 }
 0x5ce   : > { %1766 = vrot.lane.b32.xlu0 %v1756_v14, %s5244_s12 }
 0x5d0   : > { %1705 = vrot.lane.b32.xlu2 %v1637_v13, %s5243_s19 }
 0x5d5   : > { %1829 = vrot.lane.b32.xlu1 %v1819_v21, %s5242_s20 }
 0x5d6   : > { %2005 = vrot.lane.b32.xlu0 %v5718_v12, %s5241_s27 }
 0x5d8   : > { %4932 = vrot.lane.b32.xlu2 %v4931_v22, %s5241_s27 }
 0x5dd   : > { %4937 = vrot.lane.b32.xlu1 %v4936_v26, %s5240_s14  ;;  %v4623_v26 = vld [vmem:[%s5445_s18 + $0x48] sm:$0xff] }
 0x5de   : > { %4927 = vrot.lane.b32.xlu0 %v4926_v28, %s5242_s20 }
 0x5e0   : > { %1942 = vrot.lane.b32.xlu2 %v5726_v15, %s5240_s14 }
 0x5e5   : > { %2128 = vrot.lane.b32.xlu1 %v5754_v24, %s5239_s23 }
 0x5e6   : > { %4947 = vrot.lane.b32.xlu0 %v4946_v34, %s5239_s23 }
 0x5e8   : > { %4942 = vrot.lane.b32.xlu2 %v4941_v45, %s5238_s17  ;;  %v4650_v45 = vld [vmem:[%s5450_s0 + $0x8] sm:$0xff] }
 0x5ed   : > { %2183 = vperm.xlu1 %4951, %v4650_v45   ;;  %v4647_v45 = vld [vmem:[%s5445_s18 + $0x88] sm:$0xff] }
 0x5ee   : > { %2065 = vrot.lane.b32.xlu0 %v5708_v10, %s5238_s17 }
 0x622   : > { %v4918_v43 = vpop.permute.xlu2 %4917 }
 0x623   : > { %v4920_v55 = vunpack.i.h.bf16 %v4918_v43  ;;  %v4919_v57 = vunpack.i.l.bf16 %v4918_v43 }
 0x625   : > { %v1768_v13 = vsel %vm1173_vm14, %v4919_v57, %v4920_v55 }
 0x62a   : > { %v1706_v39 = vpop.permute.xlu2 %1705 }
 0x632   : > { %v4933_v60 = vpop.permute.xlu2 %4932 }
 0x633   : > { %v4935_v35 = vunpack.i.h.bf16 %v4933_v60  ;;  %v4934_v23 = vunpack.i.l.bf16 %v4933_v60 }
 0x635   : > { %v2007_v34 = vsel %vm1154_vm11, %v4934_v23, %v4935_v35 }
 0x637   : > { %v1650_v38 = vpop.permute.xlu1 %1649 }
 0x638   : > { %v4913_v51 = vpop.permute.xlu0 %4912 }
 0x639   : > { %v4915_v46 = vunpack.i.h.bf16 %v4913_v51  ;;  %v4914_v48 = vunpack.i.l.bf16 %v4913_v51 }
 0x63b   : > { %v1651_v62 = vsel %vm1041_vm0, %v4914_v48, %v4915_v46  ;;  %v1652_v14 = vsel %vm1041_vm0, %v4915_v46, %v1650_v38 }
 0x63c   : > { %1673 = vmatpush.msra.mxu2 %v1651_v62  ;;  %1693 = vmatpush.msra.mxu3 %v1652_v14 }
 0x63d   : > { %4625 = vmatmul.msk.f32.vlgmr.msra.gmra.mxu2 %vm1046_vm1, %v4624_v27  ;;  %4626 = vmatmul.msk.f32.vlgmr.msra.gmra.mxu3 %vm1046_vm1, %v4624_v27 }
 0x63e   : > { %1790 = vmatpush.msrb.mxu2 %v1768_v13  ;;  %v4632_v13 = vld [vmem:[%s5445_s18 + $0x60] sm:$0xff] }
 0x63f   : > { %v4923_v17 = vpop.permute.xlu1 %4922 }
 0x640   : > { %1900 = vmatpush.msra.mxu2 %v1628_v58  ;;  %v4925_v20 = vunpack.i.h.bf16 %v4923_v17  ;;  %v4924_v21 = vunpack.i.l.bf16 %v4923_v17  ;;  %v1767_v22 = vpop.permute.xlu0 %1766  ;;  %v1943_v58 = vpop.permute.xlu2 %1942 }
 0x641   : > { %v1769_v25 = vsel %vm1173_vm14, %v4920_v55, %v1767_v22 }
 0x642   : > { %v1707_v28 = vsel %vm1099_vm15, %v4924_v21, %v4925_v20  ;;  %v1708_v29 = vsel %vm1099_vm15, %v4925_v20, %v1706_v39  ;;  %1810 = vmatpush.msrb.mxu3 %v1769_v25  ;;  %v4641_v21 = vld [vmem:[%s5445_s18 + $0x78] sm:$0xff] }
 0x643   : > { %1729 = vmatpush.msrb.mxu0 %v1707_v28  ;;  %1749 = vmatpush.msrb.mxu1 %v1708_v29 }
 0x644   : > { %1920 = vmatpush.msra.mxu3 %v5804_v59  ;;  %4627 = vmatmul.msk.f32.vlgmr.msrb.gmra.mxu0 %vm1046_vm1, %v4623_v26  ;;  %v4635_v59 = vld [vmem:[%s5445_s18 + $0x68] sm:$0xff] }
 0x645   : > { %4630 = vmatmul.msk.f32.vlgmr.msrb.gmra.mxu2 %vm1046_vm1, %v4629_v37  ;;  %4631 = vmatmul.msk.f32.vlgmr.msrb.gmra.mxu3 %vm1046_vm1, %v4629_v37  ;;  %v4638_v37 = vld [vmem:[%s5445_s18 + $0x70] sm:$0xff] }
 0x646   : > { %2029 = vmatpush.msrb.mxu2 %v2007_v34  ;;  %4628 = vmatmul.msk.f32.vlgmr.msrb.gmra.mxu1 %vm1046_vm1, %v4623_v26 }
 0x647   : > { %v1830_v43 = vpop.permute.xlu1 %1829 }
 0x648   : > { %v2006_v39 = vpop.permute.xlu0 %2005  ;;  %v4943_v51 = vpop.permute.xlu2 %4942 }
 0x649   : > { %v2008_v38 = vsel %vm1154_vm11, %v4935_v35, %v2006_v39  ;;  %v4945_v62 = vunpack.i.h.bf16 %v4943_v51  ;;  %v4944_v14 = vunpack.i.l.bf16 %v4943_v51 }
 0x64a   : > { %2049 = vmatpush.msrb.mxu3 %v2008_v38  ;;  %v4644_v38 = vld [vmem:[%s5445_s18 + $0x80] sm:$0xff] }
 0x64b   : > { %v2067_v23 = vsel %vm1499_vm3, %v4944_v14, %v4945_v62 }
 0x64d   : > { %4636 = vmatmul.msk.f32.vlgmr.msra.gmra.mxu2 %vm1046_vm1, %v4635_v59  ;;  %4637 = vmatmul.msk.f32.vlgmr.msra.gmra.mxu3 %vm1046_vm1, %v4635_v59 }
 0x64f   : > { %v4938_v55 = vpop.permute.xlu1 %4937 }
 0x650   : > { %v4928_v57 = vpop.permute.xlu0 %4927  ;;  %v4940_v46 = vunpack.i.h.bf16 %v4938_v55  ;;  %v4939_v48 = vunpack.i.l.bf16 %v4938_v55 }
 0x651   : > { %v4930_v27 = vunpack.i.h.bf16 %v4928_v57  ;;  %v4929_v60 = vunpack.i.l.bf16 %v4928_v57 }
 0x652   : > { %v1944_v22 = vsel %vm1227_vm13, %v4939_v48, %v4940_v46  ;;  %v1945_v35 = vsel %vm1227_vm13, %v4940_v46, %v1943_v58 }
 0x653   : > { %v1831_v17 = vsel %vm1246_vm12, %v4929_v60, %v4930_v27  ;;  %v1832_v20 = vsel %vm1246_vm12, %v4930_v27, %v1830_v43 }
 0x654   : > { %1853 = vmatpush.msra.mxu0 %v1831_v17  ;;  %1873 = vmatpush.msra.mxu1 %v1832_v20 }
 0x655   : > { %4633 = vmatmul.msk.f32.vlgmr.msra.gmra.mxu0 %vm1046_vm1, %v4632_v13  ;;  %4634 = vmatmul.msk.f32.vlgmr.msra.gmra.mxu1 %vm1046_vm1, %v4632_v13 }
 0x656   : > { %1966 = vmatpush.msrb.mxu0 %v1944_v22  ;;  %1986 = vmatpush.msrb.mxu1 %v1945_v35 }
 0x657   : > { %4642 = vmatmul.msk.f32.vlgmr.msrb.gmra.mxu2 %vm1046_vm1, %v4641_v21  ;;  %4643 = vmatmul.msk.f32.vlgmr.msrb.gmra.mxu3 %vm1046_vm1, %v4641_v21  ;;  %v2129_v29 = vpop.permute.xlu1 %2128 }
 0x658   : > { %2089 = vmatpush.msra.mxu0 %v2067_v23  ;;  %v4948_v25 = vpop.permute.xlu0 %4947 }
 0x659   : > { %v4950_v26 = vunpack.i.h.bf16 %v4948_v25  ;;  %v4949_v28 = vunpack.i.l.bf16 %v4948_v25 }
 0x65b   : > { %v2130_v34 = vsel %vm1021_vm10, %v4949_v28, %v4950_v26  ;;  %v2131_v58 = vsel %vm1021_vm10, %v4950_v26, %v2129_v29 }
 0x65c   : > { %2152 = vmatpush.msra.mxu2 %v2130_v34  ;;  %2172 = vmatpush.msra.mxu3 %v2131_v58 }
 0x65d   : > { %4639 = vmatmul.msk.f32.vlgmr.msrb.gmra.mxu0 %vm1046_vm1, %v4638_v37  ;;  %4640 = vmatmul.msk.f32.vlgmr.msrb.gmra.mxu1 %vm1046_vm1, %v4638_v37 }
 0x65f   : > { %4648 = vmatmul.msk.f32.vlgmr.msra.gmra.mxu2 %vm1046_vm1, %v4647_v45  ;;  %4649 = vmatmul.msk.f32.vlgmr.msra.gmra.mxu3 %vm1046_vm1, %v4647_v45 }
 0x660   : > { %v2066_v43 = vpop.permute.xlu0 %2065 }
 0x661   : > { %v2068_v39 = vsel %vm1499_vm3, %v4945_v62, %v2066_v43 }
 0x662   : > { %2109 = vmatpush.msra.mxu1 %v2068_v39 }
 0x665   : > { %4645 = vmatmul.msk.f32.vlgmr.msra.gmra.mxu0 %vm1046_vm1, %v4644_v38  ;;  %4646 = vmatmul.msk.f32.vlgmr.msra.gmra.mxu1 %vm1046_vm1, %v4644_v38 }
 0x6c0   : > { %v1675_v59 = vpop.f32.mrf.mxu2  ;;  %v1695_v51 = vpop.f32.mrf.mxu3 }
 0x6c1   : > { %v1731_v46 = vpop.f32.mrf.mxu0 }
 0x6c2   : > { %v1732_v20 = vadd.f32 %v1731_v46, %v1675_v59 }
 0x6c3   : > { %v1751_v48 = vpop.f32.mrf.mxu1 }
 0x6c4   : > { %v1752_v27 = vadd.f32 %v1751_v48, %v1695_v51 }
 0x6c8   : > { %v1792_v55 = vpop.f32.mrf.mxu2  ;;  %v1812_v57 = vpop.f32.mrf.mxu3 }
 0x6c9   : > { %v1815_v21 = vadd.f32 %v1792_v55, %v1732_v20  ;;  %v1816_v62 = vadd.f32 %v1812_v57, %v1752_v27  ;;  %v2184_v55 = vpop.permute.xlu1 %2183 }
 0x6d0   : > { %v1902_v60 = vpop.f32.mrf.mxu2  ;;  %v1922_v14 = vpop.f32.mrf.mxu3 }
 0x6d2   : > { %v1855_v13 = vpop.f32.mrf.mxu0  ;;  %v1875_v17 = vpop.f32.mrf.mxu1 }
 0x6d3   : > { %v1878_v22 = vadd.f32 %v1855_v13, %v1815_v21  ;;  %v1879_v35 = vadd.f32 %v1875_v17, %v1816_v62 }
 0x6d5   : > { %v1925_v26 = vadd.f32 %v1902_v60, %v1878_v22  ;;  %v1926_v28 = vadd.f32 %v1922_v14, %v1879_v35 }
 0x6da   : > { %v1968_v23 = vpop.f32.mrf.mxu0  ;;  %v1988_v25 = vpop.f32.mrf.mxu1 }
 0x6db   : > { %v2031_v29 = vpop.f32.mrf.mxu2  ;;  %v2051_v37 = vpop.f32.mrf.mxu3  ;;  %v1991_v34 = vadd.f32 %v1968_v23, %v1925_v26  ;;  %v1992_v58 = vadd.f32 %v1988_v25, %v1926_v28 }
 0x6dd   : > { %v2054_v45 = vadd.f32 %v2031_v29, %v1991_v34  ;;  %v2055_v43 = vadd.f32 %v2051_v37, %v1992_v58 }
 0x6e2   : > { %v2091_v39 = vpop.f32.mrf.mxu0  ;;  %v2111_v38 = vpop.f32.mrf.mxu1 }
 0x6e3   : > { %v2114_v51 = vadd.f32 %v2091_v39, %v2054_v45  ;;  %v2115_v48 = vadd.f32 %v2111_v38, %v2055_v43  ;;  %v2154_v7 = vpop.f32.mrf.mxu2  ;;  %v2174_v59 = vpop.f32.mrf.mxu3  ;;  %v4652_v39 = vld [vmem:[%s5445_s18 + $0x98] sm:$0xff] }
 0x6e5   : > { %v2177_v57 = vadd.f32 %v2154_v7, %v2114_v51  ;;  %v2178_v46 = vadd.f32 %v2174_v59, %v2115_v48 }
 0x6e7   : > { %v2186_v27 = vadd.f32 %v2184_v55, %v2177_v57  ;;  %v2187_v13 = vadd.f32 %v2184_v55, %v2178_v46 }
 0x6e9   : > { %v5895_v17 = vmax.f32 %v2186_v27, 0.0  ;;  %v5897_v60 = vmax.f32 %v2187_v13, 0.0  ;;  %v4651_v13 = vld [vmem:[%s5445_s18 + $0x90] sm:$0xff] }
 0x6eb   : > { %2209 = vrot.lane.b32.xlu0 %v5897_v60, %s5233_s21  ;;  %v4952_v14 = vpack.i.bf16 %v5895_v17, %v5621_v31  ;;  %v2196_v20 = vmul.f32 %v5895_v17, %v5628_v33  ;;  %v2315_v21 = vmul.f32 %v5895_v17, %v5655_v44  ;;  %v2197_v22 = vmul.f32 %v5897_v60, %v5619_v30 }
 0x6ec   : > { %v2316_v31 = vmul.f32 %v5897_v60, %v5646_v41  ;;  %v2379_v35 = vmul.f32 %v5897_v60, %v5681_v53  ;;  %v2491_v23 = vmul.f32 %v5897_v60, %v5679_v52  ;;  %v2553_v28 = vmul.f32 %v5895_v17, %v5706_v63 }
 0x6ed   : > { %4953 = vrot.lane.b32.xlu2 %v4952_v14, %s5233_s21  ;;  %v4957_v7 = vpack.i.bf16 %v2196_v20, %v5634_v36  ;;  %v4962_v62 = vpack.i.bf16 %v2315_v21, %v5666_v47  ;;  %v2378_v36 = vmul.f32 %v5895_v17, %v5692_v56  ;;  %v2490_v47 = vmul.f32 %v5895_v17, %v5673_v50 }
 0x6ee   : > { %v2554_v29 = vmul.f32 %v5897_v60, %v5713_v11  ;;  %v2677_v34 = vmul.f32 %v5897_v60, %v5739_v19  ;;  %v4977_v58 = vpack.i.bf16 %v5897_v60, %v5895_v17 }
 0x6ef   : > { %4958 = vrot.lane.b32.xlu1 %v4957_v7, %s5243_s19  ;;  %v4967_v25 = vpack.i.bf16 %v2378_v36, %v5685_v54  ;;  %v4972_v26 = vpack.i.bf16 %v2491_v23, %v2490_v47  ;;  %v2676_v54 = vmul.f32 %v5895_v17, %v5732_v16  ;;  %v4678_v36 = vld [vmem:[%s5450_s0 + $0x10] sm:$0xff]  ;;  %v4657_v47 = vld [vmem:[%s5445_s18 + $0xa0] sm:$0xff] }
 0x6f0   : > { %v4982_v37 = vpack.i.bf16 %v2554_v29, %v2553_v28 }
 0x6f1   : > { %v4987_v45 = vpack.i.bf16 %v2677_v34, %v2676_v54  ;;  %v4663_v54 = vld [vmem:[%s5445_s18 + $0xb0] sm:$0xff] }
 0x6f3   : > { %4963 = vrot.lane.b32.xlu0 %v4962_v62, %s5244_s12 }
 0x6f5   : > { %2265 = vrot.lane.b32.xlu2 %v2197_v22, %s5243_s19 }
 0x6f7   : > { %2326 = vrot.lane.b32.xlu1 %v2316_v31, %s5244_s12 }
 0x6fb   : > { %2389 = vrot.lane.b32.xlu0 %v2379_v35, %s5242_s20 }
 0x6fd   : > { %4968 = vrot.lane.b32.xlu2 %v4967_v25, %s5242_s20 }
 0x6ff   : > { %4973 = vrot.lane.b32.xlu1 %v4972_v26, %s5240_s14  ;;  %v4660_v26 = vld [vmem:[%s5445_s18 + $0xa8] sm:$0xff] }
 0x703   : > { %4983 = vrot.lane.b32.xlu0 %v4982_v37, %s5241_s27 }
 0x705   : > { %2502 = vrot.lane.b32.xlu2 %v5726_v15, %s5240_s14 }
 0x707   : > { %2565 = vrot.lane.b32.xlu1 %v5718_v12, %s5241_s27 }
 0x70b   : > { %2625 = vrot.lane.b32.xlu0 %v5708_v10, %s5238_s17 }
 0x70d   : > { %4978 = vrot.lane.b32.xlu2 %v4977_v58, %s5238_s17 }
 0x70f   : > { %4988 = vrot.lane.b32.xlu1 %v4987_v45, %s5239_s23 }
 0x713   : > { %2743 = vperm.xlu0 %4992, %v4678_v36  }
 0x715   : > { %2688 = vrot.lane.b32.xlu2 %v5754_v24, %s5239_s23 }
 0x747   : > { %v4954_v12 = vpop.permute.xlu2 %4953 }
 0x748   : > { %v4956_v15 = vunpack.i.h.bf16 %v4954_v12  ;;  %v4955_v43 = vunpack.i.l.bf16 %v4954_v12 }
 0x74a   : > { %v2211_v38 = vsel %vm1041_vm0, %v4955_v43, %v4956_v15 }
 0x74b   : > { %2233 = vmatpush.msrb.mxu0 %v2211_v38 }
 0x74c   : > { %4653 = vmatmul.msk.f32.vlgmr.msrb.gmra.mxu0 %vm1046_vm1, %v4652_v39 }
 0x74f   : > { %v2266_v10 = vpop.permute.xlu2 %2265 }
 0x757   : > { %v4969_v51 = vpop.permute.xlu2 %4968 }
 0x758   : > { %v4971_v24 = vunpack.i.h.bf16 %v4969_v51  ;;  %v4970_v57 = vunpack.i.l.bf16 %v4969_v51 }
 0x75a   : > { %v2391_v31 = vsel %vm1246_vm12, %v4970_v57, %v4971_v24  ;;  %v4672_v57 = vld [vmem:[%s5445_s18 + $0xc8] sm:$0xff] }
 0x75d   : > { %v2210_v48 = vpop.permute.xlu0 %2209 }
 0x75e   : > { %v2212_v59 = vsel %vm1041_vm0, %v4956_v15, %v2210_v48 }
 0x75f   : > { %2253 = vmatpush.msrb.mxu1 %v2212_v59  ;;  %v2503_v7 = vpop.permute.xlu2 %2502  ;;  %v4669_v59 = vld [vmem:[%s5445_s18 + $0xc0] sm:$0xff] }
 0x760   : > { %4654 = vmatmul.msk.f32.vlgmr.msrb.gmra.mxu1 %vm1046_vm1, %v4652_v39 }
 0x761   : > { %v4959_v55 = vpop.permute.xlu1 %4958 }
 0x762   : > { %v4961_v46 = vunpack.i.h.bf16 %v4959_v55  ;;  %v4960_v27 = vunpack.i.l.bf16 %v4959_v55 }
 0x764   : > { %v2267_v14 = vsel %vm1099_vm15, %v4960_v27, %v4961_v46  ;;  %v2268_v20 = vsel %vm1099_vm15, %v4961_v46, %v2266_v10 }
 0x765   : > { %v4964_v21 = vpop.permute.xlu0 %4963  ;;  %2289 = vmatpush.msrb.mxu2 %v2267_v14  ;;  %2309 = vmatpush.msrb.mxu3 %v2268_v20 }
 0x766   : > { %v4966_v62 = vunpack.i.h.bf16 %v4964_v21  ;;  %v4965_v22 = vunpack.i.l.bf16 %v4964_v21  ;;  %4655 = vmatmul.msk.f32.vlgmr.msrb.gmra.mxu2 %vm1046_vm1, %v4651_v13  ;;  %4656 = vmatmul.msk.f32.vlgmr.msrb.gmra.mxu3 %vm1046_vm1, %v4651_v13  ;;  %v4675_v21 = vld [vmem:[%s5445_s18 + $0xd0] sm:$0xff] }
 0x767   : > { %2413 = vmatpush.msra.mxu2 %v2391_v31  ;;  %v4979_v37 = vpop.permute.xlu2 %4978 }
 0x768   : > { %v2328_v35 = vsel %vm1173_vm14, %v4965_v22, %v4966_v62  ;;  %v4981_v34 = vunpack.i.h.bf16 %v4979_v37  ;;  %v4980_v58 = vunpack.i.l.bf16 %v4979_v37 }
 0x769   : > { %2350 = vmatpush.msra.mxu0 %v2328_v35  ;;  %v2327_v23 = vpop.permute.xlu1 %2326 }
 0x76a   : > { %v2329_v25 = vsel %vm1173_vm14, %v4966_v62, %v2327_v23  ;;  %4658 = vmatmul.msk.f32.vlgmr.msra.gmra.mxu0 %vm1046_vm1, %v4657_v47  ;;  %v2627_v51 = vsel %vm1499_vm3, %v4980_v58, %v4981_v34 }
 0x76b   : > { %2460 = vmatpush.msrb.mxu0 %v5895_v17  ;;  %2370 = vmatpush.msra.mxu1 %v2329_v25 }
 0x76c   : > { %4659 = vmatmul.msk.f32.vlgmr.msra.gmra.mxu1 %vm1046_vm1, %v4657_v47 }
 0x76d   : > { %2480 = vmatpush.msrb.mxu1 %v5897_v60  ;;  %v2390_v28 = vpop.permute.xlu0 %2389  ;;  %v4666_v60 = vld [vmem:[%s5445_s18 + $0xb8] sm:$0xff] }
 0x76e   : > { %v2392_v29 = vsel %vm1246_vm12, %v4971_v24, %v2390_v28  ;;  %4661 = vmatmul.msk.f32.vlgmr.msra.gmra.mxu2 %vm1046_vm1, %v4660_v26 }
 0x76f   : > { %2433 = vmatpush.msra.mxu3 %v2392_v29 }
 0x770   : > { %4662 = vmatmul.msk.f32.vlgmr.msra.gmra.mxu3 %vm1046_vm1, %v4660_v26 }
 0x771   : > { %v4974_v17 = vpop.permute.xlu1 %4973 }
 0x772   : > { %v4976_v45 = vunpack.i.h.bf16 %v4974_v17  ;;  %v4975_v12 = vunpack.i.l.bf16 %v4974_v17  ;;  %4664 = vmatmul.msk.f32.vlgmr.msrb.gmra.mxu0 %vm1046_vm1, %v4663_v54 }
 0x774   : > { %v2504_v15 = vsel %vm1227_vm13, %v4975_v12, %v4976_v45  ;;  %v2505_v43 = vsel %vm1227_vm13, %v4976_v45, %v2503_v7  ;;  %4665 = vmatmul.msk.f32.vlgmr.msrb.gmra.mxu1 %vm1046_vm1, %v4663_v54  ;;  %v2689_v7 = vpop.permute.xlu2 %2688 }
 0x775   : > { %v4984_v39 = vpop.permute.xlu0 %4983  ;;  %2526 = vmatpush.msrb.mxu2 %v2504_v15  ;;  %2546 = vmatpush.msrb.mxu3 %v2505_v43 }
 0x776   : > { %v4986_v38 = vunpack.i.h.bf16 %v4984_v39  ;;  %v4985_v10 = vunpack.i.l.bf16 %v4984_v39  ;;  %4667 = vmatmul.msk.f32.vlgmr.msrb.gmra.mxu2 %vm1046_vm1, %v4666_v60 }
 0x777   : > { %2649 = vmatpush.msra.mxu2 %v2627_v51 }
 0x778   : > { %4668 = vmatmul.msk.f32.vlgmr.msrb.gmra.mxu3 %vm1046_vm1, %v4666_v60  ;;  %v2567_v48 = vsel %vm1154_vm11, %v4985_v10, %v4986_v38 }
 0x779   : > { %2589 = vmatpush.msra.mxu0 %v2567_v48  ;;  %v2566_v55 = vpop.permute.xlu1 %2565 }
 0x77a   : > { %v2568_v24 = vsel %vm1154_vm11, %v4986_v38, %v2566_v55  ;;  %4670 = vmatmul.msk.f32.vlgmr.msra.gmra.mxu0 %vm1046_vm1, %v4669_v59 }
 0x77b   : > { %2609 = vmatpush.msra.mxu1 %v2568_v24 }
 0x77c   : > { %4671 = vmatmul.msk.f32.vlgmr.msra.gmra.mxu1 %vm1046_vm1, %v4669_v59 }
 0x77d   : > { %v2626_v46 = vpop.permute.xlu0 %2625 }
 0x77e   : > { %v2628_v27 = vsel %vm1499_vm3, %v4981_v34, %v2626_v46  ;;  %4673 = vmatmul.msk.f32.vlgmr.msra.gmra.mxu2 %vm1046_vm1, %v4672_v57 }
 0x77f   : > { %2669 = vmatpush.msra.mxu3 %v2628_v27 }
 0x780   : > { %4674 = vmatmul.msk.f32.vlgmr.msra.gmra.mxu3 %vm1046_vm1, %v4672_v57 }
 0x781   : > { %v4989_v13 = vpop.permute.xlu1 %4988 }
 0x782   : > { %v4991_v14 = vunpack.i.h.bf16 %v4989_v13  ;;  %v4990_v20 = vunpack.i.l.bf16 %v4989_v13 }
 0x784   : > { %v2690_v62 = vsel %vm1021_vm10, %v4990_v20, %v4991_v14  ;;  %v2691_v22 = vsel %vm1021_vm10, %v4991_v14, %v2689_v7 }
 0x785   : > { %2712 = vmatpush.msrb.mxu0 %v2690_v62  ;;  %2732 = vmatpush.msrb.mxu1 %v2691_v22  ;;  %v2744_v46 = vpop.permute.xlu0 %2743  ;;  %v2752_v22 = vld [vmem:[#allocation2] sm:$0xff] }
 0x786   : > { %4676 = vmatmul.msk.f32.vlgmr.msrb.gmra.mxu0 %vm1046_vm1, %v4675_v21  ;;  %4677 = vmatmul.msk.f32.vlgmr.msrb.gmra.mxu1 %vm1046_vm1, %v4675_v21 }
 0x7c9   : > { %v2235_v31 = vpop.f32.mrf.mxu0 }
 0x7dd   : > { %v2255_v36 = vpop.f32.mrf.mxu1 }
 0x7e7   : > { %v2352_v35 = vpop.f32.mrf.mxu0 }
 0x7e9   : > { %v2291_v47 = vpop.f32.mrf.mxu2  ;;  %v2311_v23 = vpop.f32.mrf.mxu3 }
 0x7ea   : > { %v2372_v25 = vpop.f32.mrf.mxu1  ;;  %v2312_v26 = vadd.f32 %v2311_v23, %v2255_v36  ;;  %v2292_v28 = vadd.f32 %v2291_v47, %v2235_v31  ;;  %v6003_v23 = vmul.f32 %v2752_v22, %v5623_v32 }
 0x7ec   : > { %v2376_v54 = vadd.f32 %v2372_v25, %v2312_v26  ;;  %v2375_v58 = vadd.f32 %v2352_v35, %v2292_v28 }
 0x7ef   : > { %v2462_v29 = vpop.f32.mrf.mxu0 }
 0x7f1   : > { %v2415_v37 = vpop.f32.mrf.mxu2 }
 0x7f2   : > { %v2482_v34 = vpop.f32.mrf.mxu1  ;;  %v2438_v45 = vadd.f32 %v2415_v37, %v2375_v58 }
 0x7f3   : > { %v2435_v17 = vpop.f32.mrf.mxu3 }
 0x7f4   : > { %v2439_v12 = vadd.f32 %v2435_v17, %v2376_v54  ;;  %v2485_v43 = vadd.f32 %v2462_v29, %v2438_v45  ;;  %v6015_v29 = vmul.f32 %v2752_v22, %v5648_v42 }
 0x7f6   : > { %v2486_v39 = vadd.f32 %v2482_v34, %v2439_v12  ;;  %v6027_v34 = vld [vmem:[#allocation2 + $0x18] sm:$0xff] }
 0x7f7   : > { %v2591_v15 = vpop.f32.mrf.mxu0  ;;  %v6031_v42 = vmul.f32 %v6027_v34, %v5702_v61 }
 0x7f9   : > { %v2528_v60 = vpop.f32.mrf.mxu2 }
 0x7fa   : > { %v2611_v10 = vpop.f32.mrf.mxu1  ;;  %v2551_v51 = vadd.f32 %v2528_v60, %v2485_v43 }
 0x7fb   : > { %v2548_v38 = vpop.f32.mrf.mxu3 }
 0x7fc   : > { %v2552_v48 = vadd.f32 %v2548_v38, %v2486_v39  ;;  %v2614_v59 = vadd.f32 %v2591_v15, %v2551_v51  ;;  %v6046_v15 = vmul.f32 %v2752_v22, %v5643_v40 }
 0x7fe   : > { %v2615_v24 = vadd.f32 %v2611_v10, %v2552_v48  ;;  %v6055_v10 = vmul.f32 %v6027_v34, %v5734_v18 }
 0x801   : > { %v2651_v55 = vpop.f32.mrf.mxu2 }
 0x802   : > { %v2674_v57 = vadd.f32 %v2651_v55, %v2614_v59  ;;  %v6065_v59 = vmul.f32 %v6027_v34, %v5671_v49  ;;  %v4706_v55 = vld [vmem:[%s5450_s0 + $0x18] sm:$0xff] }
 0x803   : > { %v2671_v27 = vpop.f32.mrf.mxu3  ;;  %v2714_v13 = vpop.f32.mrf.mxu0 }
 0x804   : > { %v2675_v14 = vadd.f32 %v2671_v27, %v2615_v24  ;;  %v2737_v20 = vadd.f32 %v2714_v13, %v2674_v57  ;;  %v2734_v7 = vpop.f32.mrf.mxu1 }
 0x806   : > { %v2746_v21 = vadd.f32 %v2744_v46, %v2737_v20  ;;  %v2738_v62 = vadd.f32 %v2734_v7, %v2675_v14 }
 0x808   : > { %v5997_v31 = vmax.f32 %v2746_v21, 0.0  ;;  %v2747_v36 = vadd.f32 %v2744_v46, %v2738_v62  ;;  %v4680_v62 = vld [vmem:[%s5445_s18 + $0xe0] sm:$0xff] }
 0x80a   : > { %v5999_v35 = vmax.f32 %v2747_v36, 0.0  ;;  %v4993_v47 = vpack.i.bf16 %v5997_v31, %v2752_v22  ;;  %v2756_v25 = vmul.f32 %v5997_v31, %v5628_v33  ;;  %v2875_v28 = vmul.f32 %v5997_v31, %v5655_v44 }
 0x80b   : > { %v3050_v45 = vmul.f32 %v5997_v31, %v5673_v50  ;;  %v2938_v60 = vmul.f32 %v5997_v31, %v5692_v56  ;;  %v3113_v43 = vmul.f32 %v5997_v31, %v5706_v63  ;;  %v3236_v51 = vmul.f32 %v5997_v31, %v5732_v16 }
 0x80c   : > { %2769 = vrot.lane.b32.xlu2 %v5999_v35, %s5233_s21  ;;  %4994 = vrot.lane.b32.xlu1 %v4993_v47, %s5233_s21  ;;  %v5003_v26 = vpack.i.bf16 %v2756_v25, %v6003_v23  ;;  %v2876_v32 = vmul.f32 %v5999_v35, %v5646_v41  ;;  %v4998_v37 = vpack.i.bf16 %v2875_v28, %v6015_v29  ;;  %v4679_v28 = vld [vmem:[%s5445_s18 + $0xd8] sm:$0xff] }
 0x80d   : > { %v2939_v54 = vmul.f32 %v5999_v35, %v5681_v53  ;;  %v3051_v17 = vmul.f32 %v5999_v35, %v5679_v52  ;;  %v2757_v58 = vmul.f32 %v5999_v35, %v5619_v30  ;;  %v3114_v61 = vmul.f32 %v5999_v35, %v5713_v11 }
 0x80e   : > { %5004 = vrot.lane.b32.xlu0 %v5003_v26, %s5243_s19  ;;  %v5008_v39 = vpack.i.bf16 %v2938_v60, %v6046_v15  ;;  %v3237_v40 = vmul.f32 %v5999_v35, %v5739_v19  ;;  %v5023_v18 = vpack.i.bf16 %v5999_v35, %v5997_v31 }
 0x80f   : > { %v5018_v12 = vpack.i.bf16 %v3051_v17, %v3050_v45  ;;  %v5013_v38 = vpack.i.bf16 %v3114_v61, %v3113_v43  ;;  %v4685_v45 = vld [vmem:[%s5445_s18 + $0xe8] sm:$0xff]  ;;  %v4688_v61 = vld [vmem:[%s5445_s18 + $0xf0] sm:$0xff] }
 0x810   : > { %v5028_v48 = vpack.i.bf16 %v3237_v40, %v3236_v51  ;;  %v4691_v40 = vld [vmem:[%s5445_s18 + $0xf8] sm:$0xff] }
 0x814   : > { %2886 = vrot.lane.b32.xlu2 %v2876_v32, %s5244_s12  ;;  %4999 = vrot.lane.b32.xlu1 %v4998_v37, %s5244_s12 }
 0x816   : > { %2949 = vrot.lane.b32.xlu0 %v2939_v54, %s5242_s20 }
 0x81c   : > { %3125 = vrot.lane.b32.xlu2 %v6031_v42, %s5241_s27  ;;  %2825 = vrot.lane.b32.xlu1 %v2757_v58, %s5243_s19 }
 0x81e   : > { %5019 = vrot.lane.b32.xlu0 %v5018_v12, %s5240_s14 }
 0x824   : > { %5009 = vrot.lane.b32.xlu2 %v5008_v39, %s5242_s20  ;;  %5014 = vrot.lane.b32.xlu1 %v5013_v38, %s5241_s27 }
 0x826   : > { %3248 = vrot.lane.b32.xlu0 %v6055_v10, %s5239_s23 }
 0x82c   : > { %5029 = vrot.lane.b32.xlu2 %v5028_v48, %s5239_s23  ;;  %3062 = vrot.lane.b32.xlu1 %v6065_v59, %s5240_s14 }
 0x82e   : > { %3303 = vperm.xlu0 %4992, %v4706_v55  }
 0x834   : > { %5024 = vrot.lane.b32.xlu1 %v5023_v18, %s5238_s17  ;;  %3185 = vrot.lane.b32.xlu2 %v6027_v34, %s5238_s17 }
 0x836   : > { %3325 = vrot.lane.b32.xlu0 %v2752_v22, %s5233_s21 }
 0x866   : > { %v2770_v49 = vpop.permute.xlu2 %2769 }
 0x86e   : > { %v2887_v24 = vpop.permute.xlu2 %2886 }
 0x876   : > { %v6077_v57 = vpop.permute.xlu2 %3125 }
 0x87e   : > { %v4995_v46 = vpop.permute.xlu1 %4994  ;;  %v5010_v27 = vpop.permute.xlu2 %5009 }
 0x87f   : > { %v4997_v13 = vunpack.i.h.bf16 %v4995_v46  ;;  %v4996_v14 = vunpack.i.l.bf16 %v4995_v46  ;;  %v5012_v20 = vunpack.i.h.bf16 %v5010_v27  ;;  %v5011_v7 = vunpack.i.l.bf16 %v5010_v27 }
 0x880   : > { %v5005_v21 = vpop.permute.xlu0 %5004 }
 0x881   : > { %v5007_v36 = vunpack.i.h.bf16 %v5005_v21  ;;  %v5006_v47 = vunpack.i.l.bf16 %v5005_v21  ;;  %v2771_v25 = vsel %vm1041_vm0, %v4996_v14, %v4997_v13  ;;  %v2772_v22 = vsel %vm1041_vm0, %v4997_v13, %v2770_v49 }
 0x882   : > { %2793 = vmatpush.msrb.mxu2 %v2771_v25  ;;  %2813 = vmatpush.msrb.mxu3 %v2772_v22  ;;  %v2951_v32 = vsel %vm1246_vm12, %v5011_v7, %v5012_v20  ;;  %v4703_v22 = vld [vmem:[%s5445_s18 + $0x118] sm:$0xff] }
 0x883   : > { %4681 = vmatmul.msk.f32.vlgmr.msrb.gmra.mxu2 %vm1046_vm1, %v4680_v62  ;;  %v2827_v26 = vsel %vm1099_vm15, %v5006_v47, %v5007_v36  ;;  %4682 = vmatmul.msk.f32.vlgmr.msrb.gmra.mxu3 %vm1046_vm1, %v4680_v62 }
 0x884   : > { %2849 = vmatpush.msra.mxu0 %v2827_v26 }
 0x885   : > { %4683 = vmatmul.msk.f32.vlgmr.msra.gmra.mxu0 %vm1046_vm1, %v4679_v28 }
 0x886   : > { %2973 = vmatpush.msrb.mxu0 %v2951_v32  ;;  %v5000_v37 = vpop.permute.xlu1 %4999  ;;  %v5030_v18 = vpop.permute.xlu2 %5029 }
 0x887   : > { %v5002_v54 = vunpack.i.h.bf16 %v5000_v37  ;;  %v5001_v17 = vunpack.i.l.bf16 %v5000_v37  ;;  %v5031_v46 = vunpack.i.l.bf16 %v5030_v18  ;;  %v4700_v37 = vld [vmem:[%s5445_s18 + $0x110] sm:$0xff] }
 0x888   : > { %v2950_v58 = vpop.permute.xlu0 %2949 }
 0x889   : > { %v2888_v12 = vsel %vm1173_vm14, %v5001_v17, %v5002_v54  ;;  %v2889_v60 = vsel %vm1173_vm14, %v5002_v54, %v2887_v24  ;;  %v2952_v51 = vsel %vm1246_vm12, %v5012_v20, %v2950_v58  ;;  %v5032_v24 = vunpack.i.h.bf16 %v5030_v18  ;;  %v4697_v20 = vld [vmem:[%s5445_s18 + $0x108] sm:$0xff] }
 0x88a   : > { %2910 = vmatpush.msra.mxu2 %v2888_v12  ;;  %2930 = vmatpush.msra.mxu3 %v2889_v60 }
 0x88b   : > { %4686 = vmatmul.msk.f32.vlgmr.msra.gmra.mxu2 %vm1046_vm1, %v4685_v45  ;;  %4687 = vmatmul.msk.f32.vlgmr.msra.gmra.mxu3 %vm1046_vm1, %v4685_v45 }
 0x88c   : > { %3040 = vmatpush.msrb.mxu3 %v5999_v35  ;;  %3020 = vmatpush.msrb.mxu2 %v5997_v31  ;;  %v4694_v35 = vld [vmem:[%s5445_s18 + $0x100] sm:$0xff] }
 0x88d   : > { %4689 = vmatmul.msk.f32.vlgmr.msrb.gmra.mxu0 %vm1046_vm1, %v4688_v61 }
 0x88e   : > { %v2826_v43 = vpop.permute.xlu1 %2825  ;;  %v3186_v26 = vpop.permute.xlu2 %3185 }
 0x88f   : > { %v2828_v39 = vsel %vm1099_vm15, %v5007_v36, %v2826_v43  ;;  %v3250_v36 = vsel %vm1021_vm10, %v5031_v46, %v5032_v24 }
 0x890   : > { %v5020_v38 = vpop.permute.xlu0 %5019  ;;  %2869 = vmatpush.msra.mxu1 %v2828_v39 }
 0x891   : > { %v5022_v48 = vunpack.i.h.bf16 %v5020_v38  ;;  %v5021_v55 = vunpack.i.l.bf16 %v5020_v38  ;;  %4684 = vmatmul.msk.f32.vlgmr.msra.gmra.mxu1 %vm1046_vm1, %v4679_v28 }
 0x892   : > { %2993 = vmatpush.msrb.mxu1 %v2952_v51 }
 0x893   : > { %4692 = vmatmul.msk.f32.vlgmr.msrb.gmra.mxu2 %vm1046_vm1, %v4691_v40  ;;  %v3064_v31 = vsel %vm1227_vm13, %v5021_v55, %v5022_v48  ;;  %4693 = vmatmul.msk.f32.vlgmr.msrb.gmra.mxu3 %vm1046_vm1, %v4691_v40 }
 0x894   : > { %3086 = vmatpush.msra.mxu0 %v3064_v31 }
 0x895   : > { %4695 = vmatmul.msk.f32.vlgmr.msra.gmra.mxu0 %vm1046_vm1, %v4694_v35 }
 0x896   : > { %v5015_v49 = vpop.permute.xlu1 %5014 }
 0x897   : > { %v5017_v27 = vunpack.i.h.bf16 %v5015_v49  ;;  %v5016_v13 = vunpack.i.l.bf16 %v5015_v49 }
 0x898   : > { %v3249_v14 = vpop.permute.xlu0 %3248 }
 0x899   : > { %v3251_v7 = vsel %vm1021_vm10, %v5032_v24, %v3249_v14  ;;  %4690 = vmatmul.msk.f32.vlgmr.msrb.gmra.mxu1 %vm1046_vm1, %v4688_v61  ;;  %v3127_v21 = vsel %vm1154_vm11, %v5016_v13, %v5017_v27  ;;  %v3128_v62 = vsel %vm1154_vm11, %v5017_v27, %v6077_v57 }
 0x89a   : > { %3149 = vmatpush.msra.mxu2 %v3127_v21  ;;  %3169 = vmatpush.msra.mxu3 %v3128_v62 }
 0x89b   : > { %4698 = vmatmul.msk.f32.vlgmr.msra.gmra.mxu2 %vm1046_vm1, %v4697_v20  ;;  %4699 = vmatmul.msk.f32.vlgmr.msra.gmra.mxu3 %vm1046_vm1, %v4697_v20 }
 0x89c   : > { %3292 = vmatpush.msrb.mxu3 %v3251_v7  ;;  %3272 = vmatpush.msrb.mxu2 %v3250_v36 }
 0x89e   : > { %v3063_v47 = vpop.permute.xlu1 %3062 }
 0x89f   : > { %v3065_v25 = vsel %vm1227_vm13, %v5022_v48, %v3063_v47 }
 0x8a0   : > { %3106 = vmatpush.msra.mxu1 %v3065_v25 }
 0x8a1   : > { %4696 = vmatmul.msk.f32.vlgmr.msra.gmra.mxu1 %vm1046_vm1, %v4694_v35 }
 0x8a3   : > { %4704 = vmatmul.msk.f32.vlgmr.msrb.gmra.mxu2 %vm1046_vm1, %v4703_v22  ;;  %4705 = vmatmul.msk.f32.vlgmr.msrb.gmra.mxu3 %vm1046_vm1, %v4703_v22 }
 0x8a6   : > { %v5025_v57 = vpop.permute.xlu1 %5024 }
 0x8a7   : > { %v5027_v28 = vunpack.i.h.bf16 %v5025_v57  ;;  %v5026_v32 = vunpack.i.l.bf16 %v5025_v57 }
 0x8a9   : > { %v3188_v54 = vsel %vm1499_vm3, %v5027_v28, %v3186_v26  ;;  %v3187_v17 = vsel %vm1499_vm3, %v5026_v32, %v5027_v28 }
 0x8aa   : > { %3209 = vmatpush.msrb.mxu0 %v3187_v17  ;;  %3229 = vmatpush.msrb.mxu1 %v3188_v54  ;;  %v3304_v54 = vpop.permute.xlu0 %3303 }
 0x8ab   : > { %4701 = vmatmul.msk.f32.vlgmr.msrb.gmra.mxu0 %vm1046_vm1, %v4700_v37  ;;  %4702 = vmatmul.msk.f32.vlgmr.msrb.gmra.mxu1 %vm1046_vm1, %v4700_v37 }
 0x902   : > { %v2851_v12 = vpop.f32.mrf.mxu0 }
 0x906   : > { %v2795_v58 = vpop.f32.mrf.mxu2  ;;  %v2815_v45 = vpop.f32.mrf.mxu3 }
 0x907   : > { %v2852_v55 = vadd.f32 %v2851_v12, %v2795_v58 }
 0x90a   : > { %v2975_v39 = vpop.f32.mrf.mxu0 }
 0x90e   : > { %v2871_v60 = vpop.f32.mrf.mxu1  ;;  %v2912_v61 = vpop.f32.mrf.mxu2 }
 0x90f   : > { %v2932_v43 = vpop.f32.mrf.mxu3  ;;  %v2872_v51 = vadd.f32 %v2871_v60, %v2815_v45  ;;  %v2935_v31 = vadd.f32 %v2912_v61, %v2852_v55 }
 0x911   : > { %v2936_v35 = vadd.f32 %v2932_v43, %v2872_v51  ;;  %v2998_v49 = vadd.f32 %v2975_v39, %v2935_v31  ;;  %v3326_v31 = vpop.permute.xlu0 %3325 }
 0x912   : > { %v3088_v27 = vpop.f32.mrf.mxu0 }
 0x916   : > { %v2995_v38 = vpop.f32.mrf.mxu1  ;;  %v3022_v40 = vpop.f32.mrf.mxu2 }
 0x917   : > { %v3042_v48 = vpop.f32.mrf.mxu3  ;;  %v2999_v18 = vadd.f32 %v2995_v38, %v2936_v35  ;;  %v3045_v14 = vadd.f32 %v3022_v40, %v2998_v49 }
 0x919   : > { %v3046_v20 = vadd.f32 %v3042_v48, %v2999_v18  ;;  %v3111_v21 = vadd.f32 %v3088_v27, %v3045_v14 }
 0x91e   : > { %v3151_v24 = vpop.f32.mrf.mxu2  ;;  %v3108_v13 = vpop.f32.mrf.mxu1 }
 0x91f   : > { %v3171_v46 = vpop.f32.mrf.mxu3  ;;  %v3112_v7 = vadd.f32 %v3108_v13, %v3046_v20  ;;  %v3174_v62 = vadd.f32 %v3151_v24, %v3111_v21  ;;  %v4708_v13 = vld [vmem:[%s5445_s18 + $0x128] sm:$0xff] }
 0x921   : > { %v3175_v36 = vadd.f32 %v3171_v46, %v3112_v7 }
 0x926   : > { %v3274_v47 = vpop.f32.mrf.mxu2 }
 0x927   : > { %v3294_v25 = vpop.f32.mrf.mxu3 }
 0x928   : > { %v3211_v22 = vpop.f32.mrf.mxu0  ;;  %v3231_v57 = vpop.f32.mrf.mxu1 }
 0x929   : > { %v3234_v26 = vadd.f32 %v3211_v22, %v3174_v62  ;;  %v3235_v28 = vadd.f32 %v3231_v57, %v3175_v36  ;;  %v4716_v62 = vld [vmem:[%s5445_s18 + $0x138] sm:$0xff] }
 0x92b   : > { %v3297_v32 = vadd.f32 %v3274_v47, %v3234_v26  ;;  %v3298_v37 = vadd.f32 %v3294_v25, %v3235_v28 }
 0x92d   : > { %v3306_v17 = vadd.f32 %v3304_v54, %v3297_v32  ;;  %v3307_v58 = vadd.f32 %v3304_v54, %v3298_v37  ;;  %v4713_v37 = vld [vmem:[%s5445_s18 + $0x130] sm:$0xff] }
 0x92f   : > { %v6125_v45 = vmax.f32 %v3306_v17, 0.0  ;;  %v6127_v12 = vmax.f32 %v3307_v58, 0.0 }
 0x931   : > { %3310 = vst [vmem:[#allocation2 + $0x8] sm:$0xff] %v6125_v45  ;;  %v5033_v60 = vpack.i.bf16 %v6127_v12, %v6125_v45  ;;  %v3498_v61 = vmul.f32 %v6125_v45, %v5692_v56  ;;  %v3499_v43 = vmul.f32 %v6127_v12, %v5681_v53  ;;  %v3316_v39 = vmul.f32 %v6125_v45, %v5628_v33 }
 0x932   : > { %3311 = vst [vmem:[#allocation2 + $0x10] sm:$0xff] %v6127_v12  ;;  %v3317_v38 = vmul.f32 %v6127_v12, %v5619_v30  ;;  %v3611_v56 = vmul.f32 %v6127_v12, %v5679_v52  ;;  %v3435_v53 = vmul.f32 %v6125_v45, %v5655_v44  ;;  %v3436_v33 = vmul.f32 %v6127_v12, %v5646_v41 }
 0x933   : > { %5034 = vrot.lane.b32.xlu1 %v5033_v60, %s5233_s21  ;;  %v5048_v40 = vpack.i.bf16 %v3499_v43, %v3498_v61  ;;  %v5058_v52 = vpack.i.bf16 %v6027_v34, %v6127_v12  ;;  %v3797_v41 = vmul.f32 %v6127_v12, %v5739_v19  ;;  %v3674_v44 = vmul.f32 %v6127_v12, %v5713_v11  ;;  %v4734_v11 = vld [vmem:[%s5450_s0 + $0x20] sm:$0xff]  ;;  %v4722_v60 = vld [vmem:[%s5445_s18 + $0x148] sm:$0xff] }
 0x934   : > { %v5038_v51 = vpack.i.bf16 %v3317_v38, %v3316_v39  ;;  %v5053_v30 = vpack.i.bf16 %v6065_v59, %v3611_v56  ;;  %v5043_v48 = vpack.i.bf16 %v3436_v33, %v3435_v53  ;;  %v3673_v19 = vmul.f32 %v6125_v45, %v5706_v63  ;;  %v4707_v59 = vld [vmem:[%s5445_s18 + $0x120] sm:$0xff]  ;;  %v4728_v53 = vld [vmem:[%s5445_s18 + $0x158] sm:$0xff] }
 0x935   : > { %5049 = vrot.lane.b32.xlu0 %v5048_v40, %s5242_s20  ;;  %v5063_v34 = vpack.i.bf16 %v6031_v42, %v3674_v44  ;;  %v4719_v40 = vld [vmem:[%s5445_s18 + $0x140] sm:$0xff]  ;;  %v4725_v44 = vld [vmem:[%s5445_s18 + $0x150] sm:$0xff] }
 0x936   : > { %5039 = vrot.lane.b32.xlu2 %v5038_v51, %s5243_s19 }
 0x93b   : > { %3381 = vrot.lane.b32.xlu1 %v6003_v23, %s5243_s19  ;;  %v3610_v23 = vmul.f32 %v6125_v45, %v5673_v50  ;;  %v3796_v50 = vmul.f32 %v6125_v45, %v5732_v16 }
 0x93d   : > { %5054 = vrot.lane.b32.xlu0 %v5053_v30, %s5240_s14 }
 0x93e   : > { %5044 = vrot.lane.b32.xlu2 %v5043_v48, %s5244_s12 }
 0x943   : > { %3442 = vrot.lane.b32.xlu1 %v6015_v29, %s5244_s12  ;;  %v5068_v29 = vpack.i.bf16 %v6055_v10, %v3797_v41 }
 0x945   : > { %5059 = vrot.lane.b32.xlu0 %v5058_v52, %s5238_s17 }
 0x946   : > { %3505 = vrot.lane.b32.xlu2 %v6046_v15, %s5242_s20 }
 0x94b   : > { %3618 = vrot.lane.b32.xlu1 %v3610_v23, %s5240_s14 }
 0x94d   : > { %5069 = vrot.lane.b32.xlu0 %v5068_v29, %s5239_s23 }
 0x94e   : > { %5064 = vrot.lane.b32.xlu2 %v5063_v34, %s5241_s27 }
 0x953   : > { %3681 = vrot.lane.b32.xlu1 %v3673_v19, %s5241_s27 }
 0x956   : > { %3741 = vrot.lane.b32.xlu2 %v6125_v45, %s5238_s17 }
 0x95b   : > { %3804 = vrot.lane.b32.xlu1 %v3796_v50, %s5239_s23 }
 0x95e   : > { %3863 = vperm.xlu2 %4910, %v4734_v11   ;;  %v4731_v11 = vld [vmem:[%s5445_s18 + $0x160] sm:$0xff] }
 0x990   : > { %v5040_v42 = vpop.permute.xlu2 %5039 }
 0x991   : > { %v5042_v15 = vunpack.i.h.bf16 %v5040_v42  ;;  %v5041_v10 = vunpack.i.l.bf16 %v5040_v42 }
 0x993   : > { %v3388_v55 = vsel %vm1099_vm15, %v5041_v10, %v5042_v15 }
 0x994   : > { %3429 = vmatpush.msra.mxu3 %v3388_v55 }
 0x995   : > { %4712 = vmatmul.msk.f32.vlgmr.msra.gmra.mxu3 %vm1046_vm1, %v4707_v59 }
 0x998   : > { %v5045_v63 = vpop.permute.xlu2 %5044 }
 0x999   : > { %v5047_v16 = vunpack.i.h.bf16 %v5045_v63  ;;  %v5046_v49 = vunpack.i.l.bf16 %v5045_v63 }
 0x99b   : > { %v3449_v36 = vsel %vm1173_vm14, %v5046_v49, %v5047_v16 }
 0x9a0   : > { %v3506_v35 = vpop.permute.xlu2 %3505 }
 0x9a5   : > { %v5035_v18 = vpop.permute.xlu1 %5034 }
 0x9a6   : > { %v5037_v24 = vunpack.i.h.bf16 %v5035_v18  ;;  %v5036_v46 = vunpack.i.l.bf16 %v5035_v18 }
 0x9a7   : > { %v5050_v27 = vpop.permute.xlu0 %5049 }
 0x9a8   : > { %v5052_v14 = vunpack.i.h.bf16 %v5050_v27  ;;  %v5051_v20 = vunpack.i.l.bf16 %v5050_v27  ;;  %v3331_v7 = vsel %vm1041_vm0, %v3326_v31, %v5036_v46  ;;  %v3332_v21 = vsel %vm1041_vm0, %v5036_v46, %v5037_v24  ;;  %v5065_v25 = vpop.permute.xlu2 %5064 }
 0x9a9   : > { %3353 = vmatpush.msra.mxu0 %v3331_v7  ;;  %3373 = vmatpush.msra.mxu1 %v3332_v21  ;;  %v5067_v57 = vunpack.i.h.bf16 %v5065_v25  ;;  %v5066_v26 = vunpack.i.l.bf16 %v5065_v25 }
 0x9aa   : > { %4710 = vmatmul.msk.f32.vlgmr.msra.gmra.mxu1 %vm1046_vm1, %v4708_v13  ;;  %v3512_v47 = vsel %vm1246_vm12, %v5051_v20, %v5052_v14  ;;  %4709 = vmatmul.msk.f32.vlgmr.msra.gmra.mxu0 %vm1046_vm1, %v4708_v13  ;;  %v3511_v58 = vsel %vm1246_vm12, %v3506_v35, %v5051_v20 }
 0x9ab   : > { %3490 = vmatpush.msrb.mxu1 %v3449_v36  ;;  %3553 = vmatpush.msrb.mxu3 %v3512_v47 }
 0x9ac   : > { %4718 = vmatmul.msk.f32.vlgmr.msrb.gmra.mxu3 %vm1046_vm1, %v4716_v62 }
 0x9ad   : > { %3600 = vmatpush.msra.mxu1 %v6127_v12  ;;  %v3382_v22 = vpop.permute.xlu1 %3381  ;;  %v3688_v12 = vsel %vm1154_vm11, %v5066_v26, %v5067_v57 }
 0x9ae   : > { %v3387_v28 = vsel %vm1099_vm15, %v3382_v22, %v5041_v10 }
 0x9af   : > { %v5055_v32 = vpop.permute.xlu0 %5054  ;;  %3409 = vmatpush.msra.mxu2 %v3387_v28 }
 0x9b0   : > { %v5057_v54 = vunpack.i.h.bf16 %v5055_v32  ;;  %v5056_v17 = vunpack.i.l.bf16 %v5055_v32  ;;  %4711 = vmatmul.msk.f32.vlgmr.msra.gmra.mxu2 %vm1046_vm1, %v4707_v59  ;;  %v3742_v52 = vpop.permute.xlu2 %3741 }
 0x9b1   : > { %3533 = vmatpush.msrb.mxu2 %v3511_v58 }
 0x9b2   : > { %4715 = vmatmul.msk.f32.vlgmr.msrb.gmra.mxu1 %vm1046_vm1, %v4713_v37  ;;  %v3625_v61 = vsel %vm1227_vm13, %v5056_v17, %v5057_v54 }
 0x9b3   : > { %3729 = vmatpush.msrb.mxu1 %v3688_v12  ;;  %3666 = vmatpush.msra.mxu3 %v3625_v61  ;;  %v3964_v61 = vld [vmem:[#allocation3 + $0x18] sm:$0x1] }
 0x9b4   : > { %4724 = vmatmul.msk.f32.vlgmr.msra.gmra.mxu3 %vm1046_vm1, %v4722_v60 }
 0x9b5   : > { %v3443_v43 = vpop.permute.xlu1 %3442 }
 0x9b6   : > { %v3448_v39 = vsel %vm1173_vm14, %v3443_v43, %v5046_v49 }
 0x9b7   : > { %v5060_v38 = vpop.permute.xlu0 %5059  ;;  %3470 = vmatpush.msrb.mxu0 %v3448_v39 }
 0x9b8   : > { %v5062_v51 = vunpack.i.h.bf16 %v5060_v38  ;;  %v5061_v56 = vunpack.i.l.bf16 %v5060_v38  ;;  %4714 = vmatmul.msk.f32.vlgmr.msrb.gmra.mxu0 %vm1046_vm1, %v4713_v37  ;;  %4717 = vmatmul.msk.f32.vlgmr.msrb.gmra.mxu2 %vm1046_vm1, %v4716_v62  ;;  %v3864_v54 = vpop.permute.xlu2 %3863 }
 0x9b9   : > { %3580 = vmatpush.msra.mxu0 %v6125_v45 }
 0x9ba   : > { %4721 = vmatmul.msk.f32.vlgmr.msra.gmra.mxu1 %vm1046_vm1, %v4719_v40  ;;  %v3748_v33 = vsel %vm1499_vm3, %v5061_v56, %v5062_v51  ;;  %v3747_v29 = vsel %vm1499_vm3, %v3742_v52, %v5061_v56 }
 0x9bb   : > { %3789 = vmatpush.msrb.mxu3 %v3748_v33 }
 0x9bc   : > { %4730 = vmatmul.msk.f32.vlgmr.msrb.gmra.mxu3 %vm1046_vm1, %v4728_v53 }
 0x9bd   : > { %v3619_v30 = vpop.permute.xlu1 %3618  ;;  %4126 = vmatpush.msra.mxu3 %v5439_v9 }
 0x9be   : > { %v3624_v48 = vsel %vm1227_vm13, %v3619_v30, %v5056_v17  ;;  %v3961_v17 = vld [vmem:[#allocation3 + $0x8] sm:$0x1]  ;;  %v3871_v30 = vld [vmem:[#allocation3 + $0x10] sm:$0x1] }
 0x9bf   : > { %v5070_v41 = vpop.permute.xlu0 %5069  ;;  %3646 = vmatpush.msra.mxu2 %v3624_v48  ;;  %4127 = vmatpush.msra.mxu3 %v5434_v8 }
 0x9c0   : > { %v5072_v45 = vunpack.i.h.bf16 %v5070_v41  ;;  %v5071_v23 = vunpack.i.l.bf16 %v5070_v41  ;;  %4720 = vmatmul.msk.f32.vlgmr.msra.gmra.mxu0 %vm1046_vm1, %v4719_v40  ;;  %4723 = vmatmul.msk.f32.vlgmr.msra.gmra.mxu2 %vm1046_vm1, %v4722_v60 }
 0x9c1   : > { %3769 = vmatpush.msrb.mxu2 %v3747_v29  ;;  %v4006_v29 = vld [vmem:[#allocation3 + $0xc] sm:$0x1] }
 0x9c2   : > { %4727 = vmatmul.msk.f32.vlgmr.msrb.gmra.mxu1 %vm1046_vm1, %v4725_v44  ;;  %v3811_v34 = vsel %vm1021_vm10, %v5071_v23, %v5072_v45 }
 0x9c3   : > { %3852 = vmatpush.msra.mxu1 %v3811_v34 }
 0x9c5   : > { %4258 = vmatpush.msrb.mxu1 %v5439_v9  ;;  %v3682_v19 = vpop.permute.xlu1 %3681 }
 0x9c6   : > { %v3687_v50 = vsel %vm1154_vm11, %v3682_v19, %v5066_v26 }
 0x9c7   : > { %4259 = vmatpush.msrb.mxu1 %v5434_v8  ;;  %3709 = vmatpush.msrb.mxu0 %v3687_v50  ;;  %v4042_v50 = vld [vmem:[#allocation3 + $0xf] sm:$0x1] }
 0x9c8   : > { %4726 = vmatmul.msk.f32.vlgmr.msrb.gmra.mxu0 %vm1046_vm1, %v4725_v44  ;;  %4729 = vmatmul.msk.f32.vlgmr.msrb.gmra.mxu2 %vm1046_vm1, %v4728_v53  ;;  %v3868_v53 = vld [vmem:[#allocation3] sm:$0x1]  ;;  %v3970_v44 = vld [vmem:[#allocation3 + $0x9] sm:$0x1] }
 0x9ca   : > { %4733 = vmatmul.msk.f32.vlgmr.msra.gmra.mxu1 %vm1046_vm1, %v4731_v11 }
 0x9cd   : > { %v3805_v42 = vpop.permute.xlu1 %3804 }
 0x9ce   : > { %v3810_v15 = vsel %vm1021_vm10, %v3805_v42, %v5071_v23 }
 0x9cf   : > { %3832 = vmatpush.msra.mxu0 %v3810_v15  ;;  %v3994_v15 = vld [vmem:[#allocation3 + $0xb] sm:$0x1] }
 0x9d0   : > { %4732 = vmatmul.msk.f32.vlgmr.msra.gmra.mxu0 %vm1046_vm1, %v4731_v11 }
 0xa18   : > { %v3431_v10 = vpop.f32.mrf.mxu3 }
 0xa27   : > { %v3375_v9 = vpop.f32.mrf.mxu1  ;;  %v3355_v59 = vpop.f32.mrf.mxu0 }
 0xa28   : > { %v3432_v31 = vadd.f32 %v3431_v10, %v3375_v9  ;;  %v3982_v9 = vld [vmem:[#allocation3 + $0xa] sm:$0x1]  ;;  %v3901_v10 = vld [vmem:[#allocation3 + $0x3] sm:$0x1] }
 0xa2f   : > { %v3492_v55 = vpop.f32.mrf.mxu1  ;;  %v3555_v63 = vpop.f32.mrf.mxu3 }
 0xa30   : > { %v3496_v18 = vadd.f32 %v3492_v55, %v3432_v31 }
 0xa32   : > { %v3559_v46 = vadd.f32 %v3555_v63, %v3496_v18  ;;  %v4030_v18 = vld [vmem:[#allocation3 + $0xe] sm:$0x1] }
 0xa33   : > { %v3411_v8 = vpop.f32.mrf.mxu2 }
 0xa34   : > { %v3412_v49 = vadd.f32 %v3411_v8, %v3355_v59 }
 0xa35   : > { %v3472_v35 = vpop.f32.mrf.mxu0 }
 0xa36   : > { %v3495_v13 = vadd.f32 %v3472_v35, %v3412_v49  ;;  %v4000_v49 = vld [vmem:[#allocation3 + $0x1b] sm:$0x1] }
 0xa37   : > { %v3602_v16 = vpop.f32.mrf.mxu1  ;;  %v3668_v24 = vpop.f32.mrf.mxu3 }
 0xa38   : > { %v3606_v14 = vadd.f32 %v3602_v16, %v3559_v46  ;;  %v4018_v16 = vld [vmem:[#allocation3 + $0xd] sm:$0x1] }
 0xa3a   : > { %v3672_v21 = vadd.f32 %v3668_v24, %v3606_v14 }
 0xa3b   : > { %v3535_v27 = vpop.f32.mrf.mxu2 }
 0xa3c   : > { %v3558_v62 = vadd.f32 %v3535_v27, %v3495_v13 }
 0xa3d   : > { %v3582_v20 = vpop.f32.mrf.mxu0 }
 0xa3e   : > { %v3605_v22 = vadd.f32 %v3582_v20, %v3558_v62  ;;  %v4036_v62 = vld [vmem:[#allocation3 + $0x1e] sm:$0x1] }
 0xa3f   : > { %v3731_v7 = vpop.f32.mrf.mxu1  ;;  %v3791_v47 = vpop.f32.mrf.mxu3 }
 0xa40   : > { %v3735_v36 = vadd.f32 %v3731_v7, %v3672_v21  ;;  %v3889_v7 = vld [vmem:[#allocation3 + $0x2] sm:$0x1]  ;;  %v3877_v21 = vld [vmem:[#allocation3 + $0x1] sm:$0x1] }
 0xa42   : > { %v3795_v26 = vadd.f32 %v3791_v47, %v3735_v36 }
 0xa43   : > { %v3648_v25 = vpop.f32.mrf.mxu2 }
 0xa44   : > { %v3671_v28 = vadd.f32 %v3648_v25, %v3605_v22 }
 0xa45   : > { %v3711_v57 = vpop.f32.mrf.mxu0 }
 0xa46   : > { %v3734_v58 = vadd.f32 %v3711_v57, %v3671_v28  ;;  %v3988_v28 = vld [vmem:[#allocation3 + $0x1a] sm:$0x1] }
 0xa47   : > { %v3854_v32 = vpop.f32.mrf.mxu1 }
 0xa48   : > { %v3858_v37 = vadd.f32 %v3854_v32, %v3795_v26  ;;  %v3913_v32 = vld [vmem:[#allocation3 + $0x4] sm:$0x1] }
 0xa4a   : > { %v3867_v60 = vadd.f32 %v3864_v54, %v3858_v37  ;;  %v3895_v37 = vld [vmem:[#allocation3 + $0x12] sm:$0x1] }
 0xa4b   : > { %v3771_v12 = vpop.f32.mrf.mxu2 }
 0xa4c   : > { %v3794_v43 = vadd.f32 %v3771_v12, %v3734_v58  ;;  %3995 = vrot.lane.b32.xlu1 %v3867_v60, %s5236_s30  ;;  %3983 = vrot.lane.b32.xlu0 %v3867_v60, %s5237_s16  ;;  %v3966_v39 = vrot.slane %v3867_v60, 1  ;;  %v3962_v38 = vadd.f32 %v3961_v17, %v3867_v60 }
 0xa4d   : > { %3971 = vrot.lane.b32.xlu2 %v3867_v60, %s5238_s17  ;;  %v3834_v40 = vpop.f32.mrf.mxu0 }
 0xa4e   : > { %v3857_v51 = vadd.f32 %v3834_v40, %v3794_v43  ;;  %v3968_v56 = vadd.f32 %v3966_v39, %v3964_v61  ;;  %3963 = vst.msk [vmem:[#allocation3 + $0x8] sm:$0x1] %vm825_vm2, %v3962_v38  ;;  %v4024_v43 = vld [vmem:[#allocation3 + $0x1d] sm:$0x1]  ;;  %v3931_v38 = vld [vmem:[#allocation3 + $0x15] sm:$0x1] }
 0xa50   : > { %v3866_v33 = vadd.f32 %v3864_v54, %v3857_v51  ;;  %3969 = vst.msk [vmem:[#allocation3 + $0x18] sm:$0x1] %vm825_vm2, %v3968_v56 }
 0xa52   : > { %v3873_v48 = vrot.slane %v3866_v33, 1  ;;  %v3869_v52 = vadd.f32 %v3868_v53, %v3866_v33 }
 0xa54   : > { %4031 = vrot.lane.b32.xlu1 %v3867_v60, %s5232_s10  ;;  %4019 = vrot.lane.b32.xlu0 %v3867_v60, %s5234_s13  ;;  %v3875_v41 = vadd.f32 %v3873_v48, %v3871_v30  ;;  %3870 = vst.msk [vmem:[#allocation3] sm:$0x1] %vm825_vm2, %v3869_v52  ;;  %v3883_v52 = vld [vmem:[#allocation3 + $0x11] sm:$0x1] }
 0xa55   : > { %4007 = vrot.lane.b32.xlu2 %v3867_v60, %s5235_s26 }
 0xa56   : > { %3876 = vst.msk [vmem:[#allocation3 + $0x10] sm:$0x1] %vm825_vm2, %v3875_v41  ;;  %v3937_v41 = vld [vmem:[#allocation3 + $0x6] sm:$0x1] }
 0xa5c   : > { %3890 = vrot.lane.b32.xlu1 %v3866_v33, %s5237_s16  ;;  %3878 = vrot.lane.b32.xlu0 %v3866_v33, %s5238_s17 }
 0xa5d   : > { %4043 = vrot.lane.b32.xlu2 %v3867_v60, %s5233_s21 }
 0xa64   : > { %3989 = vrot.lane.b32.xlu1 %v3966_v39, %s5237_s16  ;;  %3914 = vrot.lane.b32.xlu0 %v3866_v33, %s5235_s26 }
 0xa65   : > { %3902 = vrot.lane.b32.xlu2 %v3866_v33, %s5236_s30 }
 0xa6c   : > { %4025 = vrot.lane.b32.xlu1 %v3966_v39, %s5234_s13  ;;  %3977 = vrot.lane.b32.xlu0 %v3966_v39, %s5238_s17 }
 0xa6d   : > { %4001 = vrot.lane.b32.xlu2 %v3966_v39, %s5236_s30 }
 0xa74   : > { %4013 = vrot.lane.b32.xlu0 %v3966_v39, %s5235_s26  ;;  %3884 = vrot.lane.b32.xlu1 %v3873_v48, %s5238_s17 }
 0xa75   : > { %4037 = vrot.lane.b32.xlu2 %v3966_v39, %s5232_s10 }
 0xa7c   : > { %4049 = vrot.lane.b32.xlu0 %v3966_v39, %s5233_s21  ;;  %3920 = vrot.lane.b32.xlu1 %v3873_v48, %s5235_s26  ;;  %v3976_v39 = vld [vmem:[#allocation3 + $0x19] sm:$0x1] }
 0xa7d   : > { %3896 = vrot.lane.b32.xlu2 %v3873_v48, %s5237_s16 }
 0xa84   : > { %3908 = vrot.lane.b32.xlu0 %v3873_v48, %s5236_s30  ;;  %3956 = vrot.lane.b32.xlu1 %v3873_v48, %s5233_s21 }
 0xa85   : > { %3932 = vrot.lane.b32.xlu2 %v3873_v48, %s5234_s13 }
 0xa8c   : > { %3944 = vrot.lane.b32.xlu0 %v3873_v48, %s5232_s10  ;;  %3926 = vrot.lane.b32.xlu1 %v3866_v33, %s5234_s13  ;;  %v4012_v48 = vld [vmem:[#allocation3 + $0x1c] sm:$0x1] }
 0xa8d   : > { %3938 = vrot.lane.b32.xlu2 %v3866_v33, %s5232_s10 }
 0xa94   : > { %3950 = vrot.lane.b32.xlu0 %v3866_v33, %s5233_s21 }
 0xaa7   : > { %v3972_v45 = vpop.permute.xlu2 %3971 }
 0xaa8   : > { %v3974_v23 = vadd.f32 %v3972_v45, %v3970_v44 }
 0xaaa   : > { %3975 = vst.msk [vmem:[#allocation3 + $0x9] sm:$0x1] %vm825_vm2, %v3974_v23 }
 0xaaf   : > { %v4008_v34 = vpop.permute.xlu2 %4007 }
 0xab0   : > { %v4010_v19 = vadd.f32 %v4008_v34, %v4006_v29 }
 0xab2   : > { %4011 = vst.msk [vmem:[#allocation3 + $0xc] sm:$0x1] %vm825_vm2, %v4010_v19 }
 0xab7   : > { %v4044_v11 = vpop.permute.xlu2 %4043 }
 0xab8   : > { %v4046_v42 = vadd.f32 %v4044_v11, %v4042_v50  ;;  %v4048_v50 = vld [vmem:[#allocation3 + $0x1f] sm:$0x1]  ;;  %v3919_v11 = vld [vmem:[#allocation3 + $0x14] sm:$0x1] }
 0xaba   : > { %4047 = vst.msk [vmem:[#allocation3 + $0xf] sm:$0x1] %vm825_vm2, %v4046_v42 }
 0xabe   : > { %v3996_v59 = vpop.permute.xlu1 %3995  ;;  %v3984_v55 = vpop.permute.xlu0 %3983 }
 0xabf   : > { %v3998_v63 = vadd.f32 %v3996_v59, %v3994_v15  ;;  %v3986_v8 = vadd.f32 %v3984_v55, %v3982_v9  ;;  %v3903_v31 = vpop.permute.xlu2 %3902  ;;  %v3907_v59 = vld [vmem:[#allocation3 + $0x13] sm:$0x1]  ;;  %v3955_v55 = vld [vmem:[#allocation3 + $0x17] sm:$0x1] }
 0xac0   : > { %v3905_v35 = vadd.f32 %v3903_v31, %v3901_v10 }
 0xac1   : > { %3999 = vst.msk [vmem:[#allocation3 + $0xb] sm:$0x1] %vm825_vm2, %v3998_v63 }
 0xac2   : > { %3987 = vst.msk [vmem:[#allocation3 + $0xa] sm:$0x1] %vm825_vm2, %v3986_v8 }
 0xac3   : > { %3906 = vst.msk [vmem:[#allocation3 + $0x3] sm:$0x1] %vm825_vm2, %v3905_v35 }
 0xac6   : > { %v4032_v24 = vpop.permute.xlu1 %4031  ;;  %v4020_v46 = vpop.permute.xlu0 %4019 }
 0xac7   : > { %v4034_v27 = vadd.f32 %v4032_v24, %v4030_v18  ;;  %v4022_v13 = vadd.f32 %v4020_v46, %v4018_v16  ;;  %v4002_v14 = vpop.permute.xlu2 %4001  ;;  %v3943_v16 = vld [vmem:[#allocation3 + $0x16] sm:$0x1] }
 0xac8   : > { %v4004_v20 = vadd.f32 %v4002_v14, %v4000_v49  ;;  %v3925_v49 = vld [vmem:[#allocation3 + $0x5] sm:$0x1]  ;;  %v3949_v14 = vld [vmem:[#allocation3 + $0x7] sm:$0x1] }
 0xac9   : > { %4035 = vst.msk [vmem:[#allocation3 + $0xe] sm:$0x1] %vm825_vm2, %v4034_v27 }
 0xaca   : > { %4023 = vst.msk [vmem:[#allocation3 + $0xd] sm:$0x1] %vm825_vm2, %v4022_v13 }
 0xacb   : > { %4005 = vst.msk [vmem:[#allocation3 + $0x1b] sm:$0x1] %vm825_vm2, %v4004_v20 }
 0xace   : > { %v3891_v36 = vpop.permute.xlu1 %3890  ;;  %v3879_v47 = vpop.permute.xlu0 %3878 }
 0xacf   : > { %v4038_v25 = vpop.permute.xlu2 %4037  ;;  %v3893_v22 = vadd.f32 %v3891_v36, %v3889_v7  ;;  %v3881_v57 = vadd.f32 %v3879_v47, %v3877_v21 }
 0xad0   : > { %v4040_v26 = vadd.f32 %v4038_v25, %v4036_v62 }
 0xad1   : > { %3894 = vst.msk [vmem:[#allocation3 + $0x2] sm:$0x1] %vm825_vm2, %v3893_v22  ;;  %v4055_v62 = vld [vmem:[#allocation3 + $0x8] sm:$0xff] }
 0xad2   : > { %4041 = vst.msk [vmem:[#allocation3 + $0x1e] sm:$0x1] %vm825_vm2, %v4040_v26 }
 0xad3   : > { %3882 = vst.msk [vmem:[#allocation3 + $0x1] sm:$0x1] %vm825_vm2, %v3881_v57 }
 0xad6   : > { %v3990_v54 = vpop.permute.xlu1 %3989  ;;  %v3915_v17 = vpop.permute.xlu0 %3914 }
 0xad7   : > { %v3992_v58 = vadd.f32 %v3990_v54, %v3988_v28  ;;  %v3917_v60 = vadd.f32 %v3915_v17, %v3913_v32  ;;  %v3897_v12 = vpop.permute.xlu2 %3896  ;;  %v4169_v54 = vld [vmem:[#allocation5 + $0x10] sm:$0xff]  ;;  %v4170_v17 = vld [vmem:[#allocation5 + $0x18] sm:$0xff] }
 0xad8   : > { %v3899_v61 = vadd.f32 %v3897_v12, %v3895_v37  ;;  %v4182_v12 = vld [vmem:[#allocation4 + $0x18] sm:$0xff] }
 0xad9   : > { %3993 = vst.msk [vmem:[#allocation3 + $0x1a] sm:$0x1] %vm825_vm2, %v3992_v58  ;;  %v4168_v58 = vld [vmem:[#allocation5 + $0x8] sm:$0xff] }
 0xada   : > { %3918 = vst.msk [vmem:[#allocation3 + $0x4] sm:$0x1] %vm825_vm2, %v3917_v60 }
 0xadb   : > { %3900 = vst.msk [vmem:[#allocation3 + $0x12] sm:$0x1] %vm825_vm2, %v3899_v61  ;;  %v4173_v61 = vsub.f32 1.0, %v4169_v54 }
 0xade   : > { %v4026_v40 = vpop.permute.xlu1 %4025  ;;  %v3978_v51 = vpop.permute.xlu0 %3977 }
 0xadf   : > { %v4028_v56 = vadd.f32 %v4026_v40, %v4024_v43  ;;  %v3980_v53 = vadd.f32 %v3978_v51, %v3976_v39  ;;  %v3933_v33 = vpop.permute.xlu2 %3932  ;;  %v4174_v43 = vsub.f32 1.0, %v4170_v17  ;;  %v4181_v39 = vld [vmem:[#allocation4 + $0x10] sm:$0xff]  ;;  %v4172_v40 = vsub.f32 1.0, %v4168_v58 }
 0xae0   : > { %v3935_v30 = vadd.f32 %v3933_v33, %v3931_v38  ;;  %v4180_v33 = vld [vmem:[#allocation4 + $0x8] sm:$0xff] }
 0xae1   : > { %4029 = vst.msk [vmem:[#allocation3 + $0x1d] sm:$0x1] %vm825_vm2, %v4028_v56  ;;  %v4186_v56 = vmul.f32 %v4182_v12, %v4170_v17 }
 0xae2   : > { %3981 = vst.msk [vmem:[#allocation3 + $0x19] sm:$0x1] %vm825_vm2, %v3980_v53 }
 0xae3   : > { %3936 = vst.msk [vmem:[#allocation3 + $0x15] sm:$0x1] %vm825_vm2, %v3935_v30  ;;  %v4185_v30 = vmul.f32 %v4181_v39, %v4169_v54 }
 0xae6   : > { %v4014_v44 = vpop.permute.xlu0 %4013  ;;  %v3885_v45 = vpop.permute.xlu1 %3884 }
 0xae7   : > { %v4016_v23 = vadd.f32 %v4014_v44, %v4012_v48  ;;  %v3939_v29 = vpop.permute.xlu2 %3938  ;;  %v3887_v34 = vadd.f32 %v3885_v45, %v3883_v52  ;;  %v4184_v45 = vmul.f32 %v4180_v33, %v4168_v58 }
 0xae8   : > { %v3941_v19 = vadd.f32 %v3939_v29, %v3937_v41 }
 0xae9   : > { %4017 = vst.msk [vmem:[#allocation3 + $0x1c] sm:$0x1] %vm825_vm2, %v4016_v23  ;;  %v4167_v23 = vld [vmem:[#allocation5] sm:$0xff] }
 0xaea   : > { %3942 = vst.msk [vmem:[#allocation3 + $0x6] sm:$0x1] %vm825_vm2, %v3941_v19  ;;  %v4171_v19 = vsub.f32 1.0, %v4167_v23 }
 0xaeb   : > { %3888 = vst.msk [vmem:[#allocation3 + $0x11] sm:$0x1] %vm825_vm2, %v3887_v34  ;;  %v4179_v34 = vld [vmem:[#allocation4] sm:$0xff] }
 0xaee   : > { %v4050_v42 = vpop.permute.xlu0 %4049  ;;  %v3921_v15 = vpop.permute.xlu1 %3920 }
 0xaef   : > { %v4052_v9 = vadd.f32 %v4050_v42, %v4048_v50  ;;  %v3923_v10 = vadd.f32 %v3921_v15, %v3919_v11  ;;  %v4183_v15 = vmul.f32 %v4179_v34, %v4167_v23 }
 0xaf1   : > { %4053 = vst.msk [vmem:[#allocation3 + $0x1f] sm:$0x1] %vm825_vm2, %v4052_v9 }
 0xaf2   : > { %3924 = vst.msk [vmem:[#allocation3 + $0x14] sm:$0x1] %vm825_vm2, %v3923_v10 }
 0xaf6   : > { %v3909_v63 = vpop.permute.xlu0 %3908  ;;  %v3957_v8 = vpop.permute.xlu1 %3956 }
 0xaf7   : > { %v3911_v31 = vadd.f32 %v3909_v63, %v3907_v59  ;;  %v3959_v35 = vadd.f32 %v3957_v8, %v3955_v55  ;;  %v6484_v59 = vld [vmem:[#allocation21_spill] sm:$0xff] }
 0xaf8   : > { %v4057_v18 = vld [vmem:[#allocation3 + $0x18] sm:$0xff] }
 0xaf9   : > { %3912 = vst.msk [vmem:[#allocation3 + $0x13] sm:$0x1] %vm825_vm2, %v3911_v31  ;;  %4083 = vmatpush.msra.mxu2 %v4057_v18 }
 0xafa   : > { %3960 = vst.msk [vmem:[#allocation3 + $0x17] sm:$0x1] %vm825_vm2, %v3959_v35 }
 0xafe   : > { %v3945_v24 = vpop.permute.xlu0 %3944  ;;  %v3927_v46 = vpop.permute.xlu1 %3926 }
 0xaff   : > { %v3947_v27 = vadd.f32 %v3945_v24, %v3943_v16  ;;  %v3929_v13 = vadd.f32 %v3927_v46, %v3925_v49 }
 0xb01   : > { %3948 = vst.msk [vmem:[#allocation3 + $0x16] sm:$0x1] %vm825_vm2, %v3947_v27 }
 0xb02   : > { %3930 = vst.msk [vmem:[#allocation3 + $0x5] sm:$0x1] %vm825_vm2, %v3929_v13 }
 0xb06   : > { %v3951_v20 = vpop.permute.xlu0 %3950 }
 0xb07   : > { %v3953_v7 = vadd.f32 %v3951_v20, %v3949_v14 }
 0xb08   : > { %v4056_v21 = vld [vmem:[#allocation3 + $0x10] sm:$0xff] }
 0xb09   : > { %3954 = vst.msk [vmem:[#allocation3 + $0x7] sm:$0x1] %vm825_vm2, %v3953_v7  ;;  %4084 = vmatpush.msra.mxu2 %v4056_v21 }
 0xb0b   : > { %4085 = vmatpush.msra.mxu2 %v4055_v62 }
 0xb10   : > { %v4054_v36 = vld [vmem:[#allocation3] sm:$0xff] }
 0xb11   : > { %4086 = vmatpush.msra.mxu2 %v4054_v36 }
 0xb12   : > { %4735 = vmatmul.msk.f32.vlgmr.msra.gmra.mxu2 %vm4058_vm4, %v5391_v0 }
 0xb1a   : > { %4736 = vmatmul.msk.f32.gmra.mxu2 %vm4058_vm4, %v5396_v1 }
 0xb22   : > { %4737 = vmatmul.msk.f32.gmra.mxu2 %vm4058_vm4, %v5401_v2 }
 0xb2a   : > { %4738 = vmatmul.msk.f32.gmra.mxu2 %vm4058_vm4, %v5409_v3 }
 0xb95   : > { %v4088_v47 = vpop.f32.mrf.mxu2 }
 0xb96   : > { %4739 = vmatmul.msk.f32.vlgmr.msra.gmra.mxu3 %vm1041_vm0, %v4088_v47 }
 0xb9d   : > { %v4091_v25 = vpop.f32.mrf.mxu2 }
 0xb9e   : > { %4740 = vmatmul.msk.f32.gmra.mxu3 %vm1041_vm0, %v4091_v25 }
 0xba5   : > { %v4094_v22 = vpop.f32.mrf.mxu2 }
 0xba6   : > { %4741 = vmatmul.msk.f32.gmra.mxu3 %vm1041_vm0, %v4094_v22 }
 0xbad   : > { %v4097_v57 = vpop.f32.mrf.mxu2 }
 0xbae   : > { %4742 = vmatmul.msk.f32.gmra.mxu3 %vm1041_vm0, %v4097_v57 }
 0xc19   : > { %v4129_v0 = vpop.f32.mrf.mxu3 }
 0xc21   : > { %v4132_v1 = vpop.f32.mrf.mxu3 }
 0xc29   : > { %v4135_v26 = vpop.f32.mrf.mxu3 }
 0xc2a   : > { %4151 = vrot.lane.b32.xlu2 %v4135_v26, %s5233_s21 }
 0xc31   : > { %v4138_v2 = vpop.f32.mrf.mxu3 }
 0xc32   : > { %4153 = vrot.lane.b32.xlu1 %v4138_v2, %s5233_s21 }
 0xc3a   : > { %4145 = vrot.lane.b32.xlu1 %v4138_v2, %s5238_s17 }
 0xc84   : > { %v4152_v3 = vpop.permute.xlu2 %4151 }
 0xc85   : > { %v4157_v28 = vadd.f32 %v4152_v3, %v4129_v0 }
 0xc87   : > { %4161 = vrot.lane.b32.xlu2 %v4157_v28, %s5238_s17 }
 0xca4   : > { %v4154_v32 = vpop.permute.xlu1 %4153 }
 0xca5   : > { %v4158_v37 = vadd.f32 %v4154_v32, %v4132_v1 }
 0xca7   : > { %4163 = vrot.lane.b32.xlu0 %v4158_v37, %s5238_s17 }
 0xcac   : > { %v4146_v60 = vpop.permute.xlu1 %4145 }
 0xcad   : > { %v4150_v51 = vsub.f32 %v4132_v1, %v4146_v60 }
 0xcaf   : > { %4143 = vrot.lane.b32.xlu0 %v4135_v26, %s5238_s17  ;;  %v4176_v41 = vmul.f32 %v4172_v40, %v4150_v51 }
 0xcb1   : > { %v4188_v50 = vadd.f32 %v4184_v45, %v4176_v41 }
 0xce1   : > { %v4162_v38 = vpop.permute.xlu2 %4161 }
 0xce2   : > { %v4177_v48 = vmul.f32 %v4173_v61, %v4162_v38 }
 0xce4   : > { %v4189_v29 = vadd.f32 %v4185_v30, %v4177_v48 }
 0xd19   : > { %v4164_v53 = vpop.permute.xlu0 %4163 }
 0xd1a   : > { %v4178_v52 = vmul.f32 %v4174_v43, %v4164_v53 }
 0xd1c   : > { %v4190_v44 = vadd.f32 %v4186_v56, %v4178_v52 }
 0xd1e   : > { %4215 = vmatpush.msrb.mxu0 %v4190_v44 }
 0xd20   : > { %4216 = vmatpush.msrb.mxu0 %v4189_v29 }
 0xd21   : > { %v4144_v11 = vpop.permute.xlu0 %4143 }
 0xd22   : > { %v4149_v42 = vsub.f32 %v4129_v0, %v4144_v11  ;;  %4217 = vmatpush.msrb.mxu0 %v4188_v50 }
 0xd24   : > { %v4175_v9 = vmul.f32 %v4171_v19, %v4149_v42 }
 0xd26   : > { %v4187_v10 = vadd.f32 %v4183_v15, %v4175_v9 }
 0xd28   : > { %4218 = vmatpush.msrb.mxu0 %v4187_v10 }
 0xd29   : > { %4743 = vmatmul.msk.f32.vlgmr.msrb.gmra.mxu0 %vm4058_vm4, %v5414_v4 }
 0xd31   : > { %4744 = vmatmul.msk.f32.gmra.mxu0 %vm4058_vm4, %v5419_v5 }
 0xd39   : > { %4745 = vmatmul.msk.f32.gmra.mxu0 %vm4058_vm4, %v5424_v6 }
 0xd41   : > { %4746 = vmatmul.msk.f32.gmra.mxu0 %vm4058_vm4, %v6484_v59 }
 0xda6   : > { %v4220_v55 = vpop.f32.mrf.mxu0 }
 0xda7   : > { %4747 = vmatmul.msk.f32.vlgmr.msrb.gmra.mxu1 %vm1041_vm0, %v4220_v55 }
 0xdae   : > { %v4223_v63 = vpop.f32.mrf.mxu0 }
 0xdaf   : > { %4748 = vmatmul.msk.f32.gmra.mxu1 %vm1041_vm0, %v4223_v63 }
 0xdb6   : > { %v4226_v8 = vpop.f32.mrf.mxu0 }
 0xdb7   : > { %4749 = vmatmul.msk.f32.gmra.mxu1 %vm1041_vm0, %v4226_v8 }
 0xdbe   : > { %v4229_v31 = vpop.f32.mrf.mxu0 }
 0xdbf   : > { %4750 = vmatmul.msk.f32.gmra.mxu1 %vm1041_vm0, %v4229_v31 }
 0xe24   : > { %v4261_v4 = vpop.f32.mrf.mxu1 }
 0xe25   : > { %4285 = vrot.lane.b32.xlu0 %v4261_v4, %s5238_s17 }
 0xe2c   : > { %v4264_v5 = vpop.f32.mrf.mxu1 }
 0xe34   : > { %v4267_v6 = vpop.f32.mrf.mxu1 }
 0xe35   : > { %4275 = vrot.lane.b32.xlu1 %v4267_v6, %s5238_s17 }
 0xe3c   : > { %v4270_v35 = vpop.f32.mrf.mxu1 }
 0xe3d   : > { %4287 = vrot.lane.b32.xlu1 %v4264_v5, %s5238_s17  ;;  %4277 = vrot.lane.b32.xlu2 %v4270_v35, %s5238_s17 }
 0xe97   : > { %v4286_v18 = vpop.permute.xlu0 %4285  ;;  %v4278_v16 = vpop.permute.xlu2 %4277 }
 0xe98   : > { %v4291_v49 = vsub.f32 %v4267_v6, %v4286_v18  ;;  %v4282_v24 = vadd.f32 %v4278_v16, %v4264_v5 }
 0xe9a   : > { %4295 = vst.msk [vmem:[#allocation3 + $0x10] sm:$0xff] %vm1041_vm0, %v4291_v49 }
 0xe9b   : > { %4294 = vst.msk [vmem:[#allocation3 + $0x8] sm:$0xff] %vm1041_vm0, %v4282_v24 }
 0xea7   : > { %v4276_v46 = vpop.permute.xlu1 %4275 }
 0xea8   : > { %v4281_v27 = vadd.f32 %v4276_v46, %v4261_v4 }
 0xeaa   : > { %4293 = vst.msk [vmem:[#allocation3] sm:$0xff] %vm1041_vm0, %v4281_v27 }
 0xeae   : > { %4300 = sbr.rel (%p4751_p2) target bundleno = 3767 (0xeb7), region = 68 }
 0xeaf   : > { %v4288_v13 = vpop.permute.xlu1 %4287 }
 0xeb0   : > { %v4292_v14 = vsub.f32 %v4270_v35, %v4288_v13 }
 0xeb2   : > { %4296 = vst.msk [vmem:[#allocation3 + $0x18] sm:$0xff] %vm1041_vm0, %v4292_v14 }
 0xeb3   : > { %4301 = vst.msk [vmem:[%s5471_s1] sm:$0xff] %vm1041_vm0, %v4281_v27 }
 0xeb4   : > { %4302 = vst.msk [vmem:[%s5471_s1 + $0x8] sm:$0xff] %vm1041_vm0, %v4282_v24 }
 0xeb5   : > { %4303 = vst.msk [vmem:[%s5471_s1 + $0x10] sm:$0xff] %vm1041_vm0, %v4291_v49 }
 0xeb6   : > { %4304 = vst.msk [vmem:[%s5471_s1 + $0x18] sm:$0xff] %vm1041_vm0, %v4292_v14 }
 0xeb7 PF: > { %s6485_s0 = sadd.s32 4294967295, %s5227_s28   ;;  %s6343_s18 = sshll.u32 %s5215_s25, 5 }
 0xeb8   : > { %s6340_s24 = sand.u32 1, %s6485_s0   ;;  %s4344_s13 = scalar_lea.hbm %s6447_s11, %s6343_s18 }
 0xeb9   : > { %s4345_s26 = sshll.u32 %s5473_s29, 4  ;;  %s4347_s30 = sshll.u32 %s4344_s13, 4  ;;  %s4346_s26 = int_to_ptr.vmem [resolvable:$true] %s4345_s26  ;;  %s4348_s30 = int_to_ptr.hbm [resolvable:$true] %s4347_s30 }
 0xeba   : > { %s4311_s16 = scalar_lea.sflag [#allocation9], %s6340_s24  ;;  %s5087_s17 = sshra.s32 %s4348_s30, 4  ;;  %s5088_s17 = int_to_ptr.hbm [resolvable:$true] %s5087_s17 }
 0xebb   : > { %s5089_s23 = scalar_lea.hbm %s5088_s17, 32  ;;  %s5093_s27 = scalar_lea.hbm %s6447_s11, 64 }
 0xebc   : > { %p5090_p4 = scmp.ne.s32.totalorder %s5088_s17, %s5089_s23  ;;  %p5094_p7 = scmp.lt.s32.totalorder %s5088_s17, %s6447_s11 }
 0xebd   : > { %p5095_p8 = scmp.lt.s32.totalorder %s5093_s27, %s5089_s23 }
 0xebe   : > { %p5091_p5 = pnand %p5090_p4, %p5364_p3 }
 0xebf   : > { %p5096_p10 = por %p5095_p8, %p5094_p7 }
 0xec0   : > { %p5092_p6 = pneg %p5091_p5 }
 0xec2   : > { %p5097_p11 = pnand %p5096_p10, %p5092_p6 }
 0xec4   : > { %5100 = shalt.err (!%p5097_p11)
}
 0xec5   : > { %s5246_s29 = smov 128   ;;  %s5247_s12 = smov 8  }
 0xec6   : > { %4771 = dma.vmem_to_hbm [thread:$0]  (%p5364_p3), %s4346_s26, 512, %s4348_s30, %s4311_s16, %s5246_s29, %s5246_s29, %s5247_s12  }
 0xec7   : > { %s6486_s21 = sld [smem:[#allocation27_spill]]  ;;  %s4328_s23 = sshll.u32 %s5471_s1, 4  ;;  %s4329_s23 = int_to_ptr.vmem [resolvable:$true] %s4328_s23 }
 0xec8   : > { %s6488_s25 = sand.u32 1, %s5203_s22  }
 0xec9   : > { %s4306_s27 = scalar_lea.sflag [#allocation7], %s6488_s25 }
 0xecd   : > { %s6487_s13 = smov %s6486_s21  ;;  %s4327_s17 = scalar_lea.hbm %s6486_s21, %s6343_s18 }
 0xece   : > { %s4330_s14 = sshll.u32 %s4327_s17, 4  ;;  %s5121_s26 = scalar_lea.hbm %s6487_s13, 64  ;;  %s4331_s14 = int_to_ptr.hbm [resolvable:$true] %s4330_s14 }
 0xecf   : > { %s5115_s20 = sshra.s32 %s4331_s14, 4  ;;  %s5116_s20 = int_to_ptr.hbm [resolvable:$true] %s5115_s20 }
 0xed0   : > { %s5117_s19 = scalar_lea.hbm %s5116_s20, 32  ;;  %p5122_p1 = scmp.lt.s32.totalorder %s5116_s20, %s6487_s13 }
 0xed1   : > { %p5118_p12 = scmp.ne.s32.totalorder %s5116_s20, %s5117_s19  ;;  %p5123_p2 = scmp.lt.s32.totalorder %s5121_s26, %s5117_s19 }
 0xed3   : > { %p5119_p13 = pnand %p5118_p12, %p5364_p3  ;;  %p5124_p4 = por %p5123_p2, %p5122_p1 }
 0xed5   : > { %p5120_p0 = pneg %p5119_p13 }
 0xed7   : > { %p5125_p5 = pnand %p5124_p4, %p5120_p0 }
 0xed9   : > { %5128 = shalt.err (!%p5125_p5)
}
 0xeda   : > { %4770 = dma.vmem_to_hbm [thread:$0]  (%p5364_p3), %s4329_s23, 512, %s4331_s14, %s4306_s27, %s5246_s29, %s5246_s29, %s5247_s12  }
 0xedb   : > { %s6489_s4 = sld [smem:[#allocation28_spill]]  ;;  %s4362_s21 = sshll.u32 %s5475_s2, 4  ;;  %s4363_s21 = int_to_ptr.vmem [resolvable:$true] %s4362_s21 }
 0xee1   : > { %s4361_s10 = scalar_lea.hbm %s6489_s4, %s6343_s18  ;;  %s5149_s30 = scalar_lea.hbm %s6489_s4, 64 }
 0xee2   : > { %s4364_s17 = sshll.u32 %s4361_s10, 4  ;;  %s4365_s17 = int_to_ptr.hbm [resolvable:$true] %s4364_s17 }
 0xee3   : > { %s5143_s25 = sshra.s32 %s4365_s17, 4  ;;  %s5144_s25 = int_to_ptr.hbm [resolvable:$true] %s5143_s25 }
 0xee4   : > { %s5145_s20 = scalar_lea.hbm %s5144_s25, 32  ;;  %p5150_p10 = scmp.lt.s32.totalorder %s5144_s25, %s6489_s4 }
 0xee5   : > { %p5146_p6 = scmp.ne.s32.totalorder %s5144_s25, %s5145_s20  ;;  %p5151_p11 = scmp.lt.s32.totalorder %s5149_s30, %s5145_s20 }
 0xee7   : > { %p5147_p7 = pnand %p5146_p6, %p5364_p3  ;;  %p5152_p12 = por %p5151_p11, %p5150_p10 }
 0xee9   : > { %p5148_p8 = pneg %p5147_p7 }
 0xeeb   : > { %p5153_p13 = pnand %p5152_p12, %p5148_p8 }
 0xeed   : > { %5156 = shalt.err (!%p5153_p13)
}
 0xeee   : > { %4772 = dma.vmem_to_hbm [thread:$0]  (%p5364_p3), %s4363_s21, 512, %s4365_s17, %s4311_s16, %s5246_s29, %s5246_s29, %s5247_s12  }
 0xeef PF: > { %s6490_s2 = sld [smem:[#allocation13_spill]]  ;;  %p4786_p0 = scmp.ge.s32.totalorder %s5227_s28, 2 }
 0xef1   : > { %p4777_p1 = pnand %p4786_p0, %p5376_p9 }
 0xef3   : > { %p4778_p2 = pneg %p4777_p1 }
 0xef5   : > { %s4379_s27 = sand.u32 1, %s6490_s2  }
 0xef6   : > { %s4380_s0 = scalar_lea.sflag [#allocation7], %s4379_s27 }
 0xef7   : > { %5190 = dma.done.wait (%p4778_p2), %s4380_s0, 512  }
 0xef8   : > { %5192 = vsyncadd (%p4778_p2), %s4380_s0, 4294966784  ;;  %s6492_s15 = sadd.s32 4294967294, %s5227_s28  }
 0xef9   : > { %s4389_s1 = sand.u32 1, %s6492_s15  }
 0xefa   : > { %s4390_s3 = scalar_lea.sflag [#allocation9], %s4389_s1 }
 0xefb   : > { %5194 = dma.done.wait (%p4778_p2), %s4390_s3, 1024  }
 0xefc   : > { %5196 = vsyncadd (%p4778_p2), %s4390_s3, 4294966272  ;;  %s29_s28 = sadd.s32 1, %s5227_s28   ;;  %s6493_s24 = sld [smem:[#allocation14_spill]] }
 0xefd   : > { %p26_p3 = scmp.ge.s32.totalorder %s29_s28, 12   ;;  %s6494_s23 = sld [smem:[#allocation20_spill]] }
 0xefe   : > { %s6495_s16 = sld [smem:[#allocation15_spill]]  ;;  %s6499_s21 = smov %s5203_s22 }
 0xeff   : > { %s6496_s25 = sld [smem:[#allocation16_spill]] }
 0xf00   : > { %s6497_s26 = sld [smem:[#allocation17_spill]]  ;;  %28 = sbr.rel (!%p26_p3) target bundleno = 15 (0xf), region = 199 }
 0xf01   : > { %s6498_s27 = sld [smem:[#allocation18_spill]] }
 0xf02   : > { %s6500_s22 = smov %s6493_s24 }
 0xf04   : > { %s6501_s24 = smov %s6495_s16 }
 0xf05   :  { %4406 = vsyncpa [#allocation7], 1 }
 0xf06   :  { %4408 = vsyncpa [#allocation7 + $0x1], 1 }
 0xf07   :  { %4409 = vsyncpa [#allocation9], 1 }
 0xf08   :  { %4411 = vsyncpa [#allocation9 + $0x1], 1 }

</bundles_post_ra>
